<compile_context>
chip_gen: v6e
topology: v6e:2x2x1
jax: 0.10.0
libtpu: 0.0.40
codegen_flags: <defaults>
</compile_context>

<pallas_src>
import functools
import math

import jax
import jax.numpy as jnp
from jax.experimental import pallas as pl
from jax.experimental.pallas import tpu as pltpu


# ----------------------------------------------------------------------------
# Pallas kernel: TB sessions per grid step.
# ----------------------------------------------------------------------------
def _sgnn_kernel(A_ref, hid_ref,
                 w_node_ref, b_node_ref, b_iaoh_ref,
                 w_ih_ref, b_ih_ref,
                 w_q_ref, b_q_ref, w_kv_ref, b_kv_ref,
                 hw_w_ref, hw_b_ref,
                 hidden_out_ref, gemb_out_ref,
                 *, step):
    TB, S, H = hid_ref.shape
    N = TB * S
    f32 = jnp.float32
    mm = w_node_ref.dtype                                  # MXU operand dtype (bf16)

    hid0_3d = hid_ref[...].astype(f32)                     # [TB, S, H]
    hid0 = hid0_3d.reshape(N, H)                           # [N, H]
    A = A_ref[...]                                         # [N, 2N]  block-diag (in | out)
    A_in, A_out = A[:, :N], A[:, N:]

    w_node = w_node_ref[...]                               # [H, 5H] = (w_hh | edge_in | edge_out)
    b_node = b_node_ref[...]                               # [1, 5H]  f32
    b_iaoh = b_iaoh_ref[...]                               # [2, H]   f32 (b_iah, b_oah)
    w_ih_t = w_ih_ref[...]                                 # [2H, 3H]
    b_ih = b_ih_ref[...]                                   # [1, 3H]  f32
    w_q = w_q_ref[...]                                     # [H, H]   (1/sqrt(H) folded in)
    b_q = b_q_ref[...]                                     # [1, H]   f32 (scaled)
    w_kv = w_kv_ref[...]                                   # [H, 2H]  = (k | v·W_out)
    b_kv = b_kv_ref[...]                                   # [1, 2H]  f32 (v part: b_v·W_out + b_out)
    hw_w_t = hw_w_ref[...]                                 # [2H, H]
    hw_b = hw_b_ref[...]                                   # [1, H]   f32

    # g_emb init: torch.mean(hidden, dim=1) -> [TB, H]   (exact, f32)
    g_emb = jnp.mean(hid0_3d, axis=1)
    hidden = hid0

    # `step` is tiny & static -> fully unrolled so the LLO scheduler can interleave
    # the small MXU / EUP ops of consecutive steps.
    for _ in range(step):
        hid_mm = hidden.astype(mm)

        # ---- fused node-wise linears: gh | edge_in | edge_out -----------------
        node = jnp.dot(hid_mm, w_node, preferred_element_type=f32) + b_node    # [N, 5H]
        gh = node[:, :3 * H]                                                    # [N, 3H]
        eh_in = node[:, 3 * H:4 * H].astype(mm)                                 # [N, H]
        eh_out = node[:, 4 * H:].astype(mm)                                     # [N, H]

        # ---- graph propagation: two full-size block-diagonal MXU matmuls ------
        input_in = jnp.dot(A_in, eh_in, preferred_element_type=f32) + b_iaoh[0:1]
        input_out = jnp.dot(A_out, eh_out, preferred_element_type=f32) + b_iaoh[1:2]

        # ---- K-fused gi dot ([N,2H] @ [2H,3H]) ---------------------------------
        inp = jnp.concatenate([input_in, input_out], axis=1)                    # [N, 2H]
        gi = jnp.dot(inp.astype(mm), w_ih_t, preferred_element_type=f32) + b_ih  # [N, 3H]

        # ---- GRU gating (one sigmoid over the full [N, 2H] slab) --------------
        gates = jax.nn.sigmoid(gi[:, :2 * H] + gh[:, :2 * H])
        resetgate, inputgate = gates[:, :H], gates[:, H:]
        newgate = jnp.tanh(gi[:, 2 * H:] + resetgate * gh[:, 2 * H:])
        hy = newgate + inputgate * (hidden - newgate)                           # [N, H]

        # ---- attn1: softmax over ONE key => weights == 1.0 exactly, so
        #      hy_new = hy + 1*g_emb - 1*hy  (same fp order as the PyTorch code).
        hy3 = hy.reshape(TB, S, H)
        hy_new = (hy3 + g_emb[:, None, :] - hy3).reshape(N, H)

        # ---- attn2 / star update (scale folded into q, out-proj folded into v) -
        q2 = jnp.dot(g_emb.astype(mm), w_q, preferred_element_type=f32) + b_q    # [TB, H]
        kv = jnp.dot(hy_new.astype(mm), w_kv, preferred_element_type=f32) + b_kv  # [N, 2H]
        k2 = kv[:, :H].reshape(TB, S, H)
        v2 = kv[:, H:].reshape(TB, S, H)
        s2 = jnp.sum(q2[:, None, :] * k2, axis=2)                               # [TB, S]
        e2 = jnp.exp(s2 - jnp.max(s2, axis=1, keepdims=True))
        # exact softmax (division): the out-projection fold relies on sum(w)==1.
        w2 = e2 / jnp.sum(e2, axis=1, keepdims=True)
        g_emb = jnp.sum(w2[:, :, None] * v2, axis=1)                            # [TB, H] == g_new
        hidden = hy_new

    # ---- highway network: one K=2H dot ----------------------------------------
    hw_in = jnp.concatenate([hid0, hidden], axis=1).astype(mm)                  # [N, 2H]
    gate = jax.nn.sigmoid(jnp.dot(hw_in, hw_w_t, preferred_element_type=f32) + hw_b)
    out = hidden + gate * hid0 - gate * hidden

    hidden_out_ref[...] = out.reshape(TB, S, H).astype(hidden_out_ref.dtype)
    gemb_out_ref[...] = g_emb.astype(gemb_out_ref.dtype)


# ----------------------------------------------------------------------------
# Wrapper: weight packing / folding, block-diagonal A, pallas_call.
# ----------------------------------------------------------------------------
def session_graph_forward(params, inputs, A, mask, alias_inputs, *,
                          step=1, batch_tile=None, matmul_dtype=jnp.bfloat16):
    # mask / alias_inputs are unused by the PyTorch forward() as well (they only
    # matter in compute_scores / training); accepted for interface parity.
    del mask, alias_inputs

    f32 = jnp.float32
    emb = params["embedding"]
    hidden = emb[inputs].astype(f32)                       # [B, S, H] gather in plain JAX
    B, S, H = hidden.shape

    # Batch tile: TB*S rows per node matmul. TB=32 -> 256 rows (v6e/v7x 256-wide MXU);
    # keep TB=16 when B < 64 so the grid still has >= 2 parallel steps (v7x: 2 TCs),
    # and 128 rows already fill v5e's MXU.
    if batch_tile is None:
        batch_tile = 32 if B >= 64 else 16
    TB = max(1, min(batch_tile, B))
    G = -(-B // TB)                                        # cdiv
    Bp = G * TB
    if Bp != B:
        pad = Bp - B
        hidden = jnp.pad(hidden, ((0, pad), (0, 0), (0, 0)))
        A = jnp.pad(A, ((0, pad), (0, 0), (0, 0)))
    N = TB * S

    # ---- block-diagonal adjacency: lane-dense [G, N, 2N] bf16 MXU operand -----
    A_r = A.astype(f32).reshape(G, TB, S, 2 * S)
    eye = jnp.eye(TB, dtype=f32)

    def block_diag(x):                                     # [G, TB, S, S] -> [G, N, N]
        return jnp.einsum('gbij,bc->gbicj', x, eye).reshape(G, N, N)

    A_bd = jnp.concatenate([block_diag(A_r[..., :S]), block_diag(A_r[..., S:])],
                           axis=-1).astype(matmul_dtype)   # [G, N, 2N]

    # ---- pack / fuse / pre-transpose weights (one-off, wrapper side, f32 math) -
    scale = float(H) ** -0.5
    w_node = jnp.concatenate(
        [params["w_hh"].T, params["edge_in_w"].T, params["edge_out_w"].T],
        axis=1).astype(matmul_dtype)                       # [H, 5H]
    b_node = jnp.concatenate(
        [params["b_hh"], params["edge_in_b"], params["edge_out_b"]])[None, :].astype(f32)
    b_iaoh = jnp.stack([params["b_iah"], params["b_oah"]]).astype(f32)          # [2, H]
    w_ih_t = params["w_ih"].T.astype(matmul_dtype)         # [2H, 3H]
    b_ih = params["b_ih"][None, :].astype(f32)             # [1, 3H]

    a2w, a2b = params["attn2_in_w"], params["attn2_in_b"]
    out_w_t = params["attn2_out_w"].T                      # [H, H]
    w_q = (a2w[:H].T * scale).astype(matmul_dtype)         # scale folded into q proj
    b_q = (a2b[:H] * scale)[None, :].astype(f32)
    w_v_f = a2w[2 * H:].T @ out_w_t                        # out-proj folded into v proj
    b_v_f = a2b[2 * H:] @ out_w_t + params["attn2_out_b"]
    w_kv = jnp.concatenate([a2w[H:2 * H].T, w_v_f], axis=1).astype(matmul_dtype)  # [H, 2H]
    b_kv = jnp.concatenate([a2b[H:2 * H], b_v_f])[None, :].astype(f32)             # [1, 2H]
    hw_w_t = params["highway_w"].T.astype(matmul_dtype)    # [2H, H]
    hw_b = params["highway_b"][None, :].astype(f32)        # [1, H]
    # NOTE: attn1's projections are mathematically unused in forward() — its attention
    # is over a single key so the weights are identically 1.0.

    kernel = functools.partial(_sgnn_kernel, step=step)

    def rep(shape):  # replicated (weight) block: full array, same block every step
        return pl.BlockSpec(shape, lambda b, n=len(shape): (0,) * n)

    grid_spec = pltpu.PrefetchScalarGridSpec(
        num_scalar_prefetch=0,
        grid=(G,),
        in_specs=[
            pl.BlockSpec((None, N, 2 * N), lambda b: (b, 0, 0)),   # block-diag A (lane dense)
            pl.BlockSpec((TB, S, H), lambda b: (b, 0, 0)),         # item embeddings
            rep((H, 5 * H)), rep((1, 5 * H)), rep((2, H)),
            rep((2 * H, 3 * H)), rep((1, 3 * H)),
            rep((H, H)), rep((1, H)), rep((H, 2 * H)), rep((1, 2 * H)),
            rep((2 * H, H)), rep((1, H)),
        ],
        out_specs=[
            pl.BlockSpec((TB, S, H), lambda b: (b, 0, 0)),         # hidden
            pl.BlockSpec((TB, H), lambda b: (b, 0)),               # g_emb as 2-D [B, H]
        ],
    )

    hidden_out, gemb_out = pl.pallas_call(
        kernel,
        out_shape=(jax.ShapeDtypeStruct((Bp, S, H), f32),
                   jax.ShapeDtypeStruct((Bp, H), f32)),
        grid_spec=grid_spec,
        compiler_params=pltpu.CompilerParams(
            dimension_semantics=("parallel",),
            # Informational only: per-block footprint is ~0.3 MiB, far below every
            # generation's VMEM, so this never constrains TB or pipeline depth.
            vmem_limit_bytes=32 * 1024 * 1024),
    )(A_bd, hidden, w_node, b_node, b_iaoh, w_ih_t, b_ih,
      w_q, b_q, w_kv, b_kv, hw_w_t, hw_b)

    return hidden_out[:B], gemb_out[:B, None, :]


# ----------------------------------------------------------------------------
# Pure-JAX reference (mirrors the PyTorch code, incl. the degenerate attn1).
# ----------------------------------------------------------------------------
def reference_forward(params, inputs, A, *, step=1):
    emb = params["embedding"]
    hidden = emb[inputs]
    B, S, H = hidden.shape
    hidden_orig = hidden
    g_emb = jnp.mean(hidden, axis=1, keepdims=True)

    def linear(x, w, b):
        return jnp.einsum('...i,oi->...o', x, w) + b

    scale = H ** -0.5
    for _ in range(step):
        eh_in = linear(hidden, params["edge_in_w"], params["edge_in_b"])
        eh_out = linear(hidden, params["edge_out_w"], params["edge_out_b"])
        input_in = jnp.matmul(A[:, :, :S], eh_in) + params["b_iah"]
        input_out = jnp.matmul(A[:, :, S:2 * S], eh_out) + params["b_oah"]
        inputs_cat = jnp.concatenate([input_in, input_out], axis=2)
        gi = linear(inputs_cat, params["w_ih"], params["b_ih"])
        gh = linear(hidden, params["w_hh"], params["b_hh"])
        i_r, i_i, i_n = jnp.split(gi, 3, axis=2)
        h_r, h_i, h_n = jnp.split(gh, 3, axis=2)
        resetgate = jax.nn.sigmoid(i_r + h_r)
        inputgate = jax.nn.sigmoid(i_i + h_i)
        newgate = jnp.tanh(i_n + resetgate * h_n)
        hy = newgate + inputgate * (hidden - newgate)

        a1w, a1b = params["attn1_in_w"], params["attn1_in_b"]
        q1 = linear(hy, a1w[:H], a1b[:H]) * scale
        k1 = linear(g_emb, a1w[H:2 * H], a1b[H:2 * H])
        w1 = jax.nn.softmax(jnp.einsum('bqh,bkh->bqk', q1, k1), axis=-1)   # [B,S,1] == 1
        hy_new = hy + w1 * g_emb - w1 * hy

        a2w, a2b = params["attn2_in_w"], params["attn2_in_b"]
        q2 = linear(g_emb, a2w[:H], a2b[:H]) * scale
        k2 = linear(hy_new, a2w[H:2 * H], a2b[H:2 * H])
        v2 = linear(hy_new, a2w[2 * H:], a2b[2 * H:])
        w2 = jax.nn.softmax(jnp.einsum('bqh,bkh->bqk', q2, k2), axis=-1)   # [B,1,S]
        ctx = jnp.einsum('bqk,bkh->bqh', w2, v2)
        g_emb = linear(ctx, params["attn2_out_w"], params["attn2_out_b"])
        hidden = hy_new

    gate = jax.nn.sigmoid(linear(jnp.concatenate([hidden_orig, hidden], axis=2),
                                 params["highway_w"], params["highway_b"]))
    out = hidden + gate * hidden_orig - gate * hidden
    return out, g_emb


# ----------------------------------------------------------------------------
# Deterministic parameter init (uniform(-1/sqrt(H), 1/sqrt(H)) like reset_parameters)
# ----------------------------------------------------------------------------
def init_params(key, n_node, H):
    stdv = 1.0 / math.sqrt(H)
    shapes = {
        "embedding": (n_node, H),
        "w_ih": (3 * H, 2 * H), "w_hh": (3 * H, H),
        "b_ih": (3 * H,), "b_hh": (3 * H,),
        "b_iah": (H,), "b_oah": (H,),
        "edge_in_w": (H, H), "edge_in_b": (H,),
        "edge_out_w": (H, H), "edge_out_b": (H,),
        "attn1_in_w": (3 * H, H), "attn1_in_b": (3 * H,),
        "attn2_in_w": (3 * H, H), "attn2_in_b": (3 * H,),
        "attn2_out_w": (H, H), "attn2_out_b": (H,),
        "highway_w": (H, 2 * H), "highway_b": (H,),
    }
    keys = jax.random.split(key, len(shapes))
    return {name: jax.random.uniform(k, shp, jnp.float32, -stdv, stdv)
            for (name, shp), k in zip(shapes.items(), keys)}
    # TODO(synk): loss_function / optimizer / scheduler / compute_scores are
    # training-time utilities not part of forward(); intentionally not ported.


if __name__ == "__main__":
    B, S, H, n_node = 32, 8, 32, 64
    key = jax.random.PRNGKey(0)
    kp, ki, ka = jax.random.split(key, 3)

    params = init_params(kp, n_node, H)
    inputs = jax.random.randint(ki, (B, S), 0, n_node)                 # item ids
    A = jax.random.uniform(ka, (B, S, 2 * S), jnp.float32)             # in/out adjacency
    mask = jnp.ones((B, S), jnp.float32)
    alias_inputs = jnp.tile(jnp.arange(S, dtype=jnp.int32)[None, :], (B, 1))

    for step in (1, 2):
        hid_out, gemb_out = session_graph_forward(params, inputs, A, mask,
                                                  alias_inputs, step=step)
        jax.block_until_ready((hid_out, gemb_out))

        ref_h, ref_g = reference_forward(params, inputs, A, step=step)
        assert hid_out.shape == (B, S, H) and gemb_out.shape == (B, 1, H)
        # bf16 MXU operands + f32 accumulation + folded attn2 out-projection
        # -> compare with relaxed tolerance.
        assert jnp.allclose(hid_out, ref_h, atol=3e-2, rtol=3e-2), f"hidden mismatch (step={step})"
        assert jnp.allclose(gemb_out, ref_g, atol=3e-2, rtol=3e-2), f"g_emb mismatch (step={step})"

    print("KERNEL_OK")
</pallas_src>

<mosaic_0001>
module attributes {stable_mosaic.version = 11 : i64} {
  func.func @_sgnn_kernel(%arg0: i32, %arg1: memref<1x128x256xbf16, #tpu.memory_space<vmem>>, %arg2: memref<16x8x32xf32, #tpu.memory_space<vmem>>, %arg3: memref<32x160xbf16, #tpu.memory_space<vmem>>, %arg4: memref<1x160xf32, #tpu.memory_space<vmem>>, %arg5: memref<2x32xf32, #tpu.memory_space<vmem>>, %arg6: memref<64x96xbf16, #tpu.memory_space<vmem>>, %arg7: memref<1x96xf32, #tpu.memory_space<vmem>>, %arg8: memref<32x32xbf16, #tpu.memory_space<vmem>>, %arg9: memref<1x32xf32, #tpu.memory_space<vmem>>, %arg10: memref<32x64xbf16, #tpu.memory_space<vmem>>, %arg11: memref<1x64xf32, #tpu.memory_space<vmem>>, %arg12: memref<64x32xbf16, #tpu.memory_space<vmem>>, %arg13: memref<1x32xf32, #tpu.memory_space<vmem>>, %arg14: memref<16x8x32xf32, #tpu.memory_space<vmem>>, %arg15: memref<16x32xf32, #tpu.memory_space<vmem>>) attributes {dimension_semantics = [#tpu.dimension_semantics<parallel>], iteration_bounds = array<i64: 2>, scalar_prefetch = 0 : i64, scratch_operands = 0 : i64, tpu.core_type = #tpu.core_type<tc>, window_params = [{transform_indices = @transform_0, window_bounds = array<i64: 1, 128, 256>}, {transform_indices = @transform_1, window_bounds = array<i64: 16, 8, 32>}, {pipeline_mode = #tpu.pipeline_mode<synchronous>, transform_indices = @transform_2, window_bounds = array<i64: 32, 160>}, {pipeline_mode = #tpu.pipeline_mode<synchronous>, transform_indices = @transform_3, window_bounds = array<i64: 1, 160>}, {pipeline_mode = #tpu.pipeline_mode<synchronous>, transform_indices = @transform_4, window_bounds = array<i64: 2, 32>}, {pipeline_mode = #tpu.pipeline_mode<synchronous>, transform_indices = @transform_5, window_bounds = array<i64: 64, 96>}, {pipeline_mode = #tpu.pipeline_mode<synchronous>, transform_indices = @transform_6, window_bounds = array<i64: 1, 96>}, {pipeline_mode = #tpu.pipeline_mode<synchronous>, transform_indices = @transform_7, window_bounds = array<i64: 32, 32>}, {pipeline_mode = #tpu.pipeline_mode<synchronous>, transform_indices = @transform_8, window_bounds = array<i64: 1, 32>}, {pipeline_mode = #tpu.pipeline_mode<synchronous>, transform_indices = @transform_9, window_bounds = array<i64: 32, 64>}, {pipeline_mode = #tpu.pipeline_mode<synchronous>, transform_indices = @transform_10, window_bounds = array<i64: 1, 64>}, {pipeline_mode = #tpu.pipeline_mode<synchronous>, transform_indices = @transform_11, window_bounds = array<i64: 64, 32>}, {pipeline_mode = #tpu.pipeline_mode<synchronous>, transform_indices = @transform_12, window_bounds = array<i64: 1, 32>}, {transform_indices = @transform_13, window_bounds = array<i64: 16, 8, 32>}, {transform_indices = @transform_14, window_bounds = array<i64: 16, 32>}]} {
    %c0 = arith.constant 0 : index
    %c0_0 = arith.constant 0 : index
    %c0_1 = arith.constant 0 : index
    %0 = vector.load %arg2[%c0, %c0_0, %c0_1] : memref<16x8x32xf32, #tpu.memory_space<vmem>>, vector<16x8x32xf32>
    %1 = vector.shape_cast %0 : vector<16x8x32xf32> to vector<128x32xf32>
    %c0_2 = arith.constant 0 : index
    %c0_3 = arith.constant 0 : index
    %c0_4 = arith.constant 0 : index
    %2 = vector.load %arg1[%c0_2, %c0_3, %c0_4] : memref<1x128x256xbf16, #tpu.memory_space<vmem>>, vector<1x128x256xbf16>
    %3 = vector.shape_cast %2 : vector<1x128x256xbf16> to vector<128x256xbf16>
    %4 = vector.extract_strided_slice %3 {offsets = [0, 0], sizes = [128, 128], strides = [1, 1]} : vector<128x256xbf16> to vector<128x128xbf16>
    %5 = vector.extract_strided_slice %3 {offsets = [0, 128], sizes = [128, 128], strides = [1, 1]} : vector<128x256xbf16> to vector<128x128xbf16>
    %c0_5 = arith.constant 0 : index
    %c0_6 = arith.constant 0 : index
    %6 = vector.load %arg3[%c0_5, %c0_6] : memref<32x160xbf16, #tpu.memory_space<vmem>>, vector<32x160xbf16>
    %c0_7 = arith.constant 0 : index
    %c0_8 = arith.constant 0 : index
    %7 = vector.load %arg4[%c0_7, %c0_8] : memref<1x160xf32, #tpu.memory_space<vmem>>, vector<1x160xf32>
    %c0_9 = arith.constant 0 : index
    %c0_10 = arith.constant 0 : index
    %8 = vector.load %arg5[%c0_9, %c0_10] : memref<2x32xf32, #tpu.memory_space<vmem>>, vector<2x32xf32>
    %c0_11 = arith.constant 0 : index
    %c0_12 = arith.constant 0 : index
    %9 = vector.load %arg6[%c0_11, %c0_12] : memref<64x96xbf16, #tpu.memory_space<vmem>>, vector<64x96xbf16>
    %c0_13 = arith.constant 0 : index
    %c0_14 = arith.constant 0 : index
    %10 = vector.load %arg7[%c0_13, %c0_14] : memref<1x96xf32, #tpu.memory_space<vmem>>, vector<1x96xf32>
    %c0_15 = arith.constant 0 : index
    %c0_16 = arith.constant 0 : index
    %11 = vector.load %arg8[%c0_15, %c0_16] : memref<32x32xbf16, #tpu.memory_space<vmem>>, vector<32x32xbf16>
    %c0_17 = arith.constant 0 : index
    %c0_18 = arith.constant 0 : index
    %12 = vector.load %arg9[%c0_17, %c0_18] : memref<1x32xf32, #tpu.memory_space<vmem>>, vector<1x32xf32>
    %c0_19 = arith.constant 0 : index
    %c0_20 = arith.constant 0 : index
    %13 = vector.load %arg10[%c0_19, %c0_20] : memref<32x64xbf16, #tpu.memory_space<vmem>>, vector<32x64xbf16>
    %c0_21 = arith.constant 0 : index
    %c0_22 = arith.constant 0 : index
    %14 = vector.load %arg11[%c0_21, %c0_22] : memref<1x64xf32, #tpu.memory_space<vmem>>, vector<1x64xf32>
    %c0_23 = arith.constant 0 : index
    %c0_24 = arith.constant 0 : index
    %15 = vector.load %arg12[%c0_23, %c0_24] : memref<64x32xbf16, #tpu.memory_space<vmem>>, vector<64x32xbf16>
    %c0_25 = arith.constant 0 : index
    %c0_26 = arith.constant 0 : index
    %16 = vector.load %arg13[%c0_25, %c0_26] : memref<1x32xf32, #tpu.memory_space<vmem>>, vector<1x32xf32>
    %cst = arith.constant dense<0.000000e+00> : vector<16x32xf32>
    %17 = vector.multi_reduction <add>, %0, %cst [1] : vector<16x8x32xf32> to vector<16x32xf32>
    %cst_27 = arith.constant 8.000000e+00 : f32
    %18 = vector.broadcast %cst_27 : f32 to vector<16x32xf32>
    %19 = arith.divf %17, %18 : vector<16x32xf32>
    %20 = arith.truncf %1 : vector<128x32xf32> to vector<128x32xbf16>
    %cst_28 = arith.constant dense<0.000000e+00> : vector<128x160xf32>
    %21 = tpu.matmul %20, %6, %cst_28 {dimension_numbers = #tpu.dot_dimension_numbers<[1], [0], [0], [1], [0, 0, 1, 1], [], []>} : vector<128x32xbf16>, vector<32x160xbf16>, vector<128x160xf32> -> vector<128x160xf32>
    %22 = vector.broadcast %7 : vector<1x160xf32> to vector<128x160xf32>
    %23 = arith.addf %21, %22 : vector<128x160xf32>
    %24 = vector.extract_strided_slice %23 {offsets = [0, 0], sizes = [128, 96], strides = [1, 1]} : vector<128x160xf32> to vector<128x96xf32>
    %25 = vector.extract_strided_slice %23 {offsets = [0, 96], sizes = [128, 32], strides = [1, 1]} : vector<128x160xf32> to vector<128x32xf32>
    %26 = arith.truncf %25 : vector<128x32xf32> to vector<128x32xbf16>
    %27 = vector.extract_strided_slice %23 {offsets = [0, 128], sizes = [128, 32], strides = [1, 1]} : vector<128x160xf32> to vector<128x32xf32>
    %28 = arith.truncf %27 : vector<128x32xf32> to vector<128x32xbf16>
    %cst_29 = arith.constant dense<0.000000e+00> : vector<128x32xf32>
    %29 = tpu.matmul %4, %26, %cst_29 {dimension_numbers = #tpu.dot_dimension_numbers<[1], [0], [0], [1], [0, 0, 1, 1], [], []>} : vector<128x128xbf16>, vector<128x32xbf16>, vector<128x32xf32> -> vector<128x32xf32>
    %30 = vector.extract_strided_slice %8 {offsets = [0, 0], sizes = [1, 32], strides = [1, 1]} : vector<2x32xf32> to vector<1x32xf32>
    %31 = vector.broadcast %30 : vector<1x32xf32> to vector<128x32xf32>
    %32 = arith.addf %29, %31 : vector<128x32xf32>
    %cst_30 = arith.constant dense<0.000000e+00> : vector<128x32xf32>
    %33 = tpu.matmul %5, %28, %cst_30 {dimension_numbers = #tpu.dot_dimension_numbers<[1], [0], [0], [1], [0, 0, 1, 1], [], []>} : vector<128x128xbf16>, vector<128x32xbf16>, vector<128x32xf32> -> vector<128x32xf32>
    %34 = vector.extract_strided_slice %8 {offsets = [1, 0], sizes = [1, 32], strides = [1, 1]} : vector<2x32xf32> to vector<1x32xf32>
    %35 = vector.broadcast %34 : vector<1x32xf32> to vector<128x32xf32>
    %36 = arith.addf %33, %35 : vector<128x32xf32>
    %37 = tpu.concatenate %32, %36 in 1 : vector<128x32xf32>, vector<128x32xf32> -> vector<128x64xf32>
    %38 = arith.truncf %37 : vector<128x64xf32> to vector<128x64xbf16>
    %cst_31 = arith.constant dense<0.000000e+00> : vector<128x96xf32>
    %39 = tpu.matmul %38, %9, %cst_31 {dimension_numbers = #tpu.dot_dimension_numbers<[1], [0], [0], [1], [0, 0, 1, 1], [], []>} : vector<128x64xbf16>, vector<64x96xbf16>, vector<128x96xf32> -> vector<128x96xf32>
    %40 = vector.broadcast %10 : vector<1x96xf32> to vector<128x96xf32>
    %41 = arith.addf %39, %40 : vector<128x96xf32>
    %42 = vector.extract_strided_slice %41 {offsets = [0, 0], sizes = [128, 64], strides = [1, 1]} : vector<128x96xf32> to vector<128x64xf32>
    %43 = vector.extract_strided_slice %24 {offsets = [0, 0], sizes = [128, 64], strides = [1, 1]} : vector<128x96xf32> to vector<128x64xf32>
    %44 = arith.addf %42, %43 : vector<128x64xf32>
    %45 = arith.negf %44 : vector<128x64xf32>
    %46 = math.exp %45 : vector<128x64xf32>
    %cst_32 = arith.constant 1.000000e+00 : f32
    %47 = vector.broadcast %cst_32 : f32 to vector<128x64xf32>
    %48 = arith.addf %47, %46 : vector<128x64xf32>
    %49 = arith.divf %47, %48 : vector<128x64xf32>
    %50 = vector.extract_strided_slice %49 {offsets = [0, 0], sizes = [128, 32], strides = [1, 1]} : vector<128x64xf32> to vector<128x32xf32>
    %51 = vector.extract_strided_slice %49 {offsets = [0, 32], sizes = [128, 32], strides = [1, 1]} : vector<128x64xf32> to vector<128x32xf32>
    %52 = vector.extract_strided_slice %41 {offsets = [0, 64], sizes = [128, 32], strides = [1, 1]} : vector<128x96xf32> to vector<128x32xf32>
    %53 = vector.extract_strided_slice %24 {offsets = [0, 64], sizes = [128, 32], strides = [1, 1]} : vector<128x96xf32> to vector<128x32xf32>
    %54 = arith.mulf %50, %53 : vector<128x32xf32>
    %55 = arith.addf %52, %54 : vector<128x32xf32>
    %56 = math.tanh %55 : vector<128x32xf32>
    %57 = arith.subf %1, %56 : vector<128x32xf32>
    %58 = arith.mulf %51, %57 : vector<128x32xf32>
    %59 = arith.addf %56, %58 : vector<128x32xf32>
    %60 = vector.shape_cast %59 : vector<128x32xf32> to vector<16x8x32xf32>
    %61 = vector.shape_cast %19 : vector<16x32xf32> to vector<16x1x32xf32>
    %62 = vector.broadcast %61 : vector<16x1x32xf32> to vector<16x8x32xf32>
    %63 = arith.addf %60, %62 : vector<16x8x32xf32>
    %64 = arith.subf %63, %60 : vector<16x8x32xf32>
    %65 = vector.shape_cast %64 : vector<16x8x32xf32> to vector<128x32xf32>
    %66 = arith.truncf %19 : vector<16x32xf32> to vector<16x32xbf16>
    %cst_33 = arith.constant dense<0.000000e+00> : vector<16x32xf32>
    %67 = tpu.matmul %66, %11, %cst_33 {dimension_numbers = #tpu.dot_dimension_numbers<[1], [0], [0], [1], [0, 0, 1, 1], [], []>} : vector<16x32xbf16>, vector<32x32xbf16>, vector<16x32xf32> -> vector<16x32xf32>
    %68 = vector.broadcast %12 : vector<1x32xf32> to vector<16x32xf32>
    %69 = arith.addf %67, %68 : vector<16x32xf32>
    %70 = arith.truncf %65 : vector<128x32xf32> to vector<128x32xbf16>
    %cst_34 = arith.constant dense<0.000000e+00> : vector<128x64xf32>
    %71 = tpu.matmul %70, %13, %cst_34 {dimension_numbers = #tpu.dot_dimension_numbers<[1], [0], [0], [1], [0, 0, 1, 1], [], []>} : vector<128x32xbf16>, vector<32x64xbf16>, vector<128x64xf32> -> vector<128x64xf32>
    %72 = vector.broadcast %14 : vector<1x64xf32> to vector<128x64xf32>
    %73 = arith.addf %71, %72 : vector<128x64xf32>
    %74 = vector.extract_strided_slice %73 {offsets = [0, 0], sizes = [128, 32], strides = [1, 1]} : vector<128x64xf32> to vector<128x32xf32>
    %75 = vector.shape_cast %74 : vector<128x32xf32> to vector<16x8x32xf32>
    %76 = vector.extract_strided_slice %73 {offsets = [0, 32], sizes = [128, 32], strides = [1, 1]} : vector<128x64xf32> to vector<128x32xf32>
    %77 = vector.shape_cast %76 : vector<128x32xf32> to vector<16x8x32xf32>
    %78 = vector.shape_cast %69 : vector<16x32xf32> to vector<16x1x32xf32>
    %79 = vector.broadcast %78 : vector<16x1x32xf32> to vector<16x8x32xf32>
    %80 = arith.mulf %79, %75 : vector<16x8x32xf32>
    %cst_35 = arith.constant dense<0.000000e+00> : vector<16x8xf32>
    %81 = vector.multi_reduction <add>, %80, %cst_35 [2] : vector<16x8x32xf32> to vector<16x8xf32>
    %cst_36 = arith.constant dense<0xFF800000> : vector<16xf32>
    %82 = vector.multi_reduction <maximumf>, %81, %cst_36 [1] : vector<16x8xf32> to vector<16xf32>
    %83 = vector.shape_cast %82 : vector<16xf32> to vector<16x1xf32>
    %84 = vector.broadcast %83 : vector<16x1xf32> to vector<16x8xf32>
    %85 = arith.subf %81, %84 : vector<16x8xf32>
    %86 = math.exp %85 : vector<16x8xf32>
    %cst_37 = arith.constant dense<0.000000e+00> : vector<16xf32>
    %87 = vector.multi_reduction <add>, %86, %cst_37 [1] : vector<16x8xf32> to vector<16xf32>
    %88 = vector.shape_cast %87 : vector<16xf32> to vector<16x1xf32>
    %89 = vector.broadcast %88 : vector<16x1xf32> to vector<16x8xf32>
    %90 = arith.divf %86, %89 : vector<16x8xf32>
    %91 = vector.shape_cast %90 : vector<16x8xf32> to vector<16x8x1xf32>
    %92 = vector.broadcast %91 : vector<16x8x1xf32> to vector<16x8x32xf32>
    %93 = arith.mulf %92, %77 : vector<16x8x32xf32>
    %cst_38 = arith.constant dense<0.000000e+00> : vector<16x32xf32>
    %94 = vector.multi_reduction <add>, %93, %cst_38 [1] : vector<16x8x32xf32> to vector<16x32xf32>
    %95 = tpu.concatenate %1, %65 in 1 : vector<128x32xf32>, vector<128x32xf32> -> vector<128x64xf32>
    %96 = arith.truncf %95 : vector<128x64xf32> to vector<128x64xbf16>
    %cst_39 = arith.constant dense<0.000000e+00> : vector<128x32xf32>
    %97 = tpu.matmul %96, %15, %cst_39 {dimension_numbers = #tpu.dot_dimension_numbers<[1], [0], [0], [1], [0, 0, 1, 1], [], []>} : vector<128x64xbf16>, vector<64x32xbf16>, vector<128x32xf32> -> vector<128x32xf32>
    %98 = vector.broadcast %16 : vector<1x32xf32> to vector<128x32xf32>
    %99 = arith.addf %97, %98 : vector<128x32xf32>
    %100 = arith.negf %99 : vector<128x32xf32>
    %101 = math.exp %100 : vector<128x32xf32>
    %cst_40 = arith.constant 1.000000e+00 : f32
    %102 = vector.broadcast %cst_40 : f32 to vector<128x32xf32>
    %103 = arith.addf %102, %101 : vector<128x32xf32>
    %104 = arith.divf %102, %103 : vector<128x32xf32>
    %105 = arith.mulf %104, %1 : vector<128x32xf32>
    %106 = arith.addf %65, %105 : vector<128x32xf32>
    %107 = arith.mulf %104, %65 : vector<128x32xf32>
    %108 = arith.subf %106, %107 : vector<128x32xf32>
    %109 = vector.shape_cast %108 : vector<128x32xf32> to vector<16x8x32xf32>
    %c0_41 = arith.constant 0 : index
    %c0_42 = arith.constant 0 : index
    %c0_43 = arith.constant 0 : index
    %110 = vector.load %arg14[%c0_41, %c0_42, %c0_43] : memref<16x8x32xf32, #tpu.memory_space<vmem>>, vector<16x8x32xf32>
    tpu.vector_store %arg14[%c0_41, %c0_42, %c0_43], %109 {strides = array<i32>} : memref<16x8x32xf32, #tpu.memory_space<vmem>>, vector<16x8x32xf32>,
    %c0_44 = arith.constant 0 : index
    %c0_45 = arith.constant 0 : index
    %111 = vector.load %arg15[%c0_44, %c0_45] : memref<16x32xf32, #tpu.memory_space<vmem>>, vector<16x32xf32>
    tpu.vector_store %arg15[%c0_44, %c0_45], %94 {strides = array<i32>} : memref<16x32xf32, #tpu.memory_space<vmem>>, vector<16x32xf32>,
    return
  }
  func.func @transform_0(%arg0: i32) -> (i32, i32, i32) {
    %c0_i32 = arith.constant 0 : i32
    %c0_i32_0 = arith.constant 0 : i32
    %c0_i32_1 = arith.constant 0 : i32
    return %arg0, %c0_i32, %c0_i32_0 : i32, i32, i32
  }
  func.func @transform_1(%arg0: i32) -> (i32, i32, i32) {
    %c0_i32 = arith.constant 0 : i32
    %c0_i32_0 = arith.constant 0 : i32
    %c0_i32_1 = arith.constant 0 : i32
    return %arg0, %c0_i32, %c0_i32_0 : i32, i32, i32
  }
  func.func @transform_2(%arg0: i32) -> (i32, i32) {
    %c0_i32 = arith.constant 0 : i32
    %c0_i32_0 = arith.constant 0 : i32
    %c0_i32_1 = arith.constant 0 : i32
    return %c0_i32, %c0_i32_0 : i32, i32
  }
  func.func @transform_3(%arg0: i32) -> (i32, i32) {
    %c0_i32 = arith.constant 0 : i32
    %c0_i32_0 = arith.constant 0 : i32
    %c0_i32_1 = arith.constant 0 : i32
    return %c0_i32, %c0_i32_0 : i32, i32
  }
  func.func @transform_4(%arg0: i32) -> (i32, i32) {
    %c0_i32 = arith.constant 0 : i32
    %c0_i32_0 = arith.constant 0 : i32
    %c0_i32_1 = arith.constant 0 : i32
    return %c0_i32, %c0_i32_0 : i32, i32
  }
  func.func @transform_5(%arg0: i32) -> (i32, i32) {
    %c0_i32 = arith.constant 0 : i32
    %c0_i32_0 = arith.constant 0 : i32
    %c0_i32_1 = arith.constant 0 : i32
    return %c0_i32, %c0_i32_0 : i32, i32
  }
  func.func @transform_6(%arg0: i32) -> (i32, i32) {
    %c0_i32 = arith.constant 0 : i32
    %c0_i32_0 = arith.constant 0 : i32
    %c0_i32_1 = arith.constant 0 : i32
    return %c0_i32, %c0_i32_0 : i32, i32
  }
  func.func @transform_7(%arg0: i32) -> (i32, i32) {
    %c0_i32 = arith.constant 0 : i32
    %c0_i32_0 = arith.constant 0 : i32
    %c0_i32_1 = arith.constant 0 : i32
    return %c0_i32, %c0_i32_0 : i32, i32
  }
  func.func @transform_8(%arg0: i32) -> (i32, i32) {
    %c0_i32 = arith.constant 0 : i32
    %c0_i32_0 = arith.constant 0 : i32
    %c0_i32_1 = arith.constant 0 : i32
    return %c0_i32, %c0_i32_0 : i32, i32
  }
  func.func @transform_9(%arg0: i32) -> (i32, i32) {
    %c0_i32 = arith.constant 0 : i32
    %c0_i32_0 = arith.constant 0 : i32
    %c0_i32_1 = arith.constant 0 : i32
    return %c0_i32, %c0_i32_0 : i32, i32
  }
  func.func @transform_10(%arg0: i32) -> (i32, i32) {
    %c0_i32 = arith.constant 0 : i32
    %c0_i32_0 = arith.constant 0 : i32
    %c0_i32_1 = arith.constant 0 : i32
    return %c0_i32, %c0_i32_0 : i32, i32
  }
  func.func @transform_11(%arg0: i32) -> (i32, i32) {
    %c0_i32 = arith.constant 0 : i32
    %c0_i32_0 = arith.constant 0 : i32
    %c0_i32_1 = arith.constant 0 : i32
    return %c0_i32, %c0_i32_0 : i32, i32
  }
  func.func @transform_12(%arg0: i32) -> (i32, i32) {
    %c0_i32 = arith.constant 0 : i32
    %c0_i32_0 = arith.constant 0 : i32
    %c0_i32_1 = arith.constant 0 : i32
    return %c0_i32, %c0_i32_0 : i32, i32
  }
  func.func @transform_13(%arg0: i32) -> (i32, i32, i32) {
    %c0_i32 = arith.constant 0 : i32
    %c0_i32_0 = arith.constant 0 : i32
    %c0_i32_1 = arith.constant 0 : i32
    return %arg0, %c0_i32, %c0_i32_0 : i32, i32, i32
  }
  func.func @transform_14(%arg0: i32) -> (i32, i32) {
    %c0_i32 = arith.constant 0 : i32
    %c0_i32_0 = arith.constant 0 : i32
    return %arg0, %c0_i32 : i32, i32
  }
}

</mosaic_0001>

<bundles_post_ra>
// kernel: tpu_custom_call.1
= control target key start
LH: loop header
LB: loop body
LE: loop exit
PB: predicated region body
PF: predicated region fallthrough
CT: control target
= control target key end

     0   :  { %s7533_s0 = inlined_call_operand.hbm [shape: bf16[2,128,256], index: 0, kind: input, shape index: {}]   ;;  %s7534_s1 = inlined_call_operand.hbm [shape: f32[32,8,32], index: 1, kind: input, shape index: {}]   ;;  %s7535_s2 = inlined_call_operand.vmem [shape: bf16[32,160], index: 2, kind: input, shape index: {}]   ;;  %s7536_s3 = inlined_call_operand.vmem [shape: f32[1,160], index: 3, kind: input, shape index: {}]   ;;  %s7537_s4 = inlined_call_operand.vmem [shape: f32[2,32], index: 4, kind: input, shape index: {}]   ;;  %s7538_s5 = inlined_call_operand.hbm [shape: bf16[64,96], index: 5, kind: input, shape index: {}]   ;;  %s7539_s6 = inlined_call_operand.hbm [shape: f32[1,96], index: 6, kind: input, shape index: {}]   ;;  %s7540_s7 = inlined_call_operand.vmem [shape: bf16[32,32], index: 7, kind: input, shape index: {}]   ;;  %s7541_s8 = inlined_call_operand.hbm [shape: f32[1,32], index: 8, kind: input, shape index: {}]   ;;  %s7542_s9 = inlined_call_operand.hbm [shape: bf16[32,64], index: 9, kind: input, shape index: {}]   ;;  %s7543_s10 = inlined_call_operand.hbm [shape: f32[1,64], index: 10, kind: input, shape index: {}]   ;;  %s7544_s11 = inlined_call_operand.vmem [shape: bf16[64,32], index: 11, kind: input, shape index: {}]   ;;  %s7545_s12 = inlined_call_operand.vmem [shape: f32[1,32], index: 12, kind: input, shape index: {}]   ;;  %s7546_s13 = inlined_call_operand.hbm [shape: f32[32,8,32], index: 13, kind: output, shape index: {0}]   ;;  %s7547_s14 = inlined_call_operand.hbm [shape: f32[32,32], index: 14, kind: output, shape index: {1}]  }
   0x1   :  { %7610 = sst [smem:[#allocation66_spill]] %s7533_s0 }
   0x2   :  { %7611 = sst [smem:[#allocation67_spill]] %s7534_s1 }
   0x3   :  { %7612 = sst [smem:[#allocation68_spill]] %s7538_s5 }
   0x4   :  { %7613 = sst [smem:[#allocation69_spill]] %s7539_s6 }
   0x5   :  { %7614 = sst [smem:[#allocation70_spill]] %s7541_s8 }
   0x6   :  { %7615 = sst [smem:[#allocation71_spill]] %s7542_s9 }
   0x7   :  { %7616 = sst [smem:[#allocation72_spill]] %s7543_s10 }
   0x8   :  { %7617 = sst [smem:[#allocation73_spill]] %s7545_s12 }
   0x9   :  { %7618 = sst [smem:[#allocation74_spill]] %s7546_s13 }
   0xa   :  { %7619 = sst [smem:[#allocation75_spill]] %s7547_s14 }
   0xb   :  { %20 = vsyncpa [#allocation3], 0 }
   0xc   :  { %22 = vsyncpa [#allocation3 + $0x1], 0 }
   0xd   :  { %23 = vsyncpa [#allocation6], 0 }
   0xe   :  { %25 = vsyncpa [#allocation6 + $0x1], 0 }
   0xf   :  { %26 = vsyncpa [#allocation9], 0 }
  0x10   :  { %27 = vsyncpa [#allocation12], 0 }
  0x11   :  { %28 = vsyncpa [#allocation4], 0 }
  0x12   :  { %30 = vsyncpa [#allocation4 + $0x1], 0 }
  0x13   :  { %31 = vsyncpa [#allocation16], 0 }
  0x14   :  { %33 = vsyncpa [#allocation16 + $0x1], 0  ;;  %s5572_s29 = smov 0   ;;  %s5574_s30 = smov 0  }
  0x15   :  { %s5576_s15 = smov 0   ;;  %s5578_s16 = smov 0  }
  0x16 LB: > { %7620 = sst [smem:[#allocation24_spill]] %s5469_s15  ;;  %s5475_s17 = smov [#allocation7]   ;;  %s5473_s16 = sphi %s5578_s16, %s7762_s16   ;;  %s5469_s15 = sphi %s5576_s15, %s7759_s15   ;;  %s5465_s30 = sphi %s5574_s30, %s7761_s30   ;;  %s5461_s29 = sphi %s5572_s29, %s7760_s29  }
  0x17   : > { %s400_s18 = sshll.u32 %s5475_s17, 4  ;;  %s5593_s19 = sadd.s32 4294967295, %s5473_s16   ;;  %s401_s18 = int_to_ptr.vmem [resolvable:$true] %s400_s18 }
  0x18   : > { %p4332_p0 = scmp.ge.s32.totalorder %s5473_s16, 1  ;;  %p7550_p1 = scmp.eq.s32.totalorder %s5593_s19, 0 }
  0x19   : > { %p379_p2 = scmp.lt.s32.totalorder %s5473_s16, 3  ;;  %s5476_s21 = smov [#allocation8]  }
  0x1a   : > { %s414_s22 = sshll.u32 %s5476_s21, 4  ;;  %s5477_s24 = smov [#allocation11]   ;;  %s415_s22 = int_to_ptr.vmem [resolvable:$true] %s414_s22 }
  0x1b   : > { %p5598_p3 = pnand %p4332_p0, %p379_p2  ;;  %s438_s25 = sshll.u32 %s5477_s24, 4  ;;  %s5611_s25 = int_to_ptr.vmem [resolvable:$true] %s438_s25 }
  0x1c   : > { %s5188_s27 = scalar_lea.vmem %s401_s18, 512  ;;  %p5196_p11 = scmp.lt.s32.totalorder %s401_s18, %s401_s18 }
  0x1d   : > { %p4705_p5 = pneg %p5598_p3  ;;  %p5189_p8 = scmp.ne.s32.totalorder %s401_s18, %s5188_s27 }
  0x1e   : > { %p5197_p12 = scmp.lt.s32.totalorder %s5188_s27, %s5188_s27 }
  0x1f   : > { %p5607_p6 = pnand %p4705_p5, %p7550_p1 }
  0x20   : > { %p5198_p13 = por %p5197_p12, %p5196_p11 }
  0x21   : > { %p5615_p7 = pneg %p5607_p6 }
  0x23   : > { %p5191_p9 = pnand %p5189_p8, %p5615_p7 }
  0x25   : > { %p5192_p10 = pneg %p5191_p9 }
  0x27   : > { %p5199_p0 = pnand %p5198_p13, %p5192_p10 }
  0x29   : > { %5202 = shalt.err (!%p5199_p0)
}
  0x2a   : > { %s5478_s28 = smov 64   ;;  %s5479_s17 = smov 4  }
  0x2b   : > { %s7624_s5 = sld [smem:[#allocation68_spill]]  ;;  %s5214_s14 = scalar_lea.vmem %s415_s22, 16 }
  0x2c   : > { %p5215_p2 = scmp.ne.s32.totalorder %s415_s22, %s5214_s14  ;;  %s5221_s13 = scalar_lea.vmem %s415_s22, 32 }
  0x2d   : > { %p5222_p9 = scmp.lt.s32.totalorder %s415_s22, %s415_s22  ;;  %p5223_p4 = scmp.lt.s32.totalorder %s5221_s13, %s5214_s14 }
  0x2e   : > { %p5217_p5 = pnand %p5215_p2, %p5615_p7 }
  0x2f   : > { %p5224_p11 = por %p5223_p4, %p5222_p9 }
  0x30   : > { %p5218_p8 = pneg %p5217_p5 }
  0x31   : > { %4708 = dma.hbm_to_vmem [thread:$0]  (!%p5607_p6), %s7624_s5, 512, %s401_s18, [#allocation6], %s5478_s28, %s5478_s28, %s5479_s17  }
  0x32   : > { %p5225_p10 = pnand %p5224_p11, %p5218_p8 }
  0x34   : > { %5228 = shalt.err (!%p5225_p10)
}
  0x35   : > { %s7625_s6 = sld [smem:[#allocation69_spill]]  ;;  %s5240_s18 = scalar_lea.vmem %s5611_s25, 256 }
  0x36   : > { %p5241_p12 = scmp.ne.s32.totalorder %s5611_s25, %s5240_s18  ;;  %p5248_p2 = scmp.lt.s32.totalorder %s5611_s25, %s5611_s25 }
  0x37   : > { %p5249_p4 = scmp.lt.s32.totalorder %s5240_s18, %s5240_s18 }
  0x38   : > { %p5243_p13 = pnand %p5241_p12, %p5615_p7 }
  0x39   : > { %p5250_p5 = por %p5249_p4, %p5248_p2 }
  0x3a   : > { %p5244_p0 = pneg %p5243_p13 }
  0x3b   : > { %4711 = dma.hbm_to_vmem [thread:$0]  (!%p5607_p6), %s7625_s6, 16, %s415_s22, [#allocation9]  }
  0x3c   : > { %p5251_p8 = pnand %p5250_p5, %p5244_p0 }
  0x3e   : > { %5254 = shalt.err (!%p5251_p8)
}
  0x3f   : > { %s7626_s9 = sld [smem:[#allocation71_spill]]  ;;  %s5480_s14 = smov [#allocation10]  }
  0x40   : > { %s428_s22 = sshll.u32 %s5480_s14, 4  ;;  %s5481_s21 = smov [#allocation13]   ;;  %s429_s22 = int_to_ptr.vmem [resolvable:$true] %s428_s22 }
  0x41   : > { %s452_s24 = sshll.u32 %s5481_s21, 4  ;;  %s5266_s27 = scalar_lea.vmem %s429_s22, 16  ;;  %s453_s24 = int_to_ptr.vmem [resolvable:$true] %s452_s24 }
  0x42   : > { %p5267_p9 = scmp.ne.s32.totalorder %s429_s22, %s5266_s27  ;;  %s5273_s18 = scalar_lea.vmem %s429_s22, 32 }
  0x43   : > { %p5274_p12 = scmp.lt.s32.totalorder %s429_s22, %s429_s22  ;;  %p5275_p13 = scmp.lt.s32.totalorder %s5273_s18, %s5266_s27 }
  0x44   : > { %p5269_p11 = pnand %p5267_p9, %p5615_p7 }
  0x45   : > { %4717 = dma.hbm_to_vmem [thread:$0]  (!%p5607_p6), %s7626_s9, 256, %s5611_s25, [#allocation12], %s5478_s28, %s5478_s28, %s5479_s17  }
  0x46   : > { %p5270_p10 = pneg %p5269_p11  ;;  %p5276_p0 = por %p5275_p13, %p5274_p12 }
  0x48   : > { %p5277_p2 = pnand %p5276_p0, %p5270_p10 }
  0x4a   : > { %5280 = shalt.err (!%p5277_p2)
}
  0x4b   : > { %s7627_s8 = sld [smem:[#allocation70_spill]]  ;;  %s5292_s28 = scalar_lea.vmem %s453_s24, 16 }
  0x4c   : > { %p5293_p4 = scmp.ne.s32.totalorder %s453_s24, %s5292_s28  ;;  %s5299_s17 = scalar_lea.vmem %s453_s24, 32 }
  0x4d   : > { %p5300_p9 = scmp.lt.s32.totalorder %s453_s24, %s453_s24  ;;  %p5301_p11 = scmp.lt.s32.totalorder %s5299_s17, %s5292_s28 }
  0x4e   : > { %p5295_p5 = pnand %p5293_p4, %p5615_p7 }
  0x4f   : > { %p5302_p1 = por %p5301_p11, %p5300_p9 }
  0x50   : > { %p5296_p8 = pneg %p5295_p5 }
  0x51   : > { %4714 = dma.hbm_to_vmem [thread:$0]  (!%p5607_p6), %s7627_s8, 16, %s429_s22, [#allocation9]  }
  0x52   : > { %p5303_p12 = pnand %p5302_p1, %p5296_p8 }
  0x54   : > { %5306 = shalt.err (!%p5303_p12)
}
  0x55   : > { %s7628_s10 = sld [smem:[#allocation72_spill]]  ;;  %s4331_s26 = sadd.s32 4294967294, %s5473_s16  }
  0x56   : > { %s5661_s23 = sadd.s32 1, %s5473_s16   ;;  %s46_s22 = sadd.s32 1, %s5469_s15 }
  0x57   : > { %s43_s21 = ssub.s32 %s5473_s16, %s5661_s23  ;;  %p53_p1 = scmp.ne.s32.totalorder %s5469_s15, %s5465_s30 }
  0x58   : > { %p44_p7 = scmp.eq.s32.totalorder %s43_s21, 0  ;;  %p54_p10 = scmp.eq.s32.totalorder %s5473_s16, 0 }
  0x59   : > { %p59_p13 = scmp.ne.s32.totalorder %s5465_s30, %s5461_s29  ;;  %p340_p0 = scmp.eq.s32.totalorder %s5593_s19, 1 }
  0x5a   : > { %s5673_s27 = scalar_select %p44_p7, %s5469_s15, %s46_s22  }
  0x5b   : > { %4720 = dma.hbm_to_vmem [thread:$0]  (!%p5607_p6), %s7628_s10, 16, %s453_s24, [#allocation12]  }
  0x5c   : > { %7629 = sst [smem:[#allocation25_spill]] %s5673_s27  ;;  %p55_p2 = por %p54_p10, %p53_p1 }
  0x5d   : > { %p7630_p4 = scmp.eq.s32.totalorder %s5593_s19, 0  ;;  %p5681_p6 = por %p340_p0, %p53_p1 }
  0x5e   : > { %p346_p8 = scmp.eq.s32.totalorder %s4331_s26, 1  ;;  %p4740_p9 = scmp.lt.s32.totalorder %s5473_s16, 2 }
  0x5f   : > { %p5677_p5 = por %p7630_p4, %p59_p13  ;;  %s469_s12 = sand.u32 1, %s5469_s15  }
  0x60   : > { %s7632_s18 = scalar_select %p5681_p6, 1, 0 }
  0x61   : > { %s7631_s24 = scalar_select %p5677_p5, 1, 0 }
  0x62   : > { %p5687_p11 = por %p346_p8, %p59_p13  ;;  %s5691_s28 = sshll.u32 %s469_s12, 7 }
  0x63   : > { %s7551_s17 = sshll.u32 %s5473_s16, 11  ;;  %s7634_s0 = sld [smem:[#allocation66_spill]] }
  0x64   : > { %s7633_s25 = scalar_select %p5687_p11, 1, 0 }
  0x65   : > { %s473_s26 = scalar_lea.vmem [#allocation2], %s5691_s28  ;;  %p5702_p12 = pnand %p4740_p9, %p55_p2 }
  0x66   : > { %s480_s21 = sshll.u32 %s473_s26, 4  ;;  %s5708_s6 = scalar_lea.sflag [#allocation3], %s469_s12  ;;  %s5706_s21 = int_to_ptr.vmem [resolvable:$true] %s480_s21 }
  0x67   : > { %p5309_p7 = pneg %p5702_p12 }
  0x69   : > { %s5699_s22 = scalar_lea.hbm %s7634_s0, %s7551_s17  ;;  %s5312_s26 = scalar_lea.hbm %s7634_s0, 4096 }
  0x6a   : > { %s5307_s8 = scalar_lea.hbm %s5699_s22, 2048  ;;  %p5313_p0 = scmp.lt.s32.totalorder %s5699_s22, %s7634_s0 }
  0x6b   : > { %p5308_p1 = scmp.ne.s32.totalorder %s5699_s22, %s5307_s8  ;;  %p5314_p2 = scmp.lt.s32.totalorder %s5312_s26, %s5307_s8 }
  0x6d   : > { %p5310_p10 = pnand %p5309_p7, %p5308_p1  ;;  %p5315_p4 = por %p5314_p2, %p5313_p0 }
  0x6f   : > { %p5311_p13 = pneg %p5310_p10 }
  0x71   : > { %p5316_p8 = pnand %p5315_p4, %p5311_p13 }
  0x73   : > { %5319 = shalt.err (!%p5316_p8)
}
  0x74   : > { %s5320_s12 = scalar_lea.vmem %s5706_s21, 2048  ;;  %s5482_s13 = smov [#allocation2]  }
  0x75   : > { %p5321_p9 = scmp.ne.s32.totalorder %s5706_s21, %s5320_s12  ;;  %s5325_s14 = sshll.u32 %s5482_s13, 4  ;;  %s5326_s14 = int_to_ptr.vmem [resolvable:$false] %s5325_s14 }
  0x76   : > { %s5327_s10 = scalar_lea.vmem %s5326_s14, 4096  ;;  %p5328_p11 = scmp.lt.s32.totalorder %s5706_s21, %s5326_s14 }
  0x77   : > { %p5323_p1 = pnand %p5321_p9, %p5309_p7  ;;  %p5329_p6 = scmp.lt.s32.totalorder %s5327_s10, %s5320_s12 }
  0x79   : > { %p5324_p10 = pneg %p5323_p1  ;;  %p5330_p5 = por %p5329_p6, %p5328_p11 }
  0x7b   : > { %p5331_p0 = pnand %p5330_p5, %p5324_p10 }
  0x7d   : > { %5334 = shalt.err (!%p5331_p0)
}
  0x7e   : > { %s5483_s8 = smov 128   ;;  %s5484_s9 = smov 8  }
  0x7f   : > { %4724 = dma.hbm_to_vmem [thread:$0]  (!%p5702_p12), %s5699_s22, 2048, %s5706_s21, %s5708_s6, %s5483_s8, %s5483_s8, %s5484_s9  }
  0x80   : > { %s7636_s17 = sshll.u32 %s5473_s16, 11  ;;  %s7637_s1 = sld [smem:[#allocation67_spill]] }
  0x81   : > { %s494_s13 = scalar_lea.vmem [#allocation5], %s5691_s28  ;;  %s490_s0 = sand.u32 1, %s5473_s16  }
  0x82   : > { %s501_s14 = sshll.u32 %s494_s13, 4  ;;  %s491_s27 = scalar_lea.sflag [#allocation6], %s490_s0  ;;  %s5747_s14 = int_to_ptr.vmem [resolvable:$true] %s501_s14 }
  0x86   : > { %s5743_s12 = scalar_lea.hbm %s7637_s1, %s7636_s17  ;;  %s5340_s21 = scalar_lea.hbm %s7637_s1, 4096 }
  0x87   : > { %s5335_s15 = scalar_lea.hbm %s5743_s12, 2048  ;;  %p5341_p13 = scmp.lt.s32.totalorder %s5743_s12, %s7637_s1 }
  0x88   : > { %p5336_p5 = scmp.ne.s32.totalorder %s5743_s12, %s5335_s15  ;;  %p5342_p2 = scmp.lt.s32.totalorder %s5340_s21, %s5335_s15 }
  0x8a   : > { %p5338_p6 = pnand %p5336_p5, %p5309_p7  ;;  %p5343_p4 = por %p5342_p2, %p5341_p13 }
  0x8c   : > { %p5339_p11 = pneg %p5338_p6 }
  0x8e   : > { %p5344_p8 = pnand %p5343_p4, %p5339_p11 }
  0x90   : > { %5347 = shalt.err (!%p5344_p8)
}
  0x91   : > { %s5348_s0 = scalar_lea.vmem %s5747_s14, 2048  ;;  %s5485_s28 = smov [#allocation5]  }
  0x92   : > { %p5349_p9 = scmp.ne.s32.totalorder %s5747_s14, %s5348_s0  ;;  %s5353_s26 = sshll.u32 %s5485_s28, 4  ;;  %s5354_s26 = int_to_ptr.vmem [resolvable:$false] %s5353_s26 }
  0x93   : > { %s5355_s13 = scalar_lea.vmem %s5354_s26, 4096  ;;  %p5356_p0 = scmp.lt.s32.totalorder %s5747_s14, %s5354_s26 }
  0x94   : > { %p5351_p1 = pnand %p5349_p9, %p5309_p7  ;;  %p5357_p5 = scmp.lt.s32.totalorder %s5355_s13, %s5348_s0 }
  0x96   : > { %p5352_p10 = pneg %p5351_p1  ;;  %p5358_p6 = por %p5357_p5, %p5356_p0 }
  0x98   : > { %p5359_p13 = pnand %p5358_p6, %p5352_p10 }
  0x9a   : > { %5362 = shalt.err (!%p5359_p13)
}
  0x9b   : > { %4727 = dma.hbm_to_vmem [thread:$0]  (!%p5702_p12), %s5743_s12, 2048, %s5747_s14, %s491_s27, %s5483_s8, %s5483_s8, %s5484_s9  }
  0x9c   : > { %513 = sbr.rel (%p5598_p3) target bundleno = 2977 (0xba1), region = 72 }
  0xa1   : > { %s5777_s15 = sand.u32 1, %s5465_s30   ;;  %p7638_p7 = scmp.ne.s32.totalorder %s7631_s24, 0 }
  0xa2   : > { %s5780_s6 = sshll.u32 %s5777_s15, 7  ;;  %s516_s22 = scalar_lea.sflag [#allocation3], %s5777_s15 }
  0xa3   : > { %s5784_s5 = scalar_lea.vmem [#allocation2], %s5780_s6 }
  0xa4   : > { %5432 = dma.done.wait (%p7638_p7), %s516_s22, 2048  }
  0xa5   : > { %5434 = vsyncadd (%p7638_p7), %s516_s22, 4294965248  ;;  %s524_s20 = sand.u32 1, %s5593_s19   ;;  %s5792_s8 = scalar_lea.vmem [#allocation5], %s5780_s6 }
  0xa6   : > { %s525_s27 = scalar_lea.sflag [#allocation6], %s524_s20 }
  0xa7   : > { %5436 = dma.done.wait (%p7638_p7), %s525_s27, 2048  }
  0xa8   : > { %5438 = vsyncadd (%p7638_p7), %s525_s27, 4294965248  ;;  %p7639_p3 = scmp.eq.s32.totalorder %s5593_s19, 0 }
  0xaa   : > { %5440 = dma.done.wait (%p7639_p3), [#allocation6], 512   ;;  %p7640_p12 = pmov %p7639_p3 }
  0xab   : > { %p7641_p11 = pmov %p7639_p3 }
  0xac   : > { %5442 = vsyncadd (%p7640_p12), [#allocation6], 4294966784 }
  0xad   : > { %5444 = dma.done.wait (%p7641_p11), [#allocation9], 32   ;;  %p7642_p2 = pmov %p7639_p3 }
  0xaf   : > { %5446 = vsyncadd (%p7642_p2), [#allocation9], 4294967264  ;;  %p7643_p4 = pmov %p7642_p2 }
  0xb0   : > { %p7644_p8 = pmov %p7642_p2 }
  0xb1   : > { %5448 = dma.done.wait (%p7643_p4), [#allocation12], 272  }
  0xb2   : > { %5450 = vsyncadd (%p7644_p8), [#allocation12], 4294967024  ;;  %v5486_v0 = vmov 0   ;;  %v4879_v1 = vld [vmem:[%s7535_s2 + $0x14] ss:$8 sps:$4 sm:$0xff]   ;;  %v607_v5 = vld [vmem:[%s5792_s8] sm:$0xff]  ;;  %v7555_v29 = vlaneseq }
  0xb3   : > { %898 = vmatprep.mubr.bf16.mxu0 %v5486_v0  ;;  %4878 = vset.pattern.permute.xlu1 %v5486_v0  ;;  %v4881_v2 = vld [vmem:[%s7535_s2 + $0x10] ss:$8 sps:$4 sm:$0xff]   ;;  %v4882_v3 = vld [vmem:[%s7535_s2 + $0x4] ss:$8 sps:$4 sm:$0xff]   ;;  %v4884_v4 = vld [vmem:[%s7535_s2] ss:$8 sps:$4 sm:$0xff]  }
  0xb4   : > { %4877 = vset.pattern.permute.xlu0 %v5486_v0  ;;  %878 = vmatprep.subr.bf16.mxu0 %v4879_v1  ;;  %v608_v6 = vld [vmem:[%s5792_s8 + $0x8] sm:$0xff]  ;;  %vm673_vm0 = vcmask 261120   ;;  %v609_v8 = vld [vmem:[%s5792_s8 + $0x10] sm:$0xff]  ;;  %v610_v9 = vld [vmem:[%s5792_s8 + $0x18] sm:$0xff]  ;;  %v5847_v30 = vshrl.u32 %v7555_v29, 7  ;;  %s5487_s13 = smov 32  }
  0xb5   : > { %879 = vmatpush1.bf16.msra.mxu0 %v4881_v2  ;;  %v803_v7 = vpack.c.bf16 %v608_v6, %v607_v5  ;;  %v804_v10 = vpack.c.bf16 %v610_v9, %v609_v8  ;;  %v611_v11 = vld [vmem:[%s5792_s8 + $0x20] sm:$0xff]  ;;  %v612_v12 = vld [vmem:[%s5792_s8 + $0x28] sm:$0xff]  ;;  %v613_v14 = vld [vmem:[%s5792_s8 + $0x30] sm:$0xff]  ;;  %s5488_s20 = smov 64   ;;  %vm1427_vm1 = vcmask 523264   ;;  %vm2227_vm2 = vcmask 1041409  }
  0xb6   : > { %880 = vmatprep.subr.bf16.mxu0 %v4882_v3  ;;  %v805_v13 = vpack.c.bf16 %v612_v12, %v611_v11  ;;  %v614_v15 = vld [vmem:[%s5792_s8 + $0x38] sm:$0xff]  ;;  %v615_v17 = vld [vmem:[%s5792_s8 + $0x40] sm:$0xff]  ;;  %v616_v18 = vld [vmem:[%s5792_s8 + $0x48] sm:$0xff]  ;;  %7645 = vst [vmem:[#allocation26_spill] sm:$0xff] %v5847_v30  ;;  %v5850_v31 = vsub.s32 1, %v5847_v30  ;;  %v5881_v2 = vsub.s32 0, %v5847_v30 }
  0xb7   : > { %v806_v16 = vpack.c.bf16 %v614_v15, %v613_v14  ;;  %v807_v19 = vpack.c.bf16 %v616_v18, %v615_v17  ;;  %v617_v20 = vld [vmem:[%s5792_s8 + $0x50] sm:$0xff]  ;;  %v618_v21 = vld [vmem:[%s5792_s8 + $0x58] sm:$0xff]  ;;  %v619_v23 = vld [vmem:[%s5792_s8 + $0x60] sm:$0xff]  ;;  %vm2229_vm3 = vcmask 1042434   ;;  %vm2231_vm4 = vcmask 1043459   ;;  %s5491_s14 = smov 96  }
  0xb8   : > { %v808_v22 = vpack.c.bf16 %v618_v21, %v617_v20  ;;  %v620_v24 = vld [vmem:[%s5792_s8 + $0x68] sm:$0xff]  ;;  %v621_v26 = vld [vmem:[%s5792_s8 + $0x70] sm:$0xff]  ;;  %v622_v27 = vld [vmem:[%s5792_s8 + $0x78] sm:$0xff]  ;;  %7646 = vst [vmem:[#allocation27_spill] sm:$0xff] %v5850_v31  ;;  %vm2233_vm5 = vcmask 1044484   ;;  %vm2235_vm6 = vcmask 1045509  }
  0xb9   : > { %881 = vmatpush1.bf16.msra.mxu0 %v4884_v4  ;;  %v809_v25 = vpack.c.bf16 %v620_v24, %v619_v23  ;;  %v810_v28 = vpack.c.bf16 %v622_v27, %v621_v26  ;;  %v643_v33 = vld [vmem:[%s7536_s3] sm:$0x3]  ;;  %7647 = vst [vmem:[#allocation28_spill] sm:$0xff] %v5881_v2  ;;  %vm2237_vm7 = vcmask 1046534   ;;  %vm2239_vm8 = vcmask 1047559   ;;  %s7710_s24 = sld [smem:[#allocation73_spill]] }
  0xba   : > { %v5858_v35 = vrot.slane %v643_v33, %v5850_v31  ;;  %v815_v8 = vrot.slane %v643_v33, %v5881_v2  ;;  %vm5490_vm9 = vmmov 0   ;;  %vm2818_vm10 = vcmask 64512   ;;  %s4466_s9 = sshll.u32 %s5593_s19, 11  ;;  %s7753_s10 = sld [smem:[#allocation74_spill]] }
  0xbb   : > { %vm3315_vm11 = vcmask 523520   ;;  %s4467_s28 = sshll.u32 %s5593_s19, 8  ;;  %s4122_s26 = scalar_lea.sflag [#allocation4], %s5777_s15 }
  0xbc   : > { %4359 = vmatmul.mubr.msk.bf16.vlgmr.msra.gmra.mxu0 %vm673_vm0, %v803_v7  ;;  %p7754_p1 = scmp.ne.s32.totalorder %s7632_s18, 0  ;;  %s5493_s22 = smov [#allocation14]  }
  0xbd   : > { %908 = vmatprep.mubr.bf16.mxu0 %v5486_v0 }
  0xc0   : > { %s7447_s0 = scalar_lea.hbm %s7753_s10, %s4466_s9 }
  0xc4   : > { %4360 = vmatmul.mubr.msk.bf16.gmra.mxu0 %vm673_vm0, %v804_v10 }
  0xc5   : > { %918 = vmatprep.mubr.bf16.mxu0 %v5486_v0 }
  0xcc   : > { %4361 = vmatmul.mubr.msk.bf16.gmra.mxu0 %vm673_vm0, %v805_v13 }
  0xcd   : > { %928 = vmatprep.mubr.bf16.mxu0 %v5486_v0 }
  0xd4   : > { %4362 = vmatmul.mubr.msk.bf16.gmra.mxu0 %vm673_vm0, %v806_v16 }
  0xd5   : > { %938 = vmatprep.mubr.bf16.mxu0 %v5486_v0 }
  0xdc   : > { %4363 = vmatmul.mubr.msk.bf16.gmra.mxu0 %vm673_vm0, %v807_v19 }
  0xdd   : > { %948 = vmatprep.mubr.bf16.mxu0 %v5486_v0 }
  0xe4   : > { %4364 = vmatmul.mubr.msk.bf16.gmra.mxu0 %vm673_vm0, %v808_v22 }
  0xe5   : > { %958 = vmatprep.mubr.bf16.mxu0 %v5486_v0 }
  0xec   : > { %4365 = vmatmul.mubr.msk.bf16.gmra.mxu0 %vm673_vm0, %v809_v25 }
  0xed   : > { %968 = vmatprep.mubr.bf16.mxu0 %v5486_v0 }
  0xf4   : > { %4366 = vmatmul.mubr.msk.bf16.gmra.mxu0 %vm673_vm0, %v810_v28 }
 0x17c   : > { %v5852_v32 = vpop.f32.mrf.mxu0 }
 0x17e   : > { %v902_v34 = vpop.f32.mrf.mxu0 }
 0x17f   : > { %v903_v38 = vadd.f32 %v902_v34, %v5858_v35 }
 0x180   : > { %v904_v36 = vpop.f32.mrf.mxu0 }
 0x181   : > { %v5910_v26 = vadd.f32 %v904_v36, %v815_v8 }
 0x182   : > { %v906_v37 = vpop.f32.mrf.mxu0 }
 0x183   : > { %v907_v39 = vadd.f32 %v906_v37, %v5858_v35  ;;  %v5917_v37 = vadd.f32 %v5852_v32, %v815_v8 }
 0x184   : > { %v5862_v40 = vpop.f32.mrf.mxu0 }
 0x185   : > { %v5864_v41 = vpack.c.bf16 %v907_v39, %v903_v38 }
 0x186   : > { %v912_v42 = vpop.f32.mrf.mxu0 }
 0x187   : > { %v913_v45 = vadd.f32 %v912_v42, %v5858_v35  ;;  %v979_v42 = vpack.c.bf16 %v5910_v26, %v5917_v37 }
 0x188   : > { %v5866_v43 = vpop.f32.mrf.mxu0 }
 0x18a   : > { %v916_v44 = vpop.f32.mrf.mxu0 }
 0x18b   : > { %v917_v46 = vadd.f32 %v916_v44, %v5858_v35 }
 0x18c   : > { %v920_v47 = vpop.f32.mrf.mxu0 }
 0x18d   : > { %v5870_v48 = vpack.c.bf16 %v917_v46, %v913_v45  ;;  %v5907_v24 = vadd.f32 %v920_v47, %v815_v8 }
 0x18e   : > { %v922_v49 = vpop.f32.mrf.mxu0 }
 0x18f   : > { %v923_v52 = vadd.f32 %v922_v49, %v5858_v35 }
 0x190   : > { %v924_v50 = vpop.f32.mrf.mxu0 }
 0x191   : > { %v5903_v21 = vadd.f32 %v924_v50, %v815_v8 }
 0x192   : > { %v926_v51 = vpop.f32.mrf.mxu0 }
 0x193   : > { %v927_v53 = vadd.f32 %v926_v51, %v5858_v35  ;;  %v981_v33 = vpack.c.bf16 %v5903_v21, %v5907_v24 }
 0x194   : > { %v930_v54 = vpop.f32.mrf.mxu0 }
 0x195   : > { %v5874_v55 = vpack.c.bf16 %v927_v53, %v923_v52  ;;  %v5938_v51 = vadd.f32 %v930_v54, %v815_v8  ;;  %v5942_v52 = vadd.f32 %v5866_v43, %v815_v8  ;;  %v4885_v54 = vld [vmem:[%s5784_s5] ss:$8 sps:$4 sm:$0xff]  }
 0x196   : > { %v932_v56 = vpop.f32.mrf.mxu0  ;;  %4553 = vmatprep.mubr.bf16.mxu1 %v4885_v54 }
 0x197   : > { %v933_v59 = vadd.f32 %v932_v56, %v5858_v35  ;;  %v5947_v56 = vadd.f32 %v5862_v40, %v815_v8 }
 0x198   : > { %v934_v57 = vpop.f32.mrf.mxu0 }
 0x199   : > { %v5934_v49 = vadd.f32 %v934_v57, %v815_v8  ;;  %v980_v57 = vpack.c.bf16 %v5942_v52, %v5947_v56 }
 0x19a   : > { %v936_v58 = vpop.f32.mrf.mxu0 }
 0x19b   : > { %v937_v60 = vadd.f32 %v936_v58, %v5858_v35  ;;  %v982_v53 = vpack.c.bf16 %v5934_v49, %v5938_v51 }
 0x19c   : > { %v940_v61 = vpop.f32.mrf.mxu0 }
 0x19d   : > { %v5878_v62 = vpack.c.bf16 %v937_v60, %v933_v59  ;;  %v5898_v18 = vadd.f32 %v940_v61, %v815_v8 }
 0x19e   : > { %v942_v63 = vpop.f32.mrf.mxu0 }
 0x19f   : > { %v943_v3 = vadd.f32 %v942_v63, %v5858_v35 }
 0x1a0   : > { %v944_v0 = vpop.f32.mrf.mxu0 }
 0x1a1   : > { %v5892_v13 = vadd.f32 %v944_v0, %v815_v8 }
 0x1a2   : > { %v946_v1 = vpop.f32.mrf.mxu0 }
 0x1a3   : > { %v947_v4 = vadd.f32 %v946_v1, %v5858_v35  ;;  %v983_v22 = vpack.c.bf16 %v5892_v13, %v5898_v18 }
 0x1a4   : > { %v950_v5 = vpop.f32.mrf.mxu0 }
 0x1a5   : > { %v5885_v6 = vpack.c.bf16 %v947_v4, %v943_v3  ;;  %v5888_v10 = vadd.f32 %v950_v5, %v815_v8 }
 0x1a6   : > { %v952_v7 = vpop.f32.mrf.mxu0 }
 0x1a7   : > { %v953_v14 = vadd.f32 %v952_v7, %v5858_v35  ;;  %v4888_v7 = vld [vmem:[%s5784_s5 + $0x10] ss:$8 sps:$4 sm:$0xff]  }
 0x1a8   : > { %v954_v9 = vpop.f32.mrf.mxu0 }
 0x1a9   : > { %v5890_v11 = vadd.f32 %v954_v9, %v815_v8  ;;  %v4893_v9 = vld [vmem:[%s5784_s5 + $0x30] ss:$8 sps:$4 sm:$0xff]  }
 0x1aa   : > { %v956_v12 = vpop.f32.mrf.mxu0 }
 0x1ab   : > { %v957_v15 = vadd.f32 %v956_v12, %v5858_v35  ;;  %v984_v16 = vpack.c.bf16 %v5890_v11, %v5888_v10  ;;  %v4895_v12 = vld [vmem:[%s5784_s5 + $0x40] ss:$8 sps:$4 sm:$0xff]  }
 0x1ac   : > { %v960_v17 = vpop.f32.mrf.mxu0 }
 0x1ad   : > { %v5900_v19 = vpack.c.bf16 %v957_v15, %v953_v14  ;;  %1065 = vrot.lane.b32.xlu1 %v984_v16, %s5487_s13  ;;  %v5931_v47 = vadd.f32 %v960_v17, %v815_v8  ;;  %v4899_v14 = vld [vmem:[%s5784_s5 + $0x60] ss:$8 sps:$4 sm:$0xff]   ;;  %v4901_v15 = vld [vmem:[%s5784_s5 + $0x70] ss:$8 sps:$4 sm:$0xff]   ;;  %v4887_v16 = vld [vmem:[%s5784_s5 + $0x4] ss:$8 sps:$4 sm:$0xff]  }
 0x1ae   : > { %v962_v20 = vpop.f32.mrf.mxu0  ;;  %v4904_v17 = vld [vmem:[%s5784_s5 + $0x34] ss:$8 sps:$4 sm:$0xff]  }
 0x1af   : > { %v963_v27 = vadd.f32 %v962_v20, %v5858_v35  ;;  %v4907_v20 = vld [vmem:[%s5784_s5 + $0x64] ss:$8 sps:$4 sm:$0xff]  }
 0x1b0   : > { %v964_v23 = vpop.f32.mrf.mxu0 }
 0x1b1   : > { %1063 = vrot.lane.b32.xlu1 %v983_v22, %s5487_s13  ;;  %v5927_v46 = vadd.f32 %v964_v23, %v815_v8  ;;  %v4908_v22 = vld [vmem:[%s5784_s5 + $0x74] ss:$8 sps:$4 sm:$0xff]  }
 0x1b2   : > { %v966_v25 = vpop.f32.mrf.mxu0  ;;  %v4910_v23 = vld [vmem:[#allocation7 + $0x10] sm:$0xff]  }
 0x1b3   : > { %v967_v28 = vadd.f32 %v966_v25, %v5858_v35  ;;  %v985_v50 = vpack.c.bf16 %v5927_v46, %v5931_v47  ;;  %v4911_v25 = vld [vmem:[#allocation7 + $0x8] sm:$0xff]  }
 0x1b4   : > { %v970_v34 = vpop.f32.mrf.mxu0 }
 0x1b5   : > { %v993_v38 = vpack.c.bf16 %v967_v28, %v963_v27  ;;  %1059 = vrot.lane.b32.xlu1 %v981_v33, %s5487_s13  ;;  %v5922_v44 = vadd.f32 %v970_v34, %v815_v8 }
 0x1b6   : > { %v972_v39 = vpop.f32.mrf.mxu0 }
 0x1b7   : > { %v973_v4 = vadd.f32 %v972_v39, %v5858_v35 }
 0x1b8   : > { %v974_v36 = vpop.f32.mrf.mxu0 }
 0x1b9   : > { %v5924_v45 = vadd.f32 %v974_v36, %v815_v8  ;;  %1055 = vrot.lane.b32.xlu1 %v979_v42, %s5487_s13  ;;  %v4891_v8 = vld [vmem:[%s5784_s5 + $0x20] ss:$8 sps:$4 sm:$0xff]  }
 0x1ba   : > { %v976_v63 = vpop.f32.mrf.mxu0 }
 0x1bb   : > { %v986_v32 = vpack.c.bf16 %v5924_v45, %v5922_v44  ;;  %v977_v1 = vadd.f32 %v976_v63, %v5858_v35  ;;  %v4897_v35 = vld [vmem:[%s5784_s5 + $0x50] ss:$8 sps:$4 sm:$0xff]  }
 0x1bd   : > { %1069 = vrot.lane.b32.xlu0 %v986_v32, %s5487_s13  ;;  %v994_v5 = vpack.c.bf16 %v977_v1, %v973_v4 }
 0x1c1   : > { %1067 = vrot.lane.b32.xlu0 %v985_v50, %s5487_s13 }
 0x1c5   : > { %1061 = vrot.lane.b32.xlu0 %v982_v53, %s5487_s13 }
 0x1c9   : > { %1057 = vrot.lane.b32.xlu0 %v980_v57, %s5487_s13 }
 0x21f   : > { %v1066_v43 = vpop.permute.xlu1 %1065 }
 0x223   : > { %v1064_v60 = vpop.permute.xlu1 %1063 }
 0x227   : > { %v1060_v61 = vpop.permute.xlu1 %1059 }
 0x22b   : > { %v1056_v3 = vpop.permute.xlu1 %1055 }
 0x22f   : > { %v1070_v58 = vpop.permute.xlu0 %1069 }
 0x230   : > { %4537 = vmatprep.subr.bf16.mxu1 %v1070_v58 }
 0x231   : > { %4538 = vmatpush3.bf16.msra.mxu1 %v1070_v58 }
 0x233   : > { %v1068_v59 = vpop.permute.xlu0 %1067 }
 0x234   : > { %4539 = vmatprep.subr.bf16.mxu1 %v1068_v59 }
 0x235   : > { %4540 = vmatpush3.bf16.msra.mxu1 %v1068_v59 }
 0x236   : > { %4541 = vmatprep.subr.bf16.mxu1 %v1066_v43 }
 0x237   : > { %v1062_v40 = vpop.permute.xlu0 %1061 }
 0x239   : > { %4542 = vmatpush3.bf16.msra.mxu1 %v1066_v43 }
 0x23a   : > { %4543 = vmatprep.subr.bf16.mxu1 %v1064_v60 }
 0x23b   : > { %v1058_v0 = vpop.permute.xlu0 %1057 }
 0x23d   : > { %4544 = vmatpush3.bf16.msra.mxu1 %v1064_v60  ;;  %v6018_v60 = vld [vmem:[%s7537_s4] sm:$0x3] }
 0x23e   : > { %4545 = vmatprep.subr.bf16.mxu1 %v1062_v40 }
 0x241   : > { %4546 = vmatpush3.bf16.msra.mxu1 %v1062_v40 }
 0x242   : > { %4547 = vmatprep.subr.bf16.mxu1 %v1060_v61 }
 0x245   : > { %4548 = vmatpush3.bf16.msra.mxu1 %v1060_v61  ;;  %v1179_v61 = vrot.slane %v6018_v60, %v5850_v31 }
 0x246   : > { %4549 = vmatprep.subr.bf16.mxu1 %v1058_v0 }
 0x249   : > { %4550 = vmatpush3.bf16.msra.mxu1 %v1058_v0 }
 0x24a   : > { %4551 = vmatprep.subr.bf16.mxu1 %v1056_v3 }
 0x24d   : > { %4552 = vmatpush3.bf16.msra.mxu1 %v1056_v3 }
 0x24e   : > { %4569 = vmatprep.subr.bf16.mxu1 %v994_v5 }
 0x250   : > { %4554 = vmatmul.mubr.bf16.vlgmr.msra.gmra.mxu1 %v4888_v7 }
 0x251   : > { %4570 = vmatpush3.bf16.msra.mxu1 %v994_v5  ;;  %4557 = vmatprep.mubr.bf16.mxu1 %v4891_v8 }
 0x252   : > { %4571 = vmatprep.subr.bf16.mxu1 %v993_v38 }
 0x255   : > { %4572 = vmatpush3.bf16.msra.mxu1 %v993_v38 }
 0x256   : > { %4573 = vmatprep.subr.bf16.mxu1 %v5900_v19 }
 0x258   : > { %4558 = vmatmul.mubr.bf16.gmra.mxu1 %v4893_v9 }
 0x259   : > { %4574 = vmatpush3.bf16.msra.mxu1 %v5900_v19  ;;  %4561 = vmatprep.mubr.bf16.mxu1 %v4895_v12  ;;  %v4905_v19 = vld [vmem:[%s5784_s5 + $0x44] ss:$8 sps:$4 sm:$0xff]  }
 0x25a   : > { %4575 = vmatprep.subr.bf16.mxu1 %v5885_v6 }
 0x25d   : > { %4576 = vmatpush3.bf16.msra.mxu1 %v5885_v6  ;;  %v4903_v6 = vld [vmem:[%s5784_s5 + $0x24] ss:$8 sps:$4 sm:$0xff]  }
 0x25e   : > { %4577 = vmatprep.subr.bf16.mxu1 %v5878_v62 }
 0x260   : > { %4562 = vmatmul.mubr.bf16.gmra.mxu1 %v4897_v35 }
 0x261   : > { %4578 = vmatpush3.bf16.msra.mxu1 %v5878_v62  ;;  %4565 = vmatprep.mubr.bf16.mxu1 %v4899_v14  ;;  %v4890_v62 = vld [vmem:[%s5784_s5 + $0x14] ss:$8 sps:$4 sm:$0xff]  }
 0x262   : > { %4579 = vmatprep.subr.bf16.mxu1 %v5874_v55 }
 0x265   : > { %4580 = vmatpush3.bf16.msra.mxu1 %v5874_v55  ;;  %v4906_v55 = vld [vmem:[%s5784_s5 + $0x54] ss:$8 sps:$4 sm:$0xff]   ;;  %s5367_s5 = sshll.u32 %s5493_s22, 4  ;;  %s5368_s5 = int_to_ptr.vmem [resolvable:$false] %s5367_s5 }
 0x266   : > { %4581 = vmatprep.subr.bf16.mxu1 %v5870_v48  ;;  %s5369_s27 = scalar_lea.vmem %s5368_s5, 4096 }
 0x268   : > { %4566 = vmatmul.mubr.bf16.gmra.mxu1 %v4901_v15 }
 0x269   : > { %4582 = vmatpush3.bf16.msra.mxu1 %v5870_v48  ;;  %4585 = vmatprep.mubr.bf16.mxu1 %v4887_v16  ;;  %v4909_v48 = vld [vmem:[#allocation7 + $0x18] sm:$0xff]  }
 0x26a   : > { %4583 = vmatprep.subr.bf16.mxu1 %v5864_v41  ;;  %4601 = vmatprep.subr.bf16.mxu0 %v4909_v48 }
 0x26b   : > { %4602 = vmatpush3.bf16.msra.mxu0 %v4909_v48 }
 0x26c   : > { %4603 = vmatprep.subr.bf16.mxu0 %v4910_v23 }
 0x26d   : > { %4584 = vmatpush3.bf16.msra.mxu1 %v5864_v41  ;;  %v4912_v41 = vld [vmem:[#allocation7] sm:$0xff]  }
 0x26f   : > { %4604 = vmatpush3.bf16.msra.mxu0 %v4910_v23 }
 0x270   : > { %4586 = vmatmul.mubr.bf16.vlgmr.msra.gmra.mxu1 %v4890_v62  ;;  %4605 = vmatprep.subr.bf16.mxu0 %v4911_v25 }
 0x271   : > { %4589 = vmatprep.mubr.bf16.mxu1 %v4903_v6 }
 0x273   : > { %4606 = vmatpush3.bf16.msra.mxu0 %v4911_v25 }
 0x274   : > { %4607 = vmatprep.subr.bf16.mxu0 %v4912_v41 }
 0x277   : > { %4608 = vmatpush3.bf16.msra.mxu0 %v4912_v41 }
 0x278   : > { %4590 = vmatmul.mubr.bf16.gmra.mxu1 %v4904_v17 }
 0x279   : > { %4593 = vmatprep.mubr.bf16.mxu1 %v4905_v19 }
 0x280   : > { %4594 = vmatmul.mubr.bf16.gmra.mxu1 %v4906_v55 }
 0x281   : > { %4597 = vmatprep.mubr.bf16.mxu1 %v4907_v20 }
 0x288   : > { %4598 = vmatmul.mubr.bf16.gmra.mxu1 %v4908_v22 }
 0x310   : > { %v5983_v27 = vpop.f32.mrf.mxu1 }
 0x312   : > { %v5985_v28 = vpop.f32.mrf.mxu1 }
 0x314   : > { %v5987_v33 = vpop.f32.mrf.mxu1 }
 0x316   : > { %v5989_v34 = vpop.f32.mrf.mxu1 }
 0x318   : > { %v5991_v38 = vpop.f32.mrf.mxu1 }
 0x31a   : > { %v5993_v39 = vpop.f32.mrf.mxu1 }
 0x31c   : > { %v5995_v42 = vpop.f32.mrf.mxu1 }
 0x31e   : > { %v5997_v36 = vpop.f32.mrf.mxu1 }
 0x320   : > { %v5999_v32 = vpop.f32.mrf.mxu1 }
 0x322   : > { %v6001_v50 = vpop.f32.mrf.mxu1 }
 0x324   : > { %v6003_v53 = vpop.f32.mrf.mxu1 }
 0x326   : > { %v6005_v57 = vpop.f32.mrf.mxu1 }
 0x328   : > { %v6007_v54 = vpop.f32.mrf.mxu1 }
 0x32a   : > { %v6009_v58 = vpop.f32.mrf.mxu1 }
 0x32c   : > { %v6011_v43 = vpop.f32.mrf.mxu1 }
 0x32e   : > { %v6013_v59 = vpop.f32.mrf.mxu1 }
 0x330   : > { %v4587_v40 = vpop.f32.mrf.mxu1 }
 0x331   : > { %v1255_v1 = vadd.f32 %v4587_v40, %v1179_v61 }
 0x332   : > { %v1246_v63 = vpop.f32.mrf.mxu1 }
 0x333   : > { %v1247_v5 = vadd.f32 %v1246_v63, %v1179_v61 }
 0x334   : > { %v4588_v0 = vpop.f32.mrf.mxu1 }
 0x335   : > { %v1258_v3 = vadd.f32 %v4588_v0, %v1179_v61 }
 0x336   : > { %v1249_v4 = vpop.f32.mrf.mxu1 }
 0x337   : > { %v4802_v7 = vpack.i.bf16 %v1258_v3, %v1255_v1  ;;  %v1250_v8 = vadd.f32 %v1249_v4, %v1179_v61 }
 0x338   : > { %v4591_v9 = vpop.f32.mrf.mxu1 }
 0x339   : > { %v4797_v12 = vpack.i.bf16 %v1250_v8, %v1247_v5  ;;  %4803 = vrot.lane.b32.xlu1 %v4802_v7, %s5487_s13  ;;  %v1271_v15 = vadd.f32 %v4591_v9, %v1179_v61 }
 0x33a   : > { %v1262_v35 = vpop.f32.mrf.mxu1 }
 0x33b   : > { %4798 = vrot.lane.b32.xlu0 %v4797_v12, %s5487_s13  ;;  %v1263_v6 = vadd.f32 %v1262_v35, %v1179_v61 }
 0x33c   : > { %v4592_v14 = vpop.f32.mrf.mxu1 }
 0x33d   : > { %v1274_v16 = vadd.f32 %v4592_v14, %v1179_v61 }
 0x33e   : > { %v1265_v62 = vpop.f32.mrf.mxu1 }
 0x33f   : > { %v4812_v17 = vpack.i.bf16 %v1274_v16, %v1271_v15  ;;  %v1266_v19 = vadd.f32 %v1265_v62, %v1179_v61 }
 0x340   : > { %v4595_v55 = vpop.f32.mrf.mxu1 }
 0x341   : > { %v4807_v20 = vpack.i.bf16 %v1266_v19, %v1263_v6  ;;  %4813 = vrot.lane.b32.xlu1 %v4812_v17, %s5487_s13  ;;  %v1287_v23 = vadd.f32 %v4595_v55, %v1179_v61 }
 0x342   : > { %v1278_v22 = vpop.f32.mrf.mxu1 }
 0x343   : > { %4808 = vrot.lane.b32.xlu0 %v4807_v20, %s5487_s13  ;;  %v1279_v40 = vadd.f32 %v1278_v22, %v1179_v61 }
 0x344   : > { %v4596_v48 = vpop.f32.mrf.mxu1 }
 0x345   : > { %v1290_v25 = vadd.f32 %v4596_v48, %v1179_v61 }
 0x346   : > { %v1281_v41 = vpop.f32.mrf.mxu1 }
 0x347   : > { %v4822_v63 = vpack.i.bf16 %v1290_v25, %v1287_v23  ;;  %v1282_v0 = vadd.f32 %v1281_v41, %v1179_v61 }
 0x348   : > { %v4599_v1 = vpop.f32.mrf.mxu1 }
 0x349   : > { %v4817_v3 = vpack.i.bf16 %v1282_v0, %v1279_v40  ;;  %4823 = vrot.lane.b32.xlu1 %v4822_v63, %s5487_s13  ;;  %v1303_v5 = vadd.f32 %v4599_v1, %v1179_v61 }
 0x34a   : > { %v1294_v4 = vpop.f32.mrf.mxu1 }
 0x34b   : > { %4818 = vrot.lane.b32.xlu0 %v4817_v3, %s5487_s13  ;;  %v1295_v8 = vadd.f32 %v1294_v4, %v1179_v61 }
 0x34c   : > { %v4600_v7 = vpop.f32.mrf.mxu1 }
 0x34d   : > { %v1306_v9 = vadd.f32 %v4600_v7, %v1179_v61 }
 0x34e   : > { %v1297_v12 = vpop.f32.mrf.mxu1 }
 0x34f   : > { %v4832_v35 = vpack.i.bf16 %v1306_v9, %v1303_v5  ;;  %v1298_v14 = vadd.f32 %v1297_v12, %v1179_v61  ;;  %v998_v61 = vrot.slane %v6018_v60, %v5881_v2  ;;  %v5154_v2 = vld [vmem:[%s5792_s8 + $0x58] sm:$0xff] }
 0x351   : > { %v4827_v15 = vpack.i.bf16 %v1298_v14, %v1295_v8  ;;  %4833 = vrot.lane.b32.xlu1 %v4832_v35, %s5487_s13  ;;  %v1122_v62 = vadd.f32 %v5983_v27, %v998_v61  ;;  %v1125_v6 = vadd.f32 %v5987_v33, %v998_v61  ;;  %v1114_v55 = vadd.f32 %v5985_v28, %v998_v61 }
 0x352   : > { %v1117_v20 = vadd.f32 %v5989_v34, %v998_v61  ;;  %v1138_v28 = vadd.f32 %v5991_v38, %v998_v61  ;;  %v1141_v34 = vadd.f32 %v5995_v42, %v998_v61  ;;  %v1130_v3 = vadd.f32 %v5993_v39, %v998_v61 }
 0x353   : > { %4828 = vrot.lane.b32.xlu0 %v4827_v15, %s5487_s13  ;;  %v1133_v4 = vadd.f32 %v5997_v36, %v998_v61  ;;  %v1154_v39 = vadd.f32 %v5999_v32, %v998_v61  ;;  %v1157_v36 = vadd.f32 %v6003_v53, %v998_v61 }
 0x355   : > { %1679 = vrot.lane.b32.xlu1 %v5910_v26, %s5488_s20 }
 0x357   : > { %1677 = vrot.lane.b32.xlu0 %v5917_v37, %s5488_s20 }
 0x359   : > { %1683 = vrot.lane.b32.xlu1 %v5942_v52, %s5488_s20 }
 0x35b   : > { %1681 = vrot.lane.b32.xlu0 %v5947_v56, %s5488_s20 }
 0x35d   : > { %1687 = vrot.lane.b32.xlu1 %v5903_v21, %s5488_s20 }
 0x35f   : > { %1685 = vrot.lane.b32.xlu0 %v5907_v24, %s5488_s20 }
 0x361   : > { %1691 = vrot.lane.b32.xlu1 %v5934_v49, %s5488_s20 }
 0x363   : > { %1689 = vrot.lane.b32.xlu0 %v5938_v51, %s5488_s20 }
 0x365   : > { %1695 = vrot.lane.b32.xlu1 %v5892_v13, %s5488_s20 }
 0x367   : > { %1693 = vrot.lane.b32.xlu0 %v5898_v18, %s5488_s20 }
 0x369   : > { %1699 = vrot.lane.b32.xlu1 %v5890_v11, %s5488_s20 }
 0x36b   : > { %1697 = vrot.lane.b32.xlu0 %v5888_v10, %s5488_s20 }
 0x36d   : > { %1703 = vrot.lane.b32.xlu1 %v5927_v46, %s5488_s20 }
 0x36f   : > { %1701 = vrot.lane.b32.xlu0 %v5931_v47, %s5488_s20 }
 0x371   : > { %1707 = vrot.lane.b32.xlu1 %v5924_v45, %s5488_s20 }
 0x373   : > { %1705 = vrot.lane.b32.xlu0 %v5922_v44, %s5488_s20 }
 0x3ab   : > { %v4804_v16 = vpop.permute.xlu1 %4803 }
 0x3ac   : > { %v4806_v17 = vunpack.i.h.bf16 %v4804_v16  ;;  %v4805_v19 = vunpack.i.l.bf16 %v4804_v16 }
 0x3ad   : > { %v4799_v22 = vpop.permute.xlu0 %4798 }
 0x3ae   : > { %v1376_v48 = vsel %vm673_vm0, %v1125_v6, %v4806_v17  ;;  %v1375_v23 = vsel %vm673_vm0, %v1122_v62, %v4805_v19  ;;  %v4801_v25 = vunpack.i.h.bf16 %v4799_v22  ;;  %v4800_v41 = vunpack.i.l.bf16 %v4799_v22 }
 0x3af   : > { %v1390_v40 = vpack.c.bf16 %v1376_v48, %v1375_v23  ;;  %v1146_v6 = vadd.f32 %v6001_v50, %v998_v61  ;;  %v1149_v17 = vadd.f32 %v6005_v57, %v998_v61  ;;  %v1170_v50 = vadd.f32 %v6007_v54, %v998_v61 }
 0x3b0   : > { %v1373_v60 = vsel %vm673_vm0, %v1114_v55, %v4800_v41  ;;  %v1374_v27 = vsel %vm673_vm0, %v1117_v20, %v4801_v25  ;;  %v1173_v57 = vadd.f32 %v6011_v43, %v998_v61 }
 0x3b1   : > { %v1389_v33 = vpack.c.bf16 %v1374_v27, %v1373_v60  ;;  %v1162_v27 = vadd.f32 %v6009_v58, %v998_v61  ;;  %v6104_v58 = vld [vmem:[#allocation8] ss:$0 sm:$0xff] }
 0x3b3   : > { %v4814_v63 = vpop.permute.xlu1 %4813  ;;  %4609 = vmatprep.mubr.msk.bf16.mxu0 %vm1427_vm1, %v1389_v33  ;;  %v1165_v33 = vadd.f32 %v6013_v59, %v998_v61 }
 0x3b4   : > { %v4816_v0 = vunpack.i.h.bf16 %v4814_v63  ;;  %v4815_v1 = vunpack.i.l.bf16 %v4814_v63  ;;  %4610 = vmatmul.mubr.msk.bf16.vlgmr.msra.gmra.mxu0 %vm1427_vm1, %v1390_v40 }
 0x3b5   : > { %v4809_v5 = vpop.permute.xlu0 %4808 }
 0x3b6   : > { %v1380_v7 = vsel %vm673_vm0, %v1141_v34, %v4816_v0  ;;  %v1379_v8 = vsel %vm673_vm0, %v1138_v28, %v4815_v1  ;;  %v4811_v9 = vunpack.i.h.bf16 %v4809_v5  ;;  %v4810_v12 = vunpack.i.l.bf16 %v4809_v5 }
 0x3b7   : > { %v1392_v35 = vpack.c.bf16 %v1380_v7, %v1379_v8 }
 0x3b8   : > { %v1377_v38 = vsel %vm673_vm0, %v1130_v3, %v4810_v12  ;;  %v1378_v42 = vsel %vm673_vm0, %v1133_v4, %v4811_v9 }
 0x3b9   : > { %v1391_v14 = vpack.c.bf16 %v1378_v42, %v1377_v38 }
 0x3bb   : > { %v4824_v15 = vpop.permute.xlu1 %4823  ;;  %4613 = vmatprep.mubr.msk.bf16.mxu0 %vm1427_vm1, %v1391_v14 }
 0x3bc   : > { %v4826_v16 = vunpack.i.h.bf16 %v4824_v15  ;;  %v4825_v62 = vunpack.i.l.bf16 %v4824_v15  ;;  %4614 = vmatmul.mubr.msk.bf16.gmra.mxu0 %vm1427_vm1, %v1392_v35 }
 0x3bd   : > { %v4819_v19 = vpop.permute.xlu0 %4818 }
 0x3be   : > { %v1384_v55 = vsel %vm673_vm0, %v1157_v36, %v4826_v16  ;;  %v1383_v20 = vsel %vm673_vm0, %v1154_v39, %v4825_v62  ;;  %v4821_v22 = vunpack.i.h.bf16 %v4819_v19  ;;  %v4820_v48 = vunpack.i.l.bf16 %v4819_v19 }
 0x3bf   : > { %v1394_v23 = vpack.c.bf16 %v1384_v55, %v1383_v20 }
 0x3c0   : > { %v1381_v32 = vsel %vm673_vm0, %v1146_v6, %v4820_v48  ;;  %v1382_v53 = vsel %vm673_vm0, %v1149_v17, %v4821_v22 }
 0x3c1   : > { %v1393_v25 = vpack.c.bf16 %v1382_v53, %v1381_v32 }
 0x3c3   : > { %v4834_v41 = vpop.permute.xlu1 %4833  ;;  %4617 = vmatprep.mubr.msk.bf16.mxu0 %vm1427_vm1, %v1393_v25 }
 0x3c4   : > { %v4836_v40 = vunpack.i.h.bf16 %v4834_v41  ;;  %v4835_v60 = vunpack.i.l.bf16 %v4834_v41  ;;  %4618 = vmatmul.mubr.msk.bf16.gmra.mxu0 %vm1427_vm1, %v1394_v23 }
 0x3c5   : > { %v4829_v63 = vpop.permute.xlu0 %4828 }
 0x3c6   : > { %v1388_v28 = vsel %vm673_vm0, %v1173_v57, %v4836_v40  ;;  %v1387_v34 = vsel %vm673_vm0, %v1170_v50, %v4835_v60  ;;  %v4831_v0 = vunpack.i.h.bf16 %v4829_v63  ;;  %v4830_v1 = vunpack.i.l.bf16 %v4829_v63 }
 0x3c7   : > { %v1396_v3 = vpack.c.bf16 %v1388_v28, %v1387_v34 }
 0x3c8   : > { %v1385_v54 = vsel %vm673_vm0, %v1162_v27, %v4830_v1  ;;  %v1386_v43 = vsel %vm673_vm0, %v1165_v33, %v4831_v0 }
 0x3c9   : > { %v1395_v4 = vpack.c.bf16 %v1386_v43, %v1385_v54 }
 0x3cb   : > { %4621 = vmatprep.mubr.msk.bf16.mxu0 %vm1427_vm1, %v1395_v4  ;;  %v1678_v4 = vpop.permute.xlu0 %1677 }
 0x3cc   : > { %4622 = vmatmul.mubr.msk.bf16.gmra.mxu0 %vm1427_vm1, %v1396_v3 }
 0x474   : > { %v4611_v59 = vpop.f32.mrf.mxu0 }
 0x475   : > { %v6107_v61 = vadd.f32 %v4611_v59, %v6104_v58 }
 0x476   : > { %v1486_v5 = vpop.f32.mrf.mxu0 }
 0x477   : > { %v1551_v7 = vadd.f32 %v6107_v61, %v5947_v56  ;;  %v6112_v8 = vadd.f32 %v6104_v58, %v1486_v5 }
 0x478   : > { %v4612_v9 = vpop.f32.mrf.mxu0 }
 0x479   : > { %v4398_v12 = vmul.f32 -1.442695, %v1551_v7  ;;  %v1549_v35 = vadd.f32 %v6112_v8, %v5917_v37  ;;  %v6117_v38 = vadd.f32 %v4612_v9, %v6104_v58 }
 0x47a   : > { %v1489_v42 = vpop.f32.mrf.mxu0 }
 0x47b   : > { %4921 = vpow2.f32 %v4398_v12  ;;  %v4396_v14 = vmul.f32 -1.442695, %v1549_v35  ;;  %v1552_v15 = vadd.f32 %v6117_v38, %v5942_v52  ;;  %v6122_v39 = vadd.f32 %v6104_v58, %v1489_v42 }
 0x47c   : > { %v4615_v56 = vpop.f32.mrf.mxu0 }
 0x47d   : > { %4923 = vpow2.f32 %v4396_v14  ;;  %v4399_v36 = vmul.f32 -1.442695, %v1552_v15  ;;  %v1550_v16 = vadd.f32 %v6122_v39, %v5910_v26  ;;  %v6127_v37 = vadd.f32 %v4615_v56, %v6104_v58 }
 0x47e   : > { %v1502_v62 = vpop.f32.mrf.mxu0 }
 0x47f   : > { %4925 = vpow2.f32 %v4399_v36  ;;  %v4397_v6 = vmul.f32 -1.442695, %v1550_v16  ;;  %v1555_v17 = vadd.f32 %v6127_v37, %v5938_v51  ;;  %v6132_v52 = vadd.f32 %v6104_v58, %v1502_v62 }
 0x480   : > { %v4616_v19 = vpop.f32.mrf.mxu0 }
 0x481   : > { %4927 = vpow2.f32 %v4397_v6  ;;  %v4402_v55 = vmul.f32 -1.442695, %v1555_v17  ;;  %v1553_v20 = vadd.f32 %v6132_v52, %v5907_v24  ;;  %v6137_v26 = vadd.f32 %v4616_v19, %v6104_v58  ;;  %v1682_v19 = vpop.permute.xlu0 %1681 }
 0x482   : > { %v1505_v22 = vpop.f32.mrf.mxu0 }
 0x483   : > { %4929 = vpow2.f32 %v4402_v55  ;;  %v4400_v48 = vmul.f32 -1.442695, %v1553_v20  ;;  %v1556_v23 = vadd.f32 %v6137_v26, %v5934_v49  ;;  %v6142_v51 = vadd.f32 %v6104_v58, %v1505_v22 }
 0x484   : > { %v4619_v32 = vpop.f32.mrf.mxu0 }
 0x485   : > { %4931 = vpow2.f32 %v4400_v48  ;;  %v4403_v53 = vmul.f32 -1.442695, %v1556_v23  ;;  %v1554_v25 = vadd.f32 %v6142_v51, %v5903_v21  ;;  %v6147_v24 = vadd.f32 %v4619_v32, %v6104_v58 }
 0x486   : > { %v1518_v41 = vpop.f32.mrf.mxu0 }
 0x487   : > { %4933 = vpow2.f32 %v4403_v53  ;;  %v4401_v50 = vmul.f32 -1.442695, %v1554_v25  ;;  %v1559_v57 = vadd.f32 %v6147_v24, %v5888_v10  ;;  %v6152_v49 = vadd.f32 %v6104_v58, %v1518_v41 }
 0x488   : > { %v4922_v40 = vpop.eup %4921  ;;  %v4620_v60 = vpop.f32.mrf.mxu0 }
 0x489   : > { %v1615_v27 = vadd.f32 1.0, %v4922_v40  ;;  %4935 = vpow2.f32 %v4401_v50  ;;  %v4406_v33 = vmul.f32 -1.442695, %v1559_v57  ;;  %v1557_v21 = vadd.f32 %v6152_v49, %v5898_v18 }
 0x48a   : > { %v4924_v63 = vpop.eup %4923  ;;  %v6157_v28 = vadd.f32 %v4620_v60, %v6104_v58  ;;  %v1521_v34 = vpop.f32.mrf.mxu0 }
 0x48b   : > { %4937 = vrcp.f32 %v1615_v27  ;;  %v1613_v0 = vadd.f32 1.0, %v4924_v63  ;;  %v4404_v1 = vmul.f32 -1.442695, %v1557_v21  ;;  %v6160_v10 = vadd.f32 %v6104_v58, %v1521_v34 }
 0x48c   : > { %v4926_v3 = vpop.eup %4925  ;;  %4939 = vpow2.f32 %v4406_v33  ;;  %v1560_v54 = vadd.f32 %v6157_v28, %v5890_v11  ;;  %v4623_v43 = vpop.f32.mrf.mxu0 }
 0x48d   : > { %4941 = vrcp.f32 %v1613_v0  ;;  %v1616_v18 = vadd.f32 1.0, %v4926_v3  ;;  %v1558_v59 = vadd.f32 %v6160_v10, %v5892_v13  ;;  %v6167_v5 = vadd.f32 %v4623_v43, %v6104_v58  ;;  %v1680_v13 = vpop.permute.xlu1 %1679 }
 0x48e   : > { %v4928_v7 = vpop.eup %4927  ;;  %4943 = vpow2.f32 %v4404_v1  ;;  %v4407_v9 = vmul.f32 -1.442695, %v1560_v54  ;;  %v1534_v12 = vpop.f32.mrf.mxu0 }
 0x48f   : > { %4945 = vrcp.f32 %v1616_v18  ;;  %v1614_v35 = vadd.f32 1.0, %v4928_v7  ;;  %v4405_v42 = vmul.f32 -1.442695, %v1558_v59  ;;  %v1563_v11 = vadd.f32 %v6167_v5, %v5922_v44 }
 0x490   : > { %v4930_v14 = vpop.eup %4929  ;;  %4947 = vpow2.f32 %v4407_v9  ;;  %v6172_v15 = vadd.f32 %v6104_v58, %v1534_v12  ;;  %v4624_v56 = vpop.f32.mrf.mxu0 }
 0x491   : > { %4949 = vrcp.f32 %v1614_v35  ;;  %v4410_v36 = vmul.f32 -1.442695, %v1563_v11  ;;  %v6175_v16 = vadd.f32 %v4624_v56, %v6104_v58  ;;  %v1619_v44 = vadd.f32 1.0, %v4930_v14 }
 0x492   : > { %v4932_v62 = vpop.eup %4931  ;;  %4951 = vpow2.f32 %v4405_v42  ;;  %v1561_v6 = vadd.f32 %v6172_v15, %v5931_v47  ;;  %v1537_v17 = vpop.f32.mrf.mxu0 }
 0x493   : > { %v1617_v55 = vadd.f32 1.0, %v4932_v62  ;;  %v1564_v20 = vadd.f32 %v6175_v16, %v5924_v45  ;;  %v6182_v22 = vadd.f32 %v6104_v58, %v1537_v17  ;;  %4953 = vpow2.f32 %v4410_v36  ;;  %v1684_v47 = vpop.permute.xlu1 %1683  ;;  %v1686_v58 = vpop.permute.xlu0 %1685 }
 0x494   : > { %v4934_v48 = vpop.eup %4933  ;;  %v4408_v23 = vmul.f32 -1.442695, %v1561_v6 }
 0x495   : > { %4955 = vrcp.f32 %v1617_v55  ;;  %v4411_v32 = vmul.f32 -1.442695, %v1564_v20  ;;  %v1562_v53 = vadd.f32 %v6182_v22, %v5927_v46  ;;  %v1620_v41 = vadd.f32 1.0, %v4934_v48 }
 0x496   : > { %v4936_v25 = vpop.eup %4935  ;;  %4957 = vpow2.f32 %v4408_v23 }
 0x497   : > { %4959 = vrcp.f32 %v1619_v44  ;;  %v1618_v50 = vadd.f32 1.0, %v4936_v25  ;;  %v4409_v57 = vmul.f32 -1.442695, %v1562_v53  ;;  %v1688_v0 = vpop.permute.xlu1 %1687  ;;  %v1690_v54 = vpop.permute.xlu0 %1689 }
 0x498   : > { %v6186_v40 = vpop.eup %4937  ;;  %4961 = vpow2.f32 %v4411_v32 }
 0x499   : > { %v4940_v45 = vpop.eup %4939  ;;  %4963 = vrcp.f32 %v1618_v50  ;;  %v1727_v18 = vmul.f32 %v6186_v40, %v1682_v19 }
 0x49a   : > { %v6188_v60 = vpop.eup %4941  ;;  %4965 = vpow2.f32 %v4409_v57  ;;  %v1623_v21 = vadd.f32 1.0, %v4940_v45 }
 0x49b   : > { %v4944_v27 = vpop.eup %4943  ;;  %4967 = vrcp.f32 %v1620_v41  ;;  %v1725_v46 = vmul.f32 %v6188_v60, %v1678_v4  ;;  %v1692_v35 = vpop.permute.xlu1 %1691 }
 0x49c   : > { %v6191_v33 = vpop.eup %4945  ;;  %v1621_v63 = vadd.f32 1.0, %v4944_v27  ;;  %v1694_v62 = vpop.permute.xlu0 %1693 }
 0x49d   : > { %v4948_v34 = vpop.eup %4947  ;;  %1757 = vrot.lane.b32.xlu0 %v1725_v46, %s5488_s20  ;;  %v1728_v42 = vmul.f32 %v6191_v33, %v1684_v47 }
 0x49e   : > { %v6194_v1 = vpop.eup %4949  ;;  %4969 = vrcp.f32 %v1621_v63  ;;  %v1624_v59 = vadd.f32 1.0, %v4948_v34 }
 0x49f   : > { %v4952_v3 = vpop.eup %4951  ;;  %v1726_v43 = vmul.f32 %v6194_v1, %v1680_v13  ;;  %4971 = vrcp.f32 %v1623_v21  ;;  %v1696_v23 = vpop.permute.xlu1 %1695 }
 0x4a0   : > { %v1622_v4 = vadd.f32 1.0, %v4952_v3  ;;  %v4954_v7 = vpop.eup %4953  ;;  %v1698_v53 = vpop.permute.xlu0 %1697 }
 0x4a1   : > { %1759 = vrot.lane.b32.xlu1 %v1726_v43, %s5488_s20  ;;  %1761 = vrot.lane.b32.xlu0 %v1727_v18, %s5488_s20  ;;  %v1627_v56 = vadd.f32 1.0, %v4954_v7 }
 0x4a2   : > { %v6200_v9 = vpop.eup %4955  ;;  %4973 = vrcp.f32 %v1622_v4 }
 0x4a3   : > { %v4958_v12 = vpop.eup %4957  ;;  %v1729_v11 = vmul.f32 %v6200_v9, %v1686_v58  ;;  %4975 = vrcp.f32 %v1624_v59  ;;  %v1700_v57 = vpop.permute.xlu1 %1699 }
 0x4a4   : > { %v6204_v14 = vpop.eup %4959  ;;  %v1625_v13 = vadd.f32 1.0, %v4958_v12  ;;  %v1702_v46 = vpop.permute.xlu0 %1701 }
 0x4a5   : > { %v4962_v36 = vpop.eup %4961  ;;  %1763 = vrot.lane.b32.xlu1 %v1728_v42, %s5488_s20  ;;  %1765 = vrot.lane.b32.xlu0 %v1729_v11, %s5488_s20  ;;  %v1731_v44 = vmul.f32 %v6204_v14, %v1690_v54 }
 0x4a6   : > { %v6208_v6 = vpop.eup %4963  ;;  %4977 = vrcp.f32 %v1625_v13  ;;  %v1628_v20 = vadd.f32 1.0, %v4962_v36 }
 0x4a7   : > { %v4966_v17 = vpop.eup %4965  ;;  %v1730_v19 = vmul.f32 %v6208_v6, %v1688_v0  ;;  %4979 = vrcp.f32 %v1627_v56  ;;  %v1704_v3 = vpop.permute.xlu1 %1703 }
 0x4a8   : > { %v6212_v55 = vpop.eup %4967  ;;  %v1626_v48 = vadd.f32 1.0, %v4966_v17  ;;  %v1706_v43 = vpop.permute.xlu0 %1705 }
 0x4a9   : > { %1767 = vrot.lane.b32.xlu1 %v1730_v19, %s5488_s20  ;;  %1769 = vrot.lane.b32.xlu0 %v1731_v44, %s5488_s20  ;;  %v1732_v25 = vmul.f32 %v6212_v55, %v1692_v35 }
 0x4aa   : > { %4981 = vrcp.f32 %v1626_v48 }
 0x4ab   : > { %v6216_v32 = vpop.eup %4969  ;;  %4983 = vrcp.f32 %v1628_v20  ;;  %v1708_v7 = vpop.permute.xlu1 %1707 }
 0x4ac   : > { %v1733_v47 = vmul.f32 %v6216_v32, %v1694_v62  ;;  %v6220_v41 = vpop.eup %4971 }
 0x4ad   : > { %1771 = vrot.lane.b32.xlu1 %v1732_v25, %s5488_s20  ;;  %v1735_v58 = vmul.f32 %v6220_v41, %v1698_v53 }
 0x4ae   : > { %1773 = vrot.lane.b32.xlu0 %v1733_v47, %s5488_s20 }
 0x4af   : > { %v6224_v50 = vpop.eup %4973 }
 0x4b0   : > { %v1734_v45 = vmul.f32 %v6224_v50, %v1696_v23  ;;  %v6228_v27 = vpop.eup %4975 }
 0x4b1   : > { %v1736_v63 = vmul.f32 %v6228_v27, %v1700_v57 }
 0x4b2   : > { %1775 = vrot.lane.b32.xlu1 %v1734_v45, %s5488_s20  ;;  %1777 = vrot.lane.b32.xlu0 %v1735_v58, %s5488_s20 }
 0x4b3   : > { %v6232_v21 = vpop.eup %4977 }
 0x4b4   : > { %v1737_v34 = vmul.f32 %v6232_v21, %v1702_v46  ;;  %v6236_v0 = vpop.eup %4979 }
 0x4b5   : > { %v1739_v59 = vmul.f32 %v6236_v0, %v1706_v43 }
 0x4b6   : > { %1779 = vrot.lane.b32.xlu1 %v1736_v63, %s5488_s20  ;;  %1781 = vrot.lane.b32.xlu0 %v1737_v34, %s5488_s20 }
 0x4b7   : > { %v6240_v54 = vpop.eup %4981 }
 0x4b8   : > { %v1738_v18 = vmul.f32 %v6240_v54, %v1704_v3  ;;  %v6244_v4 = vpop.eup %4983 }
 0x4b9   : > { %v1740_v12 = vmul.f32 %v6244_v4, %v1708_v7 }
 0x4ba   : > { %1783 = vrot.lane.b32.xlu1 %v1738_v18, %s5488_s20  ;;  %1785 = vrot.lane.b32.xlu0 %v1739_v59, %s5488_s20 }
 0x4be   : > { %1787 = vrot.lane.b32.xlu1 %v1740_v12, %s5488_s20 }
 0x50f   : > { %v1758_v35 = vpop.permute.xlu0 %1757 }
 0x510   : > { %v1805_v42 = vadd.f32 %v1758_v35, %v6112_v8 }
 0x512   : > { %4985 = vtanh.f32 %v1805_v42 }
 0x513   : > { %v1760_v11 = vpop.permute.xlu1 %1759  ;;  %v1762_v56 = vpop.permute.xlu0 %1761 }
 0x514   : > { %v1806_v13 = vadd.f32 %v1760_v11, %v6122_v39  ;;  %v1807_v36 = vadd.f32 %v1762_v56, %v6107_v61 }
 0x516   : > { %4987 = vtanh.f32 %v1806_v13 }
 0x517   : > { %4989 = vtanh.f32 %v1807_v36  ;;  %v1764_v62 = vpop.permute.xlu1 %1763  ;;  %v1766_v17 = vpop.permute.xlu0 %1765 }
 0x518   : > { %v1808_v19 = vadd.f32 %v1764_v62, %v6117_v38  ;;  %v1809_v44 = vadd.f32 %v1766_v17, %v6132_v52  ;;  %v5145_v17 = vld [vmem:[%s5792_s8 + $0x10] sm:$0xff] }
 0x51a   : > { %4991 = vtanh.f32 %v1808_v19 }
 0x51b   : > { %4993 = vtanh.f32 %v1809_v44  ;;  %v1768_v20 = vpop.permute.xlu1 %1767  ;;  %v1770_v48 = vpop.permute.xlu0 %1769  ;;  %v6332_v44 = vld [vmem:[%s5792_s8] sm:$0xff] }
 0x51c   : > { %v1810_v8 = vadd.f32 %v1768_v20, %v6142_v51  ;;  %v1811_v23 = vadd.f32 %v1770_v48, %v6127_v37  ;;  %7656 = vst [vmem:[#allocation37_spill] sm:$0xff] %v6332_v44  ;;  %v674_v20 = vsel %vm673_vm0, %v6332_v44, 0.0 }
 0x51e   : > { %4995 = vtanh.f32 %v1810_v8  ;;  %v5147_v8 = vld [vmem:[%s5792_s8 + $0x18] sm:$0xff] }
 0x51f   : > { %v6257_v39 = vpop.eup %4985  ;;  %4997 = vtanh.f32 %v1811_v23  ;;  %v1772_v61 = vpop.permute.xlu1 %1771 }
 0x520   : > { %v1812_v53 = vadd.f32 %v1772_v61, %v6137_v26  ;;  %v1774_v25 = vpop.permute.xlu0 %1773  ;;  %1853 = vrot.lane.b32.xlu0 %v6257_v39, %s5488_s20 }
 0x521   : > { %v1813_v38 = vadd.f32 %v1774_v25, %v6152_v49  ;;  %v675_v25 = vrot.slane %v674_v20, 4 }
 0x522   : > { %4999 = vtanh.f32 %v1812_v53 }
 0x523   : > { %v6263_v52 = vpop.eup %4987  ;;  %5001 = vtanh.f32 %v1813_v38  ;;  %v6340_v38 = vld [vmem:[%s5792_s8 + $0x8] sm:$0xff] }
 0x524   : > { %v6265_v51 = vpop.eup %4989  ;;  %v1776_v37 = vpop.permute.xlu1 %1775  ;;  %1855 = vrot.lane.b32.xlu1 %v6263_v52, %s5488_s20  ;;  %7657 = vst [vmem:[#allocation38_spill] sm:$0xff] %v6340_v38 }
 0x525   : > { %v1778_v47 = vpop.permute.xlu0 %1777  ;;  %v1814_v57 = vadd.f32 %v1776_v37, %v6160_v10  ;;  %1857 = vrot.lane.b32.xlu0 %v6265_v51, %s5488_s20  ;;  %v681_v37 = vsel %vm673_vm0, %v6340_v38, 0.0 }
 0x526   : > { %v1815_v26 = vadd.f32 %v1778_v47, %v6147_v24 }
 0x527   : > { %v6273_v45 = vpop.eup %4991  ;;  %5003 = vtanh.f32 %v1814_v57  ;;  %v688_v57 = vsel %vm673_vm0, %v5145_v17, 0.0 }
 0x528   : > { %v6275_v49 = vpop.eup %4993  ;;  %5005 = vtanh.f32 %v1815_v26  ;;  %v1780_v58 = vpop.permute.xlu1 %1779  ;;  %1859 = vrot.lane.b32.xlu1 %v6273_v45, %s5488_s20 }
 0x529   : > { %v1782_v46 = vpop.permute.xlu0 %1781  ;;  %v1816_v63 = vadd.f32 %v1780_v58, %v6157_v28  ;;  %1861 = vrot.lane.b32.xlu0 %v6275_v49, %s5488_s20 }
 0x52a   : > { %v1817_v10 = vadd.f32 %v1782_v46, %v6172_v15  ;;  %v682_v46 = vrot.slane %v681_v37, 4 }
 0x52b   : > { %v6283_v24 = vpop.eup %4995  ;;  %5007 = vtanh.f32 %v1816_v63  ;;  %v5149_v63 = vld [vmem:[%s5792_s8 + $0x30] sm:$0xff] }
 0x52c   : > { %v6285_v34 = vpop.eup %4997  ;;  %5009 = vtanh.f32 %v1817_v10  ;;  %v1784_v3 = vpop.permute.xlu1 %1783  ;;  %1863 = vrot.lane.b32.xlu1 %v6283_v24, %s5488_s20 }
 0x52d   : > { %v1786_v43 = vpop.permute.xlu0 %1785  ;;  %v1818_v18 = vadd.f32 %v1784_v3, %v6182_v22  ;;  %1865 = vrot.lane.b32.xlu0 %v6285_v34, %s5488_s20  ;;  %v676_v3 = vadd.f32 %v675_v25, %v674_v20 }
 0x52e   : > { %v1819_v28 = vadd.f32 %v1786_v43, %v6167_v5  ;;  %v689_v43 = vrot.slane %v688_v57, 4 }
 0x52f   : > { %v6293_v15 = vpop.eup %4999  ;;  %5011 = vtanh.f32 %v1818_v18  ;;  %v695_v18 = vsel %vm673_vm0, %v5147_v8, 0.0 }
 0x530   : > { %v6295_v59 = vpop.eup %5001  ;;  %5013 = vtanh.f32 %v1819_v28  ;;  %v1788_v7 = vpop.permute.xlu1 %1787  ;;  %1867 = vrot.lane.b32.xlu1 %v6293_v15, %s5488_s20  ;;  %v696_v20 = vrot.slane %v695_v18, 4 }
 0x531   : > { %7648 = vst [vmem:[#allocation29_spill] sm:$0xff] %v6295_v59  ;;  %v1820_v12 = vadd.f32 %v1788_v7, %v6175_v16  ;;  %1869 = vrot.lane.b32.xlu0 %v6295_v59, %s5488_s20  ;;  %v5150_v7 = vld [vmem:[%s5792_s8 + $0x20] sm:$0xff] }
 0x533   : > { %5015 = vtanh.f32 %v1820_v12  ;;  %v702_v12 = vsel %vm673_vm0, %v5150_v7, 0.0 }
 0x534   : > { %v6302_v5 = vpop.eup %5003 }
 0x535   : > { %7649 = vst [vmem:[#allocation30_spill] sm:$0xff] %v6302_v5  ;;  %v6304_v22 = vpop.eup %5005  ;;  %1871 = vrot.lane.b32.xlu1 %v6302_v5, %s5488_s20  ;;  %v5160_v5 = vld [vmem:[%s5792_s8 + $0x68] sm:$0xff] }
 0x536   : > { %7650 = vst [vmem:[#allocation31_spill] sm:$0xff] %v6304_v22  ;;  %1873 = vrot.lane.b32.xlu0 %v6304_v22, %s5488_s20  ;;  %v765_v59 = vsel %vm673_vm0, %v5160_v5, 0.0 }
 0x538   : > { %v6310_v35 = vpop.eup %5007 }
 0x539   : > { %7651 = vst [vmem:[#allocation32_spill] sm:$0xff] %v6310_v35  ;;  %v6312_v42 = vpop.eup %5009  ;;  %1875 = vrot.lane.b32.xlu1 %v6310_v35, %s5488_s20 }
 0x53a   : > { %7652 = vst [vmem:[#allocation33_spill] sm:$0xff] %v6312_v42  ;;  %1877 = vrot.lane.b32.xlu0 %v6312_v42, %s5488_s20 }
 0x53c   : > { %v6318_v16 = vpop.eup %5011 }
 0x53d   : > { %7653 = vst [vmem:[#allocation34_spill] sm:$0xff] %v6318_v16  ;;  %v6320_v11 = vpop.eup %5013  ;;  %1879 = vrot.lane.b32.xlu1 %v6318_v16, %s5488_s20 }
 0x53e   : > { %7654 = vst [vmem:[#allocation35_spill] sm:$0xff] %v6320_v11  ;;  %1881 = vrot.lane.b32.xlu0 %v6320_v11, %s5488_s20 }
 0x540   : > { %v6326_v56 = vpop.eup %5015 }
 0x541   : > { %7655 = vst [vmem:[#allocation36_spill] sm:$0xff] %v6326_v56  ;;  %1883 = vrot.lane.b32.xlu1 %v6326_v56, %s5488_s20 }
 0x592   : > { %v1854_v13 = vpop.permute.xlu0 %1853 }
 0x593   : > { %v1901_v53 = vsub.f32 %v6332_v44, %v1854_v13  ;;  %v5151_v13 = vld [vmem:[%s5792_s8 + $0x38] sm:$0xff]  ;;  %v5156_v44 = vld [vmem:[%s5792_s8 + $0x48] sm:$0xff] }
 0x594   : > { %v723_v31 = vsel %vm673_vm0, %v5151_v13, 0.0 }
 0x596   : > { %v1856_v36 = vpop.permute.xlu1 %1855 }
 0x597   : > { %v1858_v62 = vpop.permute.xlu0 %1857  ;;  %v1902_v26 = vsub.f32 %v6340_v38, %v1856_v36  ;;  %v737_v38 = vsel %vm673_vm0, %v5156_v44, 0.0 }
 0x598   : > { %v1903_v19 = vsub.f32 %v5145_v17, %v1858_v62  ;;  %v683_v17 = vadd.f32 %v682_v46, %v681_v37  ;;  %v697_v46 = vadd.f32 %v696_v20, %v695_v18 }
 0x59a   : > { %1937 = vrot.lane.b32.xlu0 %v1903_v19, %s5487_s13  ;;  %v1860_v48 = vpop.permute.xlu1 %1859  ;;  %v698_v18 = vrot.slane %v697_v46, 2 }
 0x59b   : > { %v1904_v23 = vsub.f32 %v5147_v8, %v1860_v48  ;;  %v1862_v61 = vpop.permute.xlu0 %1861  ;;  %v677_v48 = vrot.slane %v676_v3, 2  ;;  %v5152_v8 = vld [vmem:[%s5792_s8 + $0x28] sm:$0xff] }
 0x59c   : > { %v1905_v19 = vsub.f32 %v5150_v7, %v1862_v61  ;;  %v709_v25 = vsel %vm673_vm0, %v5152_v8, 0.0  ;;  %v5153_v7 = vld [vmem:[%s5792_s8 + $0x50] sm:$0xff] }
 0x59d   : > { %1939 = vrot.lane.b32.xlu1 %v1904_v23, %s5487_s13  ;;  %v690_v23 = vadd.f32 %v689_v43, %v688_v57  ;;  %v678_v61 = vadd.f32 %v677_v48, %v676_v3  ;;  %v5155_v48 = vld [vmem:[%s5792_s8 + $0x40] sm:$0xff] }
 0x59e   : > { %1933 = vrot.lane.b32.xlu0 %v1901_v53, %s5487_s13  ;;  %v1864_v47 = vpop.permute.xlu1 %1863  ;;  %v703_v53 = vrot.slane %v702_v12, 4  ;;  %v730_v20 = vsel %vm673_vm0, %v5155_v48, 0.0 }
 0x59f   : > { %v1866_v58 = vpop.permute.xlu0 %1865  ;;  %v691_v57 = vrot.slane %v690_v23, 2  ;;  %v679_v3 = vrot.slane %v678_v61, 1 }
 0x5a0   : > { %v1907_v10 = vsub.f32 %v5149_v63, %v1866_v58  ;;  %v704_v43 = vadd.f32 %v703_v53, %v702_v12 }
 0x5a1   : > { %1935 = vrot.lane.b32.xlu1 %v1902_v26, %s5487_s13  ;;  %v1906_v26 = vsub.f32 %v5152_v8, %v1864_v47  ;;  %v680_v11 = vadd.f32 %v679_v3, %v678_v61  ;;  %v6380_v3 = vld [vmem:[%s5792_s8 + $0x78] sm:$0xff] }
 0x5a2   : > { %1945 = vrot.lane.b32.xlu0 %v1907_v10, %s5487_s13  ;;  %v1868_v28 = vpop.permute.xlu1 %1867  ;;  %v684_v10 = vrot.slane %v683_v17, 2  ;;  %v705_v12 = vrot.slane %v704_v43, 2 }
 0x5a3   : > { %v1908_v62 = vsub.f32 %v5151_v13, %v1868_v28  ;;  %v1870_v36 = vpop.permute.xlu0 %1869  ;;  %v716_v28 = vsel %vm673_vm0, %v5149_v63, 0.0 }
 0x5a4   : > { %v685_v8 = vadd.f32 %v684_v10, %v683_v17  ;;  %v724_v17 = vrot.slane %v723_v31, 4 }
 0x5a5   : > { %1947 = vrot.lane.b32.xlu1 %v1908_v62, %s5487_s13  ;;  %v710_v62 = vrot.slane %v709_v25, 4 }
 0x5a6   : > { %1941 = vrot.lane.b32.xlu0 %v1905_v19, %s5487_s13  ;;  %v717_v19 = vrot.slane %v716_v28, 4  ;;  %v686_v10 = vrot.slane %v685_v8, 1 }
 0x5a7   : > { %v1872_v58 = vpop.permute.xlu1 %1871  ;;  %v711_v53 = vadd.f32 %v710_v62, %v709_v25  ;;  %v6373_v25 = vld [vmem:[%s5792_s8 + $0x70] sm:$0xff]  ;;  %v706_v62 = vadd.f32 %v705_v12, %v704_v43  ;;  %v6383_v43 = vmul.f32 0.125, %v680_v11 }
 0x5a8   : > { %v1874_v37 = vpop.permute.xlu0 %1873  ;;  %v1910_v56 = vsub.f32 %v5156_v44, %v1872_v58  ;;  %v687_v58 = vadd.f32 %v686_v10, %v685_v8 }
 0x5a9   : > { %v1911_v29 = vsub.f32 %v5153_v7, %v1874_v37  ;;  %1943 = vrot.lane.b32.xlu1 %v1906_v26, %s5487_s13  ;;  %v1909_v26 = vsub.f32 %v5155_v48, %v1870_v36  ;;  %v692_v37 = vadd.f32 %v691_v57, %v690_v23  ;;  %v699_v36 = vadd.f32 %v698_v18, %v697_v46 }
 0x5aa   : > { %v744_v23 = vsel %vm673_vm0, %v5153_v7, 0.0  ;;  %v725_v48 = vadd.f32 %v724_v17, %v723_v31  ;;  %v751_v7 = vsel %vm673_vm0, %v5154_v2, 0.0  ;;  %v6391_v22 = vmul.f32 0.125, %v687_v58 }
 0x5ab   : > { %1953 = vrot.lane.b32.xlu0 %v1911_v29, %s5487_s13  ;;  %v1876_v47 = vpop.permute.xlu1 %1875  ;;  %v718_v29 = vadd.f32 %v717_v19, %v716_v28  ;;  %v693_v57 = vrot.slane %v692_v37, 1  ;;  %v712_v19 = vrot.slane %v711_v53, 2  ;;  %v745_v46 = vrot.slane %v744_v23, 4 }
 0x5ac   : > { %v1912_v63 = vsub.f32 %v5154_v2, %v1876_v47  ;;  %v1878_v30 = vpop.permute.xlu0 %1877  ;;  %v731_v47 = vrot.slane %v730_v20, 4  ;;  %v700_v18 = vrot.slane %v699_v36, 1  ;;  %v752_v10 = vrot.slane %v751_v7, 4 }
 0x5ad   : > { %v694_v17 = vadd.f32 %v693_v57, %v692_v37  ;;  %v713_v42 = vadd.f32 %v712_v19, %v711_v53  ;;  %v746_v11 = vadd.f32 %v745_v46, %v744_v23 }
 0x5ae   : > { %1955 = vrot.lane.b32.xlu1 %v1912_v63, %s5487_s13  ;;  %v719_v63 = vrot.slane %v718_v29, 2  ;;  %v732_v61 = vadd.f32 %v731_v47, %v730_v20  ;;  %v726_v20 = vrot.slane %v725_v48, 2  ;;  %v701_v37 = vadd.f32 %v700_v18, %v699_v36 }
 0x5af   : > { %1949 = vrot.lane.b32.xlu0 %v1909_v26, %s5487_s13  ;;  %v1880_v13 = vpop.permute.xlu1 %1879  ;;  %v738_v26 = vrot.slane %v737_v38, 4  ;;  %v714_v57 = vrot.slane %v713_v42, 1  ;;  %v753_v19 = vadd.f32 %v752_v10, %v751_v7  ;;  %v747_v46 = vrot.slane %v746_v11, 2 }
 0x5b0   : > { %v1882_v16 = vpop.permute.xlu0 %1881  ;;  %v720_v8 = vadd.f32 %v719_v63, %v718_v29  ;;  %v733_v47 = vrot.slane %v732_v61, 2  ;;  %v1914_v35 = vsub.f32 %v5160_v5, %v1880_v13  ;;  %v766_v63 = vrot.slane %v765_v59, 4 }
 0x5b1   : > { %v1915_v28 = vsub.f32 %v6373_v25, %v1882_v16  ;;  %v739_v2 = vadd.f32 %v738_v26, %v737_v38  ;;  %v727_v38 = vadd.f32 %v726_v20, %v725_v48  ;;  %v6398_v13 = vmul.f32 0.125, %v701_v37 }
 0x5b2   : > { %1951 = vrot.lane.b32.xlu1 %v1910_v56, %s5487_s13  ;;  %v5159_v56 = vld [vmem:[%s5792_s8 + $0x60] sm:$0xff]  ;;  %v721_v23 = vrot.slane %v720_v8, 1  ;;  %v734_v26 = vadd.f32 %v733_v47, %v732_v61  ;;  %v715_v36 = vadd.f32 %v714_v57, %v713_v42  ;;  %v754_v48 = vrot.slane %v753_v19, 2 }
 0x5b3   : > { %1961 = vrot.lane.b32.xlu0 %v1915_v28, %s5487_s13  ;;  %v1884_v44 = vpop.permute.xlu1 %1883  ;;  %v758_v31 = vsel %vm673_vm0, %v5159_v56, 0.0  ;;  %v1913_v12 = vsub.f32 %v5159_v56, %v1878_v30  ;;  %v707_v28 = vrot.slane %v706_v62, 1  ;;  %v6393_v30 = vmul.f32 0.125, %v694_v17 }
 0x5b4   : > { %v1916_v16 = vsub.f32 %v6380_v3, %v1884_v44  ;;  %v759_v44 = vrot.slane %v758_v31, 4  ;;  %v740_v29 = vrot.slane %v739_v2, 2  ;;  %v767_v7 = vadd.f32 %v766_v63, %v765_v59 }
 0x5b5   : > { %v708_v53 = vadd.f32 %v707_v28, %v706_v62  ;;  %v735_v18 = vrot.slane %v734_v26, 1  ;;  %v748_v61 = vadd.f32 %v747_v46, %v746_v11  ;;  %v755_v17 = vadd.f32 %v754_v48, %v753_v19 }
 0x5b6   : > { %1963 = vrot.lane.b32.xlu1 %v1916_v16, %s5487_s13  ;;  %v760_v5 = vadd.f32 %v759_v44, %v758_v31  ;;  %v741_v62 = vadd.f32 %v740_v29, %v739_v2  ;;  %v722_v16 = vadd.f32 %v721_v23, %v720_v8  ;;  %v6406_v31 = vmul.f32 0.125, %v715_v36 }
 0x5b7   : > { %1957 = vrot.lane.b32.xlu0 %v1913_v12, %s5487_s13  ;;  %v6400_v58 = vmul.f32 0.125, %v708_v53  ;;  %v768_v28 = vrot.slane %v767_v7, 2  ;;  %v736_v20 = vadd.f32 %v735_v18, %v734_v26  ;;  %v749_v2 = vrot.slane %v748_v61, 1 }
 0x5b8   : > { %v761_v56 = vrot.slane %v760_v5, 2  ;;  %v742_v12 = vrot.slane %v741_v62, 1  ;;  %v6412_v59 = vmul.f32 0.125, %v722_v16  ;;  %v756_v11 = vrot.slane %v755_v17, 1 }
 0x5b9   : > { %v769_v44 = vadd.f32 %v768_v28, %v767_v7  ;;  %v795_v37 = vmul.f32 0.125, %v736_v20  ;;  %v750_v53 = vadd.f32 %v749_v2, %v748_v61  ;;  %v779_v16 = vsel %vm673_vm0, %v6380_v3, 0.0 }
 0x5ba   : > { %1959 = vrot.lane.b32.xlu1 %v1914_v35, %s5487_s13  ;;  %v728_v35 = vrot.slane %v727_v38, 1  ;;  %v762_v8 = vadd.f32 %v761_v56, %v760_v5  ;;  %v743_v47 = vadd.f32 %v742_v12, %v741_v62  ;;  %v757_v29 = vadd.f32 %v756_v11, %v755_v17 }
 0x5bb   : > { %2093 = vrot.lane.b32.xlu0 %v6383_v43, %s5488_s20  ;;  %v770_v19 = vrot.slane %v769_v44, 1  ;;  %v797_v63 = vmul.f32 0.125, %v750_v53 }
 0x5bc   : > { %v729_v42 = vadd.f32 %v728_v35, %v727_v38  ;;  %v763_v57 = vrot.slane %v762_v8, 1  ;;  %v796_v38 = vmul.f32 0.125, %v743_v47  ;;  %v6424_v26 = vmul.f32 0.125, %v757_v29 }
 0x5bd   : > { %v771_v46 = vadd.f32 %v770_v19, %v769_v44  ;;  %v772_v35 = vsel %vm673_vm0, %v6373_v25, 0.0  ;;  %v2181_v47 = vpack.c.bf16 %v795_v37, %v795_v37 }
 0x5be   : > { %2095 = vrot.lane.b32.xlu1 %v6391_v22, %s5488_s20  ;;  %v6416_v10 = vmul.f32 0.125, %v729_v42  ;;  %v764_v23 = vadd.f32 %v763_v57, %v762_v8  ;;  %v773_v7 = vrot.slane %v772_v35, 4  ;;  %v780_v42 = vrot.slane %v779_v16, 4 }
 0x5bf   : > { %2097 = vrot.lane.b32.xlu0 %v6393_v30, %s5488_s20  ;;  %v6431_v36 = vmul.f32 0.125, %v771_v46  ;;  %v2182_v11 = vpack.c.bf16 %v796_v38, %v796_v38 }
 0x5c0   : > { %v6427_v5 = vmul.f32 0.125, %v764_v23  ;;  %v774_v17 = vadd.f32 %v773_v7, %v772_v35  ;;  %v781_v20 = vadd.f32 %v780_v42, %v779_v16 }
 0x5c2   : > { %2099 = vrot.lane.b32.xlu1 %v6398_v13, %s5488_s20  ;;  %v775_v2 = vrot.slane %v774_v17, 2  ;;  %v782_v53 = vrot.slane %v781_v20, 2 }
 0x5c3   : > { %2101 = vrot.lane.b32.xlu0 %v6400_v58, %s5488_s20 }
 0x5c4   : > { %v776_v57 = vadd.f32 %v775_v2, %v774_v17  ;;  %v783_v46 = vadd.f32 %v782_v53, %v781_v20 }
 0x5c6   : > { %2103 = vrot.lane.b32.xlu1 %v6406_v31, %s5488_s20 }
 0x5c7   : > { %2105 = vrot.lane.b32.xlu0 %v6412_v59, %s5488_s20 }
 0x5ca   : > { %2107 = vrot.lane.b32.xlu1 %v6416_v10, %s5488_s20 }
 0x5cb   : > { %2109 = vrot.lane.b32.xlu0 %v795_v37, %s5488_s20  ;;  %v2219_v37 = vunpack.c.l.b16 %v2181_v47 }
 0x5ce   : > { %2111 = vrot.lane.b32.xlu1 %v796_v38, %s5488_s20  ;;  %v2220_v38 = vunpack.c.l.b16 %v2182_v11 }
 0x5cf   : > { %2113 = vrot.lane.b32.xlu0 %v797_v63, %s5488_s20 }
 0x5d2   : > { %2115 = vrot.lane.b32.xlu1 %v6424_v26, %s5488_s20 }
 0x5d3   : > { %2117 = vrot.lane.b32.xlu0 %v6427_v5, %s5488_s20 }
 0x5d6   : > { %2119 = vrot.lane.b32.xlu1 %v6431_v36, %s5488_s20 }
 0x60c   : > { %v1938_v62 = vpop.permute.xlu0 %1937 }
 0x60d   : > { %v1983_v48 = vmul.f32 %v6186_v40, %v1938_v62  ;;  %v2176_v62 = vpack.c.bf16 %v6398_v13, %v6398_v13  ;;  %v2177_v13 = vpack.c.bf16 %v6400_v58, %v6400_v58  ;;  %v2178_v58 = vpack.c.bf16 %v6406_v31, %v6406_v31 }
 0x60f   : > { %2017 = vrot.lane.b32.xlu0 %v1983_v48, %s5487_s13  ;;  %v1940_v18 = vpop.permute.xlu1 %1939  ;;  %v2184_v48 = vpack.c.bf16 %v6424_v26, %v6424_v26  ;;  %v2185_v26 = vpack.c.bf16 %v6427_v5, %v6427_v5  ;;  %v2186_v5 = vpack.c.bf16 %v6431_v36, %v6431_v36  ;;  %v2179_v36 = vpack.c.bf16 %v6412_v59, %v6412_v59 }
 0x610   : > { %v1984_v61 = vmul.f32 %v6191_v33, %v1940_v18  ;;  %v1934_v56 = vpop.permute.xlu0 %1933  ;;  %v2173_v33 = vpack.c.bf16 %v6383_v43, %v6383_v43  ;;  %v2175_v43 = vpack.c.bf16 %v6393_v30, %v6393_v30  ;;  %v2180_v59 = vpack.c.bf16 %v6416_v10, %v6416_v10 }
 0x611   : > { %v1981_v12 = vmul.f32 %v6188_v60, %v1934_v56  ;;  %v2174_v60 = vpack.c.bf16 %v6391_v22, %v6391_v22  ;;  %v2183_v22 = vpack.c.bf16 %v797_v63, %v797_v63  ;;  %v2222_v17 = vunpack.c.l.b16 %v2184_v48  ;;  %v4915_v48 = vld [vmem:[#allocation11] sm:$0xff]  }
 0x612   : > { %2019 = vrot.lane.b32.xlu1 %v1984_v61, %s5487_s13  ;;  %v2211_v29 = vunpack.c.l.b16 %v2173_v33  ;;  %v2213_v63 = vunpack.c.l.b16 %v2175_v43  ;;  %v784_v61 = vrot.slane %v783_v46, 1  ;;  %v2223_v2 = vunpack.c.l.b16 %v2185_v26 }
 0x613   : > { %2013 = vrot.lane.b32.xlu0 %v1981_v12, %s5487_s13  ;;  %v1936_v25 = vpop.permute.xlu1 %1935  ;;  %v2212_v19 = vunpack.c.l.b16 %v2174_v60  ;;  %v2221_v7 = vunpack.c.l.b16 %v2183_v22  ;;  %v2214_v12 = vunpack.c.l.b16 %v2176_v62  ;;  %v2217_v22 = vunpack.c.l.b16 %v2179_v36  ;;  %v4914_v62 = vld [vmem:[%s7540_s7 + $0x8] sm:$0xff]  }
 0x614   : > { %v1982_v40 = vmul.f32 %v6194_v1, %v1936_v25  ;;  %v1946_v28 = vpop.permute.xlu0 %1945  ;;  %v785_v20 = vadd.f32 %v784_v61, %v783_v46  ;;  %v2218_v46 = vunpack.c.l.b16 %v2180_v59 }
 0x615   : > { %v1987_v3 = vmul.f32 %v6204_v14, %v1946_v28  ;;  %v2228_v16 = vsel %vm2227_vm2, %v2212_v19, %v2211_v29 }
 0x616   : > { %2015 = vrot.lane.b32.xlu1 %v1982_v40, %s5487_s13  ;;  %v2230_v40 = vsel %vm2229_vm3, %v2213_v63, %v2228_v16  ;;  %v802_v53 = vmul.f32 0.125, %v785_v20 }
 0x617   : > { %2025 = vrot.lane.b32.xlu0 %v1987_v3, %s5487_s13  ;;  %v1948_v8 = vpop.permute.xlu1 %1947  ;;  %v2215_v3 = vunpack.c.l.b16 %v2177_v13 }
 0x618   : > { %v1988_v1 = vmul.f32 %v6212_v55, %v1948_v8  ;;  %v1942_v44 = vpop.permute.xlu0 %1941  ;;  %v2232_v8 = vsel %vm2231_vm4, %v2214_v12, %v2230_v40  ;;  %v2188_v43 = vpack.c.bf16 %v802_v53, %v802_v53 }
 0x619   : > { %v1985_v14 = vmul.f32 %v6200_v9, %v1942_v44  ;;  %v777_v9 = vrot.slane %v776_v57, 1  ;;  %v2224_v44 = vunpack.c.l.b16 %v2186_v5 }
 0x61a   : > { %2027 = vrot.lane.b32.xlu1 %v1988_v1, %s5487_s13  ;;  %v2216_v1 = vunpack.c.l.b16 %v2178_v58 }
 0x61b   : > { %2021 = vrot.lane.b32.xlu0 %v1985_v14, %s5487_s13  ;;  %v1944_v23 = vpop.permute.xlu1 %1943  ;;  %v778_v42 = vadd.f32 %v777_v9, %v776_v57  ;;  %v2234_v14 = vsel %vm2233_vm5, %v2215_v3, %v2232_v8  ;;  %v4913_v9 = vld [vmem:[#allocation11 + $0x8] sm:$0xff]  }
 0x61c   : > { %v1986_v55 = vmul.f32 %v6208_v6, %v1944_v23  ;;  %v2241_v6 = vsel %vm2227_vm2, %v2220_v38, %v2219_v37  ;;  %v2236_v37 = vsel %vm2235_vm6, %v2216_v1, %v2234_v14  ;;  %4633 = vmatprep.subr.bf16.mxu0 %v4913_v9 }
 0x61d   : > { %v1954_v35 = vpop.permute.xlu0 %1953  ;;  %v2242_v28 = vsel %vm2229_vm3, %v2221_v7, %v2241_v6  ;;  %v801_v60 = vmul.f32 0.125, %v778_v42  ;;  %v2238_v10 = vsel %vm2237_vm7, %v2217_v22, %v2236_v37  ;;  %v4916_v7 = vld [vmem:[%s7540_s7] sm:$0xff]   ;;  %4634 = vmatpush3.bf16.msra.mxu0 %v4913_v9 }
 0x61e   : > { %v1991_v30 = vmul.f32 %v6220_v41, %v1954_v35  ;;  %2023 = vrot.lane.b32.xlu1 %v1986_v55, %s5487_s13  ;;  %v2243_v47 = vsel %vm2231_vm4, %v2222_v17, %v2242_v28  ;;  %v2226_v35 = vunpack.c.l.b16 %v2188_v43  ;;  %4635 = vmatprep.subr.bf16.mxu0 %v4915_v48 }
 0x61f   : > { %v2187_v11 = vpack.c.bf16 %v801_v60, %v801_v60  ;;  %v2244_v57 = vsel %vm2233_vm5, %v2223_v2, %v2243_v47 }
 0x620   : > { %2033 = vrot.lane.b32.xlu0 %v1991_v30, %s5487_s13  ;;  %v1956_v18 = vpop.permute.xlu1 %1955  ;;  %v2245_v38 = vsel %vm2235_vm6, %v2224_v44, %v2244_v57  ;;  %v5489_v30 = vmov 0.0  }
 0x621   : > { %v1992_v41 = vmul.f32 %v6228_v27, %v1956_v18  ;;  %v1950_v56 = vpop.permute.xlu0 %1949  ;;  %v2225_v23 = vunpack.c.l.b16 %v2187_v11  ;;  %4625 = vmatprep.subr.bf16.mxu1 %v5489_v30  ;;  %4629 = vmatprep.mubr.msk.bf16.mxu1 %vm5490_vm9, %v5489_v30 }
 0x622   : > { %v1989_v25 = vmul.f32 %v6216_v32, %v1950_v56  ;;  %4626 = vmatpush3.bf16.msra.mxu1 %v4914_v62  ;;  %4636 = vmatpush3.bf16.msra.mxu0 %v4915_v48  ;;  %v7666_v62 = vld [vmem:[#allocation29_spill] sm:$0xff] }
 0x623   : > { %2035 = vrot.lane.b32.xlu1 %v1992_v41, %s5487_s13  ;;  %4627 = vmatprep.subr.bf16.mxu1 %v5489_v30 }
 0x624   : > { %2029 = vrot.lane.b32.xlu0 %v1989_v25, %s5487_s13  ;;  %v1952_v27 = vpop.permute.xlu1 %1951 }
 0x625   : > { %v1990_v32 = vmul.f32 %v6224_v50, %v1952_v27  ;;  %v1962_v33 = vpop.permute.xlu0 %1961 }
 0x626   : > { %v1995_v31 = vmul.f32 %v6236_v0, %v1962_v33  ;;  %4628 = vmatpush3.bf16.msra.mxu1 %v4916_v7 }
 0x627   : > { %2031 = vrot.lane.b32.xlu1 %v1990_v32, %s5487_s13 }
 0x628   : > { %2041 = vrot.lane.b32.xlu0 %v1995_v31, %s5487_s13  ;;  %v1964_v50 = vpop.permute.xlu1 %1963 }
 0x629   : > { %v1996_v29 = vmul.f32 %v6244_v4, %v1964_v50  ;;  %v1958_v0 = vpop.permute.xlu0 %1957 }
 0x62a   : > { %v1993_v19 = vmul.f32 %v6232_v21, %v1958_v0  ;;  %v2246_v21 = vsel %vm2237_vm7, %v2225_v23, %v2245_v38  ;;  %v7662_v38 = vld [vmem:[#allocation31_spill] sm:$0xff] }
 0x62b   : > { %2043 = vrot.lane.b32.xlu1 %v1996_v29, %s5487_s13  ;;  %v2247_v63 = vsel %vm2239_vm8, %v2226_v35, %v2246_v21  ;;  %v7665_v21 = vld [vmem:[#allocation32_spill] sm:$0xff] }
 0x62c   : > { %2037 = vrot.lane.b32.xlu0 %v1993_v19, %s5487_s13  ;;  %v1960_v55 = vpop.permute.xlu1 %1959 }
 0x62d   : > { %v1994_v4 = vmul.f32 %v6240_v54, %v1960_v55  ;;  %v2240_v54 = vsel %vm2239_vm8, %v2218_v46, %v2238_v10  ;;  %v2094_v6 = vpop.permute.xlu0 %2093 }
 0x62e   : > { %v2248_v16 = vpack.c.b16 %v2247_v63, %v2240_v54 }
 0x62f   : > { %2039 = vrot.lane.b32.xlu1 %v1994_v4, %s5487_s13 }
 0x630   : > { %2121 = vrot.lane.b32.xlu0 %v801_v60, %s5488_s20  ;;  %4630 = vmatmul.mubr.msk.bf16.vlgmr.msra.gmra.mxu1 %vm673_vm0, %v2248_v16  ;;  %v2096_v18 = vpop.permute.xlu1 %2095 }
 0x631   : > { %v2098_v61 = vpop.permute.xlu0 %2097 }
 0x633   : > { %2123 = vrot.lane.b32.xlu1 %v802_v53, %s5488_s20 }
 0x634   : > { %v2100_v13 = vpop.permute.xlu1 %2099 }
 0x635   : > { %v2102_v26 = vpop.permute.xlu0 %2101 }
 0x638   : > { %v2104_v41 = vpop.permute.xlu1 %2103 }
 0x639   : > { %v2106_v56 = vpop.permute.xlu0 %2105 }
 0x63c   : > { %v2108_v42 = vpop.permute.xlu1 %2107 }
 0x63d   : > { %v2110_v12 = vpop.permute.xlu0 %2109 }
 0x640   : > { %v2112_v17 = vpop.permute.xlu1 %2111 }
 0x641   : > { %v2114_v25 = vpop.permute.xlu0 %2113 }
 0x644   : > { %v2116_v40 = vpop.permute.xlu1 %2115 }
 0x645   : > { %v6518_v28 = vpop.permute.xlu0 %2117 }
 0x648   : > { %v6520_v58 = vpop.permute.xlu1 %2119 }
 0x681   : > { %v2018_v5 = vpop.permute.xlu0 %2017 }
 0x682   : > { %v2063_v27 = vadd.f32 %v6265_v51, %v2018_v5  ;;  %v7672_v5 = vld [vmem:[#allocation33_spill] sm:$0xff] }
 0x684   : > { %v2020_v20 = vpop.permute.xlu1 %2019  ;;  %v2143_v3 = vadd.f32 %v2098_v61, %v2063_v27 }
 0x685   : > { %v2064_v2 = vadd.f32 %v6273_v45, %v2020_v20  ;;  %v2014_v32 = vpop.permute.xlu0 %2013 }
 0x686   : > { %v2061_v33 = vadd.f32 %v6257_v39, %v2014_v32  ;;  %v6525_v47 = vsub.f32 %v2143_v3, %v2063_v27  ;;  %v7673_v3 = vld [vmem:[#allocation35_spill] sm:$0xff]  ;;  %v7674_v32 = vld [vmem:[#allocation34_spill] sm:$0xff] }
 0x687   : > { %v2144_v60 = vadd.f32 %v2100_v13, %v2064_v2 }
 0x688   : > { %v2016_v8 = vpop.permute.xlu1 %2015  ;;  %v2141_v36 = vadd.f32 %v2094_v6, %v2061_v33 }
 0x689   : > { %v6527_v31 = vsub.f32 %v2144_v60, %v2064_v2  ;;  %v2062_v11 = vadd.f32 %v6263_v52, %v2016_v8  ;;  %v2026_v1 = vpop.permute.xlu0 %2025  ;;  %v7675_v8 = vld [vmem:[#allocation36_spill] sm:$0xff] }
 0x68a   : > { %v2067_v44 = vadd.f32 %v6285_v34, %v2026_v1  ;;  %v6533_v53 = vsub.f32 %v2141_v36, %v2061_v33 }
 0x68b   : > { %7658 = vst [vmem:[#allocation39_spill] sm:$0xff] %v6527_v31  ;;  %v2142_v51 = vadd.f32 %v2096_v18, %v2062_v11  ;;  %v2306_v50 = vpack.c.bf16 %v6527_v31, %v6525_v47  ;;  %v7669_v18 = vld [vmem:[#allocation30_spill] sm:$0xff] }
 0x68c   : > { %v2028_v45 = vpop.permute.xlu1 %2027  ;;  %v2147_v14 = vadd.f32 %v2106_v56, %v2067_v44 }
 0x68d   : > { %v6535_v39 = vsub.f32 %v2142_v51, %v2062_v11  ;;  %v2068_v57 = vadd.f32 %v6293_v15, %v2028_v45  ;;  %v2022_v29 = vpop.permute.xlu0 %2021  ;;  %2329 = vrot.lane.b32.xlu1 %v2306_v50, %s5488_s20 }
 0x68e   : > { %v2065_v52 = vadd.f32 %v6275_v49, %v2022_v29  ;;  %v6542_v19 = vsub.f32 %v2147_v14, %v2067_v44 }
 0x68f   : > { %7659 = vst [vmem:[#allocation40_spill] sm:$0xff] %v6535_v39  ;;  %v2148_v0 = vadd.f32 %v2108_v42, %v2068_v57  ;;  %v2305_v34 = vpack.c.bf16 %v6535_v39, %v6533_v53 }
 0x690   : > { %v2024_v59 = vpop.permute.xlu1 %2023  ;;  %7660 = vst [vmem:[#allocation41_spill] sm:$0xff] %v6542_v19  ;;  %v2145_v22 = vadd.f32 %v2102_v26, %v2065_v52 }
 0x691   : > { %v6544_v43 = vsub.f32 %v2148_v0, %v2068_v57  ;;  %v2066_v23 = vadd.f32 %v6283_v24, %v2024_v59  ;;  %2327 = vrot.lane.b32.xlu0 %v2305_v34, %s5488_s20 }
 0x692   : > { %v2034_v15 = vpop.permute.xlu0 %2033  ;;  %v6551_v4 = vsub.f32 %v2145_v22, %v2065_v52 }
 0x693   : > { %7661 = vst [vmem:[#allocation42_spill] sm:$0xff] %v6544_v43  ;;  %v2146_v37 = vadd.f32 %v2104_v41, %v2066_v23  ;;  %v2071_v55 = vadd.f32 %v7662_v38, %v2034_v15  ;;  %v2308_v49 = vpack.c.bf16 %v6544_v43, %v6542_v19 }
 0x694   : > { %7663 = vst [vmem:[#allocation31_spill] sm:$0xff] %v6551_v4 }
 0x695   : > { %v6553_v46 = vsub.f32 %v2146_v37, %v2066_v23  ;;  %v2036_v35 = vpop.permute.xlu1 %2035  ;;  %2333 = vrot.lane.b32.xlu1 %v2308_v49, %s5488_s20  ;;  %v2151_v10 = vadd.f32 %v2114_v25, %v2071_v55 }
 0x696   : > { %v2072_v9 = vadd.f32 %v7665_v21, %v2036_v35  ;;  %v2030_v24 = vpop.permute.xlu0 %2029 }
 0x697   : > { %7664 = vst [vmem:[#allocation43_spill] sm:$0xff] %v6553_v46  ;;  %v2069_v48 = vadd.f32 %v7666_v62, %v2030_v24  ;;  %v2307_v30 = vpack.c.bf16 %v6553_v46, %v6551_v4  ;;  %v6561_v7 = vsub.f32 %v2151_v10, %v2071_v55  ;;  %v7680_v24 = vld [vmem:[#allocation38_spill] sm:$0xff] }
 0x698   : > { %v2152_v54 = vadd.f32 %v2116_v40, %v2072_v9 }
 0x699   : > { %v2032_v63 = vpop.permute.xlu1 %2031  ;;  %2331 = vrot.lane.b32.xlu0 %v2307_v30, %s5488_s20  ;;  %7667 = vst [vmem:[#allocation32_spill] sm:$0xff] %v6561_v7  ;;  %v2149_v6 = vadd.f32 %v2110_v12, %v2069_v48 }
 0x69a   : > { %v6563_v16 = vsub.f32 %v2152_v54, %v2072_v9  ;;  %v2070_v61 = vadd.f32 %v7669_v18, %v2032_v63  ;;  %v2042_v13 = vpop.permute.xlu0 %2041  ;;  %v5492_v63 = vmov 1966171168  }
 0x69b   : > { %v6568_v42 = vsub.f32 %v2149_v6, %v2069_v48  ;;  %v2075_v2 = vadd.f32 %v7673_v3, %v2042_v13  ;;  %v7681_v48 = vld [vmem:[#allocation37_spill] sm:$0xff]  ;;  %v2480_v6 = vunpack.c.l.s4 %v5492_v63 }
 0x69c   : > { %7668 = vst [vmem:[#allocation29_spill] sm:$0xff] %v6563_v16  ;;  %v2150_v26 = vadd.f32 %v2112_v17, %v2070_v61  ;;  %v2310_v41 = vpack.c.bf16 %v6563_v16, %v6561_v7 }
 0x69d   : > { %v2044_v56 = vpop.permute.xlu1 %2043  ;;  %7670 = vst [vmem:[#allocation30_spill] sm:$0xff] %v6568_v42  ;;  %v2481_v18 = vunpack.c.0.s8 %v2480_v6 }
 0x69e   : > { %v6570_v25 = vsub.f32 %v2150_v26, %v2070_v61  ;;  %v2038_v40 = vpop.permute.xlu0 %2037  ;;  %2337 = vrot.lane.b32.xlu1 %v2310_v41, %s5488_s20  ;;  %v2076_v36 = vadd.f32 %v7675_v8, %v2044_v56  ;;  %v4412_v61 = vld [vmem:[#allocation10] ss:$0 sm:$0xff]  ;;  %v7682_v26 = vld [vmem:[#allocation26_spill] sm:$0xff] }
 0x69f   : > { %v2073_v27 = vadd.f32 %v7672_v5, %v2038_v40  ;;  %v6613_v41 = vsub.s32 %v2481_v18, %v7682_v26 }
 0x6a0   : > { %7671 = vst [vmem:[#allocation44_spill] sm:$0xff] %v6570_v25  ;;  %v2309_v12 = vpack.c.bf16 %v6570_v25, %v6568_v42 }
 0x6a1   : > { %v2040_v20 = vpop.permute.xlu1 %2039  ;;  %v2153_v17 = vadd.f32 %v6518_v28, %v2073_v27 }
 0x6a2   : > { %v2074_v33 = vadd.f32 %v7674_v32, %v2040_v20  ;;  %v2122_v60 = vpop.permute.xlu0 %2121  ;;  %2335 = vrot.lane.b32.xlu0 %v2309_v12, %s5488_s20 }
 0x6a3   : > { %v2155_v1 = vadd.f32 %v2122_v60, %v2075_v2  ;;  %v6582_v51 = vsub.f32 %v2153_v17, %v2073_v27  ;;  %v7683_v17 = vld [vmem:[#allocation28_spill] sm:$0xff] }
 0x6a4   : > { %v2154_v11 = vadd.f32 %v6520_v58, %v2074_v33  ;;  %v4837_v58 = vpack.i.bf16 %v6535_v39, %v6533_v53 }
 0x6a5   : > { %v2124_v44 = vpop.permute.xlu1 %2123  ;;  %7676 = vst [vmem:[#allocation33_spill] sm:$0xff] %v6582_v51  ;;  %v6586_v14 = vsub.f32 %v2155_v1, %v2075_v2  ;;  %v6619_v2 = vld [vmem:[#allocation13] ss:$0 sm:$0xff] }
 0x6a6   : > { %v6584_v50 = vsub.f32 %v2154_v11, %v2074_v33  ;;  %v2156_v45 = vadd.f32 %v2124_v44, %v2076_v36 }
 0x6a7   : > { %7678 = vst [vmem:[#allocation34_spill] sm:$0xff] %v6586_v14 }
 0x6a8   : > { %7677 = vst [vmem:[#allocation35_spill] sm:$0xff] %v6584_v50  ;;  %v6588_v57 = vsub.f32 %v2156_v45, %v2076_v36  ;;  %v2311_v28 = vpack.c.bf16 %v6584_v50, %v6582_v51 }
 0x6aa   : > { %7679 = vst [vmem:[#allocation36_spill] sm:$0xff] %v6588_v57  ;;  %2339 = vrot.lane.b32.xlu0 %v2311_v28, %s5488_s20  ;;  %v2312_v29 = vpack.c.bf16 %v6588_v57, %v6586_v14 }
 0x6ac   : > { %2341 = vrot.lane.b32.xlu1 %v2312_v29, %s5488_s20 }
 0x6b0   : > { %4838 = vrot.lane.b32.xlu1 %v4837_v58, %s5491_s14 }
 0x6f0   : > { %v2298_v52 = vpop.f32.mrf.mxu1 }
 0x6f1   : > { %v2299_v13 = vadd.f32 %v4412_v61, %v2298_v52 }
 0x6f2   : > { %v4631_v0 = vpop.f32.mrf.mxu1 }
 0x6f3   : > { %v2485_v56 = vrot.slane %v2299_v13, %v6613_v41  ;;  %v2478_v27 = vcombine.high %v2299_v13, %v2299_v13 }
 0x6f4   : > { %v2301_v34 = vpop.f32.mrf.mxu1 }
 0x6f5   : > { %v2493_v40 = vcombine.high %v2485_v56, %v2485_v56  ;;  %v2501_v5 = vrot.slane %v2485_v56, %v6613_v41  ;;  %v2492_v3 = vrot.slane %v2478_v27, %v6613_v41  ;;  %v2302_v1 = vadd.f32 %v4412_v61, %v2301_v34 }
 0x6f6   : > { %v4632_v59 = vpop.f32.mrf.mxu1 }
 0x6f7   : > { %v2515_v12 = vrot.slane %v2493_v40, %v6613_v41  ;;  %v2523_v20 = vcombine.high %v2501_v5, %v2501_v5  ;;  %v2508_v60 = vrot.slane %v2492_v3, %v6613_v41  ;;  %v2579_v11 = vrot.slane %v2501_v5, %v7683_v17 }
 0x6f8   : > { %v2494_v58 = vcombine.high %v2492_v3, %v2492_v3  ;;  %v2527_v5 = vcombine.high %v2302_v1, %v2302_v1 }
 0x6f9   : > { %v2587_v32 = vrot.slane %v2523_v20, %v7683_v17  ;;  %v2525_v33 = vcombine.high %v2515_v12, %v2515_v12  ;;  %v2524_v0 = vcombine.high %v2508_v60, %v2508_v60  ;;  %v2595_v27 = vrot.slane %v2508_v60, %v7683_v17 }
 0x6fa   : > { %v2541_v60 = vrot.slane %v2527_v5, %v6613_v41 }
 0x6fb   : > { %v2591_v29 = vrot.slane %v2525_v33, %v7683_v17 }
 0x6ff   : > { %v2330_v23 = vpop.permute.xlu1 %2329 }
 0x703   : > { %v2328_v22 = vpop.permute.xlu0 %2327 }
 0x704   : > { %4637 = vmatprep.mubr.msk.bf16.mxu0 %vm673_vm0, %v2328_v22 }
 0x705   : > { %4638 = vmatmul.mubr.msk.bf16.vlgmr.msra.gmra.mxu0 %vm673_vm0, %v2330_v23  ;;  %v2583_v23 = vrot.slane %v2515_v12, %v7683_v17 }
 0x707   : > { %v2334_v37 = vpop.permute.xlu1 %2333 }
 0x70b   : > { %v2332_v15 = vpop.permute.xlu0 %2331 }
 0x70c   : > { %4641 = vmatprep.mubr.msk.bf16.mxu0 %vm673_vm0, %v2332_v15  ;;  %v2534_v15 = vrot.slane %v2302_v1, %v6613_v41 }
 0x70d   : > { %4642 = vmatmul.mubr.msk.bf16.gmra.mxu0 %vm673_vm0, %v2334_v37 }
 0x710   : > { %v2338_v55 = vpop.permute.xlu1 %2337 }
 0x714   : > { %v2336_v38 = vpop.permute.xlu0 %2335 }
 0x715   : > { %4645 = vmatprep.mubr.msk.bf16.mxu0 %vm673_vm0, %v2336_v38 }
 0x716   : > { %4646 = vmatmul.mubr.msk.bf16.gmra.mxu0 %vm673_vm0, %v2338_v55 }
 0x71c   : > { %v2340_v49 = vpop.permute.xlu0 %2339 }
 0x71d   : > { %4649 = vmatprep.mubr.msk.bf16.mxu0 %vm673_vm0, %v2340_v49 }
 0x71e   : > { %v2342_v35 = vpop.permute.xlu1 %2341 }
 0x71f   : > { %4650 = vmatmul.mubr.msk.bf16.gmra.mxu0 %vm673_vm0, %v2342_v35 }
 0x722   : > { %v4839_v10 = vpop.permute.xlu1 %4838 }
 0x723   : > { %v4841_v21 = vunpack.i.h.bf16 %v4839_v10  ;;  %v4840_v9 = vunpack.i.l.bf16 %v4839_v10  ;;  %v2603_v10 = vrot.slane %v2524_v0, %v7683_v17 }
 0x725   : > { %v3493_v62 = vsel %vm673_vm0, %v7680_v24, %v4841_v21  ;;  %v3492_v30 = vsel %vm673_vm0, %v7681_v48, %v4840_v9  ;;  %v2550_v48 = vrot.slane %v2534_v15, %v6613_v41 }
 0x726   : > { %v3508_v54 = vpack.c.bf16 %v3493_v62, %v3492_v30  ;;  %v2522_v62 = vrot.slane %v2494_v58, %v6613_v41 }
 0x727   : > { %v2572_v40 = vcombine.high %v2550_v48, %v2550_v48  ;;  %v2611_v58 = vrot.slane %v2550_v48, %v7683_v17 }
 0x728   : > { %4661 = vmatprep.mubr.msk.bf16.mxu1 %vm1427_vm1, %v3508_v54  ;;  %v2542_v54 = vcombine.high %v2534_v15, %v2534_v15  ;;  %v2526_v61 = vcombine.high %v2522_v62, %v2522_v62 }
 0x72a   : > { %v2564_v12 = vrot.slane %v2542_v54, %v6613_v41 }
 0x7c5   : > { %v4639_v8 = vpop.f32.mrf.mxu0 }
 0x7c6   : > { %v6624_v36 = vadd.f32 %v4639_v8, %v6619_v2 }
 0x7c7   : > { %v2413_v44 = vpop.f32.mrf.mxu0 }
 0x7c8   : > { %7684 = vst [vmem:[#allocation38_spill] sm:$0xff] %v6624_v36  ;;  %v2658_v45 = vmul.f32 %v2587_v32, %v6624_v36  ;;  %v6629_v28 = vadd.f32 %v6619_v2, %v2413_v44  ;;  %v2607_v32 = vrot.slane %v2526_v61, %v7683_v17  ;;  %v2619_v44 = vrot.slane %v2572_v40, %v7683_v17 }
 0x7c9   : > { %v4640_v52 = vpop.f32.mrf.mxu0  ;;  %v2615_v61 = vrot.slane %v2564_v12, %v7683_v17 }
 0x7ca   : > { %7685 = vst [vmem:[#allocation37_spill] sm:$0xff] %v6629_v28  ;;  %v2656_v59 = vmul.f32 %v2579_v11, %v6629_v28  ;;  %v6634_v22 = vadd.f32 %v4640_v52, %v6619_v2  ;;  %v2678_v34 = vsel %vm673_vm0, %v2658_v45, 0.0  ;;  %v2574_v52 = vcombine.high %v2564_v12, %v2564_v12 }
 0x7cb   : > { %v2416_v37 = vpop.f32.mrf.mxu0  ;;  %2679 = vadd.xlane.f32.xlu1 %v2678_v34 }
 0x7cc   : > { %7686 = vst [vmem:[#allocation26_spill] sm:$0xff] %v6634_v22  ;;  %v2659_v38 = vmul.f32 %v2591_v29, %v6634_v22  ;;  %v6641_v55 = vadd.f32 %v6619_v2, %v2416_v37  ;;  %v2672_v49 = vsel %vm673_vm0, %v2656_v59, 0.0  ;;  %v6914_v22 = vld [vmem:[%s5792_s8 + $0x70] sm:$0xff] }
 0x7cd   : > { %v4643_v35 = vpop.f32.mrf.mxu0  ;;  %2673 = vadd.xlane.f32.xlu0 %v2672_v49  ;;  %v2599_v49 = vrot.slane %v2522_v62, %v7683_v17  ;;  %v2543_v62 = vcombine.high %v2541_v60, %v2541_v60  ;;  %7708 = vst [vmem:[#allocation64_spill] sm:$0xff] %v6914_v22 }
 0x7ce   : > { %7687 = vst [vmem:[#allocation28_spill] sm:$0xff] %v6641_v55  ;;  %v2657_v21 = vmul.f32 %v2583_v23, %v6641_v55  ;;  %v6647_v9 = vadd.f32 %v4643_v35, %v6619_v2  ;;  %v2681_v24 = vsel %vm673_vm0, %v2659_v38, 0.0 }
 0x7cf   : > { %v2429_v30 = vpop.f32.mrf.mxu0  ;;  %2682 = vadd.xlane.f32.xlu1 %v2681_v24 }
 0x7d0   : > { %7688 = vst [vmem:[#allocation45_spill] sm:$0xff] %v6647_v9  ;;  %v2662_v6 = vmul.f32 %v2603_v10, %v6647_v9  ;;  %v6654_v18 = vadd.f32 %v6619_v2, %v2429_v30  ;;  %v2675_v13 = vsel %vm673_vm0, %v2657_v21, 0.0  ;;  %v2557_v10 = vrot.slane %v2541_v60, %v6613_v41 }
 0x7d1   : > { %v4644_v63 = vpop.f32.mrf.mxu0  ;;  %v2623_v21 = vrot.slane %v2574_v52, %v7683_v17 }
 0x7d2   : > { %7689 = vst [vmem:[#allocation46_spill] sm:$0xff] %v6654_v18  ;;  %v2660_v20 = vmul.f32 %v2595_v27, %v6654_v18  ;;  %v6661_v3 = vadd.f32 %v4644_v63, %v6619_v2  ;;  %v2690_v8 = vsel %vm673_vm0, %v2662_v6, 0.0 }
 0x7d3   : > { %v2432_v56 = vpop.f32.mrf.mxu0  ;;  %2676 = vadd.xlane.f32.xlu1 %v2675_v13  ;;  %v2573_v13 = vcombine.high %v2557_v10, %v2557_v10 }
 0x7d4   : > { %7690 = vst [vmem:[#allocation47_spill] sm:$0xff] %v6661_v3  ;;  %v2663_v0 = vmul.f32 %v2607_v32, %v6661_v3  ;;  %v6677_v59 = vadd.f32 %v6619_v2, %v2432_v56  ;;  %v2684_v34 = vsel %vm673_vm0, %v2660_v20, 0.0 }
 0x7d5   : > { %v2635_v32 = vrot.slane %v2573_v13, %v7683_v17  ;;  %v4842_v13 = vpack.i.bf16 %v6527_v31, %v6525_v47 }
 0x7d6   : > { %v4647_v33 = vpop.f32.mrf.mxu0  ;;  %7693 = vst [vmem:[#allocation50_spill] sm:$0xff] %v6677_v59  ;;  %v2661_v24 = vmul.f32 %v2599_v49, %v6677_v59  ;;  %v2693_v48 = vsel %vm673_vm0, %v2663_v0, 0.0 }
 0x7d7   : > { %v6666_v11 = vadd.f32 %v4647_v33, %v6619_v2  ;;  %2691 = vadd.xlane.f32.xlu1 %v2690_v8  ;;  %v2571_v33 = vrot.slane %v2543_v62, %v6613_v41  ;;  %v4919_v62 = vld [vmem:[%s7544_s11 + $0x8] sm:$0xff]  }
 0x7d8   : > { %v2445_v1 = vpop.f32.mrf.mxu0  ;;  %v2687_v56 = vsel %vm673_vm0, %v2661_v24, 0.0  ;;  %v4852_v24 = vpack.i.bf16 %v6544_v43, %v6542_v19 }
 0x7d9   : > { %7691 = vst [vmem:[#allocation48_spill] sm:$0xff] %v6666_v11  ;;  %v2666_v45 = vmul.f32 %v2619_v44, %v6666_v11  ;;  %v6672_v29 = vadd.f32 %v6619_v2, %v2445_v1  ;;  %v2627_v1 = vrot.slane %v2557_v10, %v7683_v17  ;;  %v2631_v49 = vrot.slane %v2571_v33, %v7683_v17 }
 0x7da   : > { %v4648_v23 = vpop.f32.mrf.mxu0 }
 0x7db   : > { %7692 = vst [vmem:[#allocation49_spill] sm:$0xff] %v6672_v29  ;;  %v2664_v15 = vmul.f32 %v2611_v58, %v6672_v29  ;;  %v6682_v37 = vadd.f32 %v4648_v23, %v6619_v2  ;;  %2685 = vadd.xlane.f32.xlu1 %v2684_v34  ;;  %v2702_v38 = vsel %vm673_vm0, %v2666_v45, 0.0  ;;  %v2575_v45 = vcombine.high %v2571_v33, %v2571_v33 }
 0x7dc   : > { %v2448_v35 = vpop.f32.mrf.mxu0  ;;  %2703 = vadd.xlane.f32.xlu0 %v2702_v38  ;;  %v7700_v33 = vlaneseq }
 0x7dd   : > { %7694 = vst [vmem:[#allocation51_spill] sm:$0xff] %v6682_v37  ;;  %v2667_v30 = vmul.f32 %v2623_v21, %v6682_v37  ;;  %v6692_v54 = vadd.f32 %v6619_v2, %v2448_v35  ;;  %v2696_v63 = vsel %vm673_vm0, %v2664_v15, 0.0  ;;  %v2639_v23 = vrot.slane %v2575_v45, %v7683_v17 }
 0x7de   : > { %v4847_v35 = vpack.i.bf16 %v6553_v46, %v6551_v4 }
 0x7df   : > { %7695 = vst [vmem:[#allocation52_spill] sm:$0xff] %v6692_v54  ;;  %2694 = vadd.xlane.f32.xlu1 %v2693_v48  ;;  %v4651_v6 = vpop.f32.mrf.mxu0  ;;  %v2665_v40 = vmul.f32 %v2615_v61, %v6692_v54  ;;  %v2705_v27 = vsel %vm673_vm0, %v2667_v30, 0.0  ;;  %v4862_v48 = vpack.i.bf16 %v6563_v16, %v6561_v7  ;;  %v4917_v30 = vld [vmem:[%s7544_s11 + $0x18] sm:$0xff]   ;;  %v4920_v61 = vld [vmem:[%s7544_s11] sm:$0xff]  }
 0x7e0   : > { %2697 = vadd.xlane.f32.xlu0 %v2696_v63  ;;  %v6699_v5 = vadd.f32 %v4651_v6, %v6619_v2  ;;  %4653 = vmatprep.subr.bf16.mxu1 %v4917_v30  ;;  %v4872_v63 = vpack.i.bf16 %v6588_v57, %v6586_v14  ;;  %v4918_v6 = vld [vmem:[%s7544_s11 + $0x10] sm:$0xff]  }
 0x7e1   : > { %v2461_v20 = vpop.f32.mrf.mxu0  ;;  %v2699_v44 = vsel %vm673_vm0, %v2665_v40, 0.0  ;;  %4654 = vmatpush3.bf16.msra.mxu1 %v4917_v30  ;;  %v4867_v40 = vpack.i.bf16 %v6584_v50, %v6582_v51 }
 0x7e2   : > { %7696 = vst [vmem:[#allocation53_spill] sm:$0xff] %v6699_v5  ;;  %v2670_v8 = vmul.f32 %v2635_v32, %v6699_v5  ;;  %v6706_v12 = vadd.f32 %v6619_v2, %v2461_v20  ;;  %4655 = vmatprep.subr.bf16.mxu1 %v4918_v6 }
 0x7e3   : > { %2688 = vadd.xlane.f32.xlu1 %v2687_v56  ;;  %v4652_v60 = vpop.f32.mrf.mxu0  ;;  %v4857_v56 = vpack.i.bf16 %v6570_v25, %v6568_v42 }
 0x7e4   : > { %2706 = vadd.xlane.f32.xlu0 %v2705_v27  ;;  %7697 = vst [vmem:[#allocation54_spill] sm:$0xff] %v6706_v12  ;;  %v2668_v58 = vmul.f32 %v2627_v1, %v6706_v12  ;;  %v6712_v52 = vadd.f32 %v4652_v60, %v6619_v2  ;;  %v2714_v0 = vsel %vm673_vm0, %v2670_v8, 0.0  ;;  %v2737_v8 = vand.u32 127, %v7700_v33  ;;  %v6847_v12 = vld [vmem:[%s5792_s8 + $0x20] sm:$0xff] }
 0x7e5   : > { %v2464_v41 = vpop.f32.mrf.mxu0  ;;  %4656 = vmatpush3.bf16.msra.mxu1 %v4918_v6 }
 0x7e6   : > { %7698 = vst [vmem:[#allocation55_spill] sm:$0xff] %v6712_v52  ;;  %v2671_v34 = vmul.f32 %v2639_v23, %v6712_v52  ;;  %v6718_v15 = vadd.f32 %v6619_v2, %v2464_v41  ;;  %v2708_v38 = vsel %vm673_vm0, %v2668_v58, 0.0  ;;  %4657 = vmatprep.subr.bf16.mxu1 %v4919_v62  ;;  %v6768_v60 = vsub.s32 %v2737_v8, %v7682_v26 }
 0x7e8   : > { %2700 = vadd.xlane.f32.xlu0 %v2699_v44  ;;  %7699 = vst [vmem:[#allocation56_spill] sm:$0xff] %v6718_v15  ;;  %v2669_v10 = vmul.f32 %v2631_v49, %v6718_v15  ;;  %v2717_v21 = vsel %vm673_vm0, %v2671_v34, 0.0 }
 0x7e9   : > { %4658 = vmatpush3.bf16.msra.mxu1 %v4919_v62 }
 0x7ea   : > { %v2711_v2 = vsel %vm673_vm0, %v2669_v10, 0.0  ;;  %4659 = vmatprep.subr.bf16.mxu1 %v4920_v61 }
 0x7ec   : > { %2715 = vadd.xlane.f32.xlu0 %v2714_v0 }
 0x7ed   : > { %4660 = vmatpush3.bf16.msra.mxu1 %v4920_v61 }
 0x7f0   : > { %2709 = vadd.xlane.f32.xlu0 %v2708_v38 }
 0x7f4   : > { %2718 = vadd.xlane.f32.xlu0 %v2717_v21  ;;  %4848 = vrot.lane.b32.xlu1 %v4847_v35, %s5491_s14 }
 0x7f8   : > { %2712 = vadd.xlane.f32.xlu0 %v2711_v2  ;;  %4853 = vrot.lane.b32.xlu1 %v4852_v24, %s5491_s14 }
 0x7fc   : > { %4863 = vrot.lane.b32.xlu1 %v4862_v48, %s5491_s14 }
 0x800   : > { %4873 = vrot.lane.b32.xlu1 %v4872_v63, %s5491_s14 }
 0x80e   : > { %4843 = vrot.lane.b32.xlu0 %v4842_v13, %s5491_s14 }
 0x812   : > { %4858 = vrot.lane.b32.xlu0 %v4857_v56, %s5491_s14 }
 0x816   : > { %4868 = vrot.lane.b32.xlu0 %v4867_v40, %s5491_s14 }
 0x854   : > { %v6758_v27 = vpop.xlane.xlu1 %2679 }
 0x855   : > { %v2749_v34 = vrot.slane %v6758_v27, %v6768_v60 }
 0x856   : > { %v6770_v1 = vpop.xlane.xlu0 %2673 }
 0x857   : > { %v2741_v0 = vrot.slane %v6770_v1, %v6768_v60 }
 0x858   : > { %v6760_v20 = vpop.xlane.xlu1 %2682 }
 0x859   : > { %v2753_v21 = vrot.slane %v6760_v20, %v6768_v60 }
 0x85c   : > { %v6762_v32 = vpop.xlane.xlu1 %2676 }
 0x85d   : > { %v2745_v45 = vrot.slane %v6762_v32, %v6768_v60 }
 0x85f   : > { %v2802_v23 = vsel %vm2227_vm2, %v2745_v45, %v2741_v0 }
 0x860   : > { %v6765_v44 = vpop.xlane.xlu1 %2691  ;;  %v2803_v35 = vsel %vm2229_vm3, %v2749_v34, %v2802_v23 }
 0x861   : > { %v2804_v2 = vsel %vm2231_vm4, %v2753_v21, %v2803_v35  ;;  %v2765_v63 = vrot.slane %v6765_v44, %v6768_v60 }
 0x864   : > { %v6774_v58 = vpop.xlane.xlu1 %2685 }
 0x865   : > { %v6778_v41 = vpop.xlane.xlu0 %2703  ;;  %v2757_v10 = vrot.slane %v6774_v58, %v6768_v60 }
 0x866   : > { %v2781_v35 = vrot.slane %v6778_v41, %v6768_v60 }
 0x867   : > { %v2805_v6 = vsel %vm2233_vm5, %v2757_v10, %v2804_v2 }
 0x868   : > { %v6783_v38 = vpop.xlane.xlu1 %2694 }
 0x869   : > { %v6785_v49 = vpop.xlane.xlu0 %2697  ;;  %v2769_v62 = vrot.slane %v6783_v38, %v6768_v60 }
 0x86a   : > { %v2773_v23 = vrot.slane %v6785_v49, %v6768_v60 }
 0x86c   : > { %v6792_v24 = vpop.xlane.xlu1 %2688 }
 0x86d   : > { %v2761_v48 = vrot.slane %v6792_v24, %v6768_v60  ;;  %v6797_v30 = vpop.xlane.xlu0 %2706 }
 0x86f   : > { %v2806_v61 = vsel %vm2235_vm6, %v2761_v48, %v2805_v6  ;;  %v2785_v48 = vrot.slane %v6797_v30, %v6768_v60 }
 0x870   : > { %v2807_v13 = vsel %vm2237_vm7, %v2765_v63, %v2806_v61  ;;  %v4849_v63 = vpop.permute.xlu1 %4848 }
 0x871   : > { %v6806_v56 = vpop.xlane.xlu0 %2700  ;;  %v2808_v40 = vsel %vm2239_vm8, %v2769_v62, %v2807_v13  ;;  %v4851_v13 = vunpack.i.h.bf16 %v4849_v63 }
 0x872   : > { %v2819_v33 = vsel %vm2818_vm10, %v2808_v40, -inf  ;;  %v2777_v45 = vrot.slane %v6806_v56, %v6768_v60  ;;  %v4850_v40 = vunpack.i.l.bf16 %v4849_v63  ;;  %v6842_v63 = vld [vmem:[%s5792_s8 + $0x28] sm:$0xff] }
 0x873   : > { %2820 = vmax.xlane.f32.xlu0 %v2819_v33  ;;  %v3497_v15 = vsel %vm673_vm0, %v6842_v63, %v4851_v13 }
 0x874   : > { %v2809_v34 = vsel %vm2227_vm2, %v2777_v45, %v2773_v23 }
 0x875   : > { %v6810_v8 = vpop.xlane.xlu0 %2715  ;;  %v2810_v21 = vsel %vm2229_vm3, %v2781_v35, %v2809_v34 }
 0x876   : > { %v2811_v62 = vsel %vm2231_vm4, %v2785_v48, %v2810_v21  ;;  %v2797_v33 = vrot.slane %v6810_v8, %v6768_v60 }
 0x879   : > { %v6814_v0 = vpop.xlane.xlu0 %2709 }
 0x87a   : > { %v2789_v2 = vrot.slane %v6814_v0, %v6768_v60 }
 0x87c   : > { %v2812_v45 = vsel %vm2233_vm5, %v2789_v2, %v2811_v62  ;;  %v3496_v2 = vsel %vm673_vm0, %v6847_v12, %v4850_v40  ;;  %v4854_v62 = vpop.permute.xlu1 %4853 }
 0x87d   : > { %v6821_v10 = vpop.xlane.xlu0 %2718  ;;  %v3510_v37 = vpack.c.bf16 %v3497_v15, %v3496_v2  ;;  %v6875_v15 = vld [vmem:[%s5792_s8 + $0x48] sm:$0xff] }
 0x87e   : > { %v2801_v23 = vrot.slane %v6821_v10, %v6768_v60  ;;  %7702 = vst [vmem:[#allocation58_spill] sm:$0xff] %v6875_v15 }
 0x881   : > { %v6828_v6 = vpop.xlane.xlu0 %2712 }
 0x882   : > { %v2793_v61 = vrot.slane %v6828_v6, %v6768_v60 }
 0x884   : > { %v2813_v34 = vsel %vm2235_vm6, %v2793_v61, %v2812_v45  ;;  %v6853_v45 = vld [vmem:[%s5792_s8 + $0x18] sm:$0xff] }
 0x885   : > { %v4844_v35 = vpop.permute.xlu0 %4843  ;;  %v2814_v21 = vsel %vm2237_vm7, %v2797_v33, %v2813_v34 }
 0x886   : > { %v4846_v48 = vunpack.i.h.bf16 %v4844_v35  ;;  %v4845_v52 = vunpack.i.l.bf16 %v4844_v35  ;;  %v2815_v5 = vsel %vm2239_vm8, %v2801_v23, %v2814_v21  ;;  %v6858_v23 = vld [vmem:[%s5792_s8 + $0x10] sm:$0xff]  ;;  %v4856_v35 = vunpack.i.h.bf16 %v4854_v62 }
 0x887   : > { %v2822_v61 = vsel %vm2818_vm10, %v2815_v5, -inf  ;;  %v4855_v21 = vunpack.i.l.bf16 %v4854_v62  ;;  %v6880_v62 = vld [vmem:[%s5792_s8 + $0x40] sm:$0xff] }
 0x888   : > { %v3495_v33 = vsel %vm673_vm0, %v6853_v45, %v4846_v48  ;;  %v3494_v13 = vsel %vm673_vm0, %v6858_v23, %v4845_v52  ;;  %2823 = vmax.xlane.f32.xlu1 %v2822_v61  ;;  %v6865_v48 = vld [vmem:[%s5792_s8 + $0x38] sm:$0xff]  ;;  %v6870_v52 = vld [vmem:[%s5792_s8 + $0x30] sm:$0xff] }
 0x889   : > { %v3509_v34 = vpack.c.bf16 %v3495_v33, %v3494_v13  ;;  %v4859_v40 = vpop.permute.xlu0 %4858  ;;  %7701 = vst [vmem:[#allocation57_spill] sm:$0xff] %v6865_v48  ;;  %v3499_v29 = vsel %vm673_vm0, %v6865_v48, %v4856_v35  ;;  %v3498_v61 = vsel %vm673_vm0, %v6870_v52, %v4855_v21  ;;  %v4864_v33 = vpop.permute.xlu1 %4863  ;;  %v6945_v48 = vsub.s32 7, %v7682_v26 }
 0x88a   : > { %v4861_v5 = vunpack.i.h.bf16 %v4859_v40  ;;  %v4860_v11 = vunpack.i.l.bf16 %v4859_v40  ;;  %v4866_v40 = vunpack.i.h.bf16 %v4864_v33  ;;  %v4865_v35 = vunpack.i.l.bf16 %v4864_v33  ;;  %v6897_v33 = vld [vmem:[%s5792_s8 + $0x68] sm:$0xff] }
 0x88b   : > { %4662 = vmatmul.mubr.msk.bf16.vlgmr.msra.gmra.mxu1 %vm1427_vm1, %v3509_v34  ;;  %v3511_v34 = vpack.c.bf16 %v3499_v29, %v3498_v61  ;;  %7705 = vst [vmem:[#allocation61_spill] sm:$0xff] %v6897_v33 }
 0x88c   : > { %4665 = vmatprep.mubr.msk.bf16.mxu1 %vm1427_vm1, %v3510_v37  ;;  %v3501_v2 = vsel %vm673_vm0, %v6875_v15, %v4861_v5  ;;  %v3500_v37 = vsel %vm673_vm0, %v6880_v62, %v4860_v11  ;;  %v6887_v5 = vld [vmem:[%s5792_s8 + $0x58] sm:$0xff]  ;;  %v6892_v11 = vld [vmem:[%s5792_s8 + $0x50] sm:$0xff] }
 0x88d   : > { %v4869_v13 = vpop.permute.xlu0 %4868  ;;  %v3512_v54 = vpack.c.bf16 %v3501_v2, %v3500_v37  ;;  %7703 = vst [vmem:[#allocation59_spill] sm:$0xff] %v6887_v5  ;;  %v3503_v9 = vsel %vm673_vm0, %v6887_v5, %v4866_v40  ;;  %7704 = vst [vmem:[#allocation60_spill] sm:$0xff] %v6892_v11  ;;  %v3502_v29 = vsel %vm673_vm0, %v6892_v11, %v4865_v35  ;;  %v4874_v61 = vpop.permute.xlu1 %4873  ;;  %v6902_v37 = vld [vmem:[%s5792_s8 + $0x60] sm:$0xff]  ;;  %v6909_v35 = vld [vmem:[%s5792_s8 + $0x78] sm:$0xff] }
 0x88e   : > { %v4871_v21 = vunpack.i.h.bf16 %v4869_v13  ;;  %v4870_v3 = vunpack.i.l.bf16 %v4869_v13  ;;  %7706 = vst [vmem:[#allocation62_spill] sm:$0xff] %v6902_v37  ;;  %v3513_v13 = vpack.c.bf16 %v3503_v9, %v3502_v29  ;;  %v4875_v40 = vunpack.i.l.bf16 %v4874_v61  ;;  %7707 = vst [vmem:[#allocation63_spill] sm:$0xff] %v6909_v35 }
 0x88f   : > { %v6920_v9 = vsub.s32 2, %v7682_v26  ;;  %v6929_v29 = vsub.s32 3, %v7682_v26 }
 0x890   : > { %v3505_v2 = vsel %vm673_vm0, %v6897_v33, %v4871_v21  ;;  %v3506_v21 = vsel %vm673_vm0, %v6914_v22, %v4875_v40 }
 0x893   : > { %4666 = vmatmul.mubr.msk.bf16.gmra.mxu1 %vm1427_vm1, %v3511_v34  ;;  %v4876_v34 = vunpack.i.h.bf16 %v4874_v61 }
 0x894   : > { %4669 = vmatprep.mubr.msk.bf16.mxu1 %vm1427_vm1, %v3512_v54  ;;  %v3504_v54 = vsel %vm673_vm0, %v6902_v37, %v4870_v3  ;;  %v6923_v3 = vsub.s32 4, %v7682_v26 }
 0x895   : > { %v3514_v59 = vpack.c.bf16 %v3505_v2, %v3504_v54  ;;  %v3507_v18 = vsel %vm673_vm0, %v6909_v35, %v4876_v34  ;;  %v7709_v54 = vld [vmem:[#allocation27_spill] sm:$0xff]  ;;  %v6936_v34 = vsub.s32 6, %v7682_v26 }
 0x896   : > { %v3515_v36 = vpack.c.bf16 %v3507_v18, %v3506_v21 }
 0x89b   : > { %4670 = vmatmul.mubr.msk.bf16.gmra.mxu1 %vm1427_vm1, %v3513_v13 }
 0x89c   : > { %4673 = vmatprep.mubr.msk.bf16.mxu1 %vm1427_vm1, %v3514_v59  ;;  %v6926_v59 = vsub.s32 5, %v7682_v26 }
 0x8a3   : > { %4674 = vmatmul.mubr.msk.bf16.gmra.mxu1 %vm1427_vm1, %v3515_v36 }
 0x8fc   : > { %v2821_v61 = vpop.xlane.xlu0 %2820 }
 0x8fd   : > { %v2830_v2 = vrot.slane %v2821_v61, %v7683_v17  ;;  %v2834_v13 = vrot.slane %v2821_v61, %v7709_v54  ;;  %v2838_v18 = vrot.slane %v2821_v61, %v6920_v9  ;;  %v2846_v36 = vrot.slane %v2821_v61, %v6923_v3 }
 0x8fe   : > { %v2850_v40 = vrot.slane %v2821_v61, %v6926_v59  ;;  %v2842_v28 = vrot.slane %v2821_v61, %v6929_v29  ;;  %v2854_v22 = vrot.slane %v2821_v61, %v6936_v34 }
 0x8ff   : > { %v2907_v21 = vsub.f32 %v6770_v1, %v2830_v2  ;;  %v2908_v55 = vsub.f32 %v6762_v32, %v2834_v13  ;;  %v2909_v35 = vsub.f32 %v6758_v27, %v2838_v18  ;;  %v2911_v33 = vsub.f32 %v6774_v58, %v2846_v36 }
 0x900   : > { %v2912_v37 = vsub.f32 %v6792_v24, %v2850_v40  ;;  %v2910_v1 = vsub.f32 %v6760_v20, %v2842_v28  ;;  %v2858_v2 = vrot.slane %v2821_v61, %v6945_v48  ;;  %v2913_v27 = vsub.f32 %v6765_v44, %v2854_v22 }
 0x901   : > { %v2923_v5 = vmul.f32 1.442695, %v2907_v21  ;;  %v2925_v15 = vmul.f32 1.442695, %v2908_v55  ;;  %v2931_v11 = vmul.f32 1.442695, %v2911_v33 }
 0x902   : > { %v2927_v32 = vmul.f32 1.442695, %v2909_v35  ;;  %v2933_v58 = vmul.f32 1.442695, %v2912_v37  ;;  %v2929_v55 = vmul.f32 1.442695, %v2910_v1  ;;  %v2914_v26 = vsub.f32 %v6783_v38, %v2858_v2 }
 0x903   : > { %5017 = vpow2.f32 %v2923_v5  ;;  %v2935_v13 = vmul.f32 1.442695, %v2913_v27 }
 0x904   : > { %5019 = vpow2.f32 %v2925_v15  ;;  %v2937_v24 = vmul.f32 1.442695, %v2914_v26 }
 0x905   : > { %5021 = vpow2.f32 %v2931_v11 }
 0x906   : > { %5023 = vpow2.f32 %v2927_v32 }
 0x907   : > { %5025 = vpow2.f32 %v2933_v58 }
 0x908   : > { %5027 = vpow2.f32 %v2929_v55 }
 0x909   : > { %5029 = vpow2.f32 %v2935_v13 }
 0x90a   : > { %5031 = vpow2.f32 %v2937_v24 }
 0x910   : > { %v6953_v5 = vpop.eup %5017 }
 0x911   : > { %v6955_v28 = vpop.eup %5019  ;;  %v2824_v20 = vpop.xlane.xlu1 %2823  ;;  %2972 = vperm.xlu0 %4877, %v6953_v5  }
 0x912   : > { %v2862_v22 = vrot.slane %v2824_v20, %v7683_v17  ;;  %v2866_v44 = vrot.slane %v2824_v20, %v7709_v54  ;;  %2975 = vperm.xlu1 %4878, %v6955_v28   ;;  %v6961_v38 = vpop.eup %5021  ;;  %v2870_v15 = vrot.slane %v2824_v20, %v6920_v9  ;;  %v2874_v18 = vrot.slane %v2824_v20, %v6929_v29 }
 0x913   : > { %v6966_v37 = vpop.eup %5023  ;;  %v2886_v55 = vrot.slane %v2824_v20, %v6936_v34  ;;  %v2890_v24 = vrot.slane %v2824_v20, %v6945_v48 }
 0x914   : > { %v2915_v11 = vsub.f32 %v6785_v49, %v2862_v22  ;;  %v2916_v33 = vsub.f32 %v6806_v56, %v2866_v44  ;;  %v6970_v61 = vpop.eup %5025  ;;  %v2917_v36 = vsub.f32 %v6778_v41, %v2870_v15  ;;  %v2878_v56 = vrot.slane %v2824_v20, %v6923_v3 }
 0x915   : > { %2984 = vperm.xlu0 %4877, %v6961_v38   ;;  %v6974_v21 = vpop.eup %5027  ;;  %v2918_v1 = vsub.f32 %v6797_v30, %v2874_v18  ;;  %v2882_v41 = vrot.slane %v2824_v20, %v6926_v59 }
 0x916   : > { %v2939_v35 = vmul.f32 1.442695, %v2915_v11  ;;  %2978 = vperm.xlu1 %4878, %v6966_v37   ;;  %v2941_v40 = vmul.f32 1.442695, %v2916_v33  ;;  %v6978_v49 = vpop.eup %5029  ;;  %v2943_v32 = vmul.f32 1.442695, %v2917_v36  ;;  %v2919_v27 = vsub.f32 %v6814_v0, %v2878_v56 }
 0x917   : > { %v6983_v2 = vpop.eup %5031  ;;  %v2945_v58 = vmul.f32 1.442695, %v2918_v1  ;;  %v2920_v26 = vsub.f32 %v6828_v6, %v2882_v41  ;;  %v2921_v0 = vsub.f32 %v6810_v8, %v2886_v55  ;;  %v2922_v6 = vsub.f32 %v6821_v10, %v2890_v24  ;;  %v7038_v36 = vld [vmem:[%s7710_s24] ss:$0 sm:$0xff] }
 0x918   : > { %5033 = vpow2.f32 %v2939_v35  ;;  %v2947_v30 = vmul.f32 1.442695, %v2919_v27 }
 0x919   : > { %2987 = vperm.xlu0 %4877, %v6970_v61   ;;  %5035 = vpow2.f32 %v2941_v40  ;;  %v2949_v22 = vmul.f32 1.442695, %v2920_v26  ;;  %v2951_v15 = vmul.f32 1.442695, %v2921_v0  ;;  %v2953_v8 = vmul.f32 1.442695, %v2922_v6 }
 0x91a   : > { %2981 = vperm.xlu1 %4878, %v6974_v21   ;;  %5037 = vpow2.f32 %v2943_v32 }
 0x91b   : > { %5039 = vpow2.f32 %v2945_v58 }
 0x91c   : > { %5041 = vpow2.f32 %v2947_v30 }
 0x91d   : > { %2990 = vperm.xlu0 %4877, %v6978_v49   ;;  %5043 = vpow2.f32 %v2949_v22 }
 0x91e   : > { %5045 = vpow2.f32 %v2951_v15 }
 0x91f   : > { %5047 = vpow2.f32 %v2953_v8 }
 0x921   : > { %2993 = vperm.xlu0 %4877, %v6983_v2  }
 0x925   : > { %v6990_v13 = vpop.eup %5033  ;;  %3861 = vrot.lane.b32.xlu0 %v6535_v39, %s5488_s20 }
 0x926   : > { %2996 = vperm.xlu1 %4878, %v6990_v13   ;;  %v6997_v44 = vpop.eup %5035 }
 0x927   : > { %v7003_v11 = vpop.eup %5037 }
 0x928   : > { %v7008_v20 = vpop.eup %5039 }
 0x929   : > { %3865 = vrot.lane.b32.xlu0 %v6527_v31, %s5488_s20  ;;  %v7013_v10 = vpop.eup %5041 }
 0x92a   : > { %2999 = vperm.xlu1 %4878, %v6997_v44   ;;  %v7018_v33 = vpop.eup %5043 }
 0x92b   : > { %v7023_v35 = vpop.eup %5045 }
 0x92c   : > { %v7028_v18 = vpop.eup %5047 }
 0x92d   : > { %3869 = vrot.lane.b32.xlu0 %v6553_v46, %s5488_s20 }
 0x92e   : > { %3002 = vperm.xlu1 %4878, %v7003_v11  }
 0x931   : > { %3873 = vrot.lane.b32.xlu0 %v6544_v43, %s5488_s20 }
 0x932   : > { %3005 = vperm.xlu1 %4878, %v7008_v20  }
 0x935   : > { %3877 = vrot.lane.b32.xlu0 %v6570_v25, %s5488_s20 }
 0x936   : > { %3008 = vperm.xlu1 %4878, %v7013_v10  }
 0x939   : > { %3881 = vrot.lane.b32.xlu0 %v6563_v16, %s5488_s20 }
 0x93a   : > { %3011 = vperm.xlu1 %4878, %v7018_v33  }
 0x93d   : > { %3885 = vrot.lane.b32.xlu0 %v6584_v50, %s5488_s20 }
 0x93e   : > { %3014 = vperm.xlu1 %4878, %v7023_v35  }
 0x941   : > { %3889 = vrot.lane.b32.xlu0 %v6588_v57, %s5488_s20 }
 0x942   : > { %3017 = vperm.xlu1 %4878, %v7028_v18  }
 0x946   : > { %3859 = vrot.lane.b32.xlu1 %v6533_v53, %s5488_s20 }
 0x94a   : > { %3863 = vrot.lane.b32.xlu1 %v6525_v47, %s5488_s20 }
 0x94b   : > { %v4663_v40 = vpop.f32.mrf.mxu1 }
 0x94c   : > { %v3613_v56 = vadd.f32 %v4663_v40, %v7038_v36 }
 0x94d   : > { %v3604_v1 = vpop.f32.mrf.mxu1 }
 0x94e   : > { %v4442_v32 = vmul.f32 -1.442695, %v3613_v56  ;;  %v3605_v41 = vadd.f32 %v7038_v36, %v3604_v1  ;;  %3867 = vrot.lane.b32.xlu1 %v6551_v4, %s5488_s20 }
 0x94f   : > { %v4664_v27 = vpop.f32.mrf.mxu1 }
 0x950   : > { %5049 = vpow2.f32 %v4442_v32  ;;  %v4440_v58 = vmul.f32 -1.442695, %v3605_v41  ;;  %v3616_v55 = vadd.f32 %v4664_v27, %v7038_v36 }
 0x951   : > { %v3607_v26 = vpop.f32.mrf.mxu1 }
 0x952   : > { %5051 = vpow2.f32 %v4440_v58  ;;  %v4443_v30 = vmul.f32 -1.442695, %v3616_v55  ;;  %v3608_v24 = vadd.f32 %v7038_v36, %v3607_v26  ;;  %3871 = vrot.lane.b32.xlu1 %v6542_v19, %s5488_s20 }
 0x953   : > { %v7050_v0 = vpop.f32.mrf.mxu1 }
 0x954   : > { %5053 = vpow2.f32 %v4443_v30  ;;  %v4441_v22 = vmul.f32 -1.442695, %v3608_v24 }
 0x955   : > { %v3620_v6 = vpop.f32.mrf.mxu1 }
 0x956   : > { %5055 = vpow2.f32 %v4441_v22  ;;  %v3621_v15 = vadd.f32 %v7038_v36, %v3620_v6  ;;  %3875 = vrot.lane.b32.xlu1 %v6568_v42, %s5488_s20 }
 0x957   : > { %v4668_v8 = vpop.f32.mrf.mxu1 }
 0x958   : > { %v4444_v40 = vmul.f32 -1.442695, %v3621_v15  ;;  %v3632_v56 = vadd.f32 %v4668_v8, %v7038_v36 }
 0x959   : > { %v3623_v1 = vpop.f32.mrf.mxu1 }
 0x95a   : > { %5057 = vpow2.f32 %v4444_v40  ;;  %v3624_v32 = vadd.f32 %v7038_v36, %v3623_v1  ;;  %3879 = vrot.lane.b32.xlu1 %v6561_v7, %s5488_s20  ;;  %v4447_v57 = vmul.f32 -1.442695, %v3632_v56 }
 0x95c   : > { %v4445_v41 = vmul.f32 -1.442695, %v3624_v32 }
 0x95d   : > { %v5050_v27 = vpop.eup %5049 }
 0x95e   : > { %5059 = vpow2.f32 %v4445_v41  ;;  %3883 = vrot.lane.b32.xlu1 %v6582_v51, %s5488_s20  ;;  %v3717_v55 = vadd.f32 1.0, %v5050_v27  ;;  %v4671_v41 = vpop.f32.mrf.mxu1  ;;  %v5175_v27 = vld [vmem:[%s5792_s8] sm:$0xff] }
 0x95f   : > { %v5052_v58 = vpop.eup %5051 }
 0x960   : > { %v3715_v26 = vadd.f32 1.0, %v5052_v58 }
 0x961   : > { %v5054_v30 = vpop.eup %5053 }
 0x962   : > { %5061 = vrcp.f32 %v3715_v26  ;;  %3887 = vrot.lane.b32.xlu1 %v6586_v14, %s5488_s20  ;;  %v3718_v22 = vadd.f32 1.0, %v5054_v30  ;;  %v3636_v30 = vpop.f32.mrf.mxu1 }
 0x963   : > { %v5056_v24 = vpop.eup %5055  ;;  %5063 = vrcp.f32 %v3717_v55 }
 0x964   : > { %v3716_v6 = vadd.f32 1.0, %v5056_v24  ;;  %v5176_v24 = vld [vmem:[%s5792_s8 + $0x8] sm:$0xff]  ;;  %s7380_s8 = scalar_lea.vmem [#allocation14], %s5780_s6  ;;  %s4354_s6 = sshll.u32 %s5777_s15, 4 }
 0x965   : > { %s4140_s12 = sshll.u32 %s7380_s8, 4  ;;  %s7449_s12 = int_to_ptr.vmem [resolvable:$true] %s4140_s12 }
 0x966   : > { %5065 = vrcp.f32 %v3716_v6  ;;  %s5363_s13 = scalar_lea.vmem %s7449_s12, 2048  ;;  %p5370_p5 = scmp.lt.s32.totalorder %s7449_s12, %s5368_s5 }
 0x967   : > { %v5058_v15 = vpop.eup %5057  ;;  %5067 = vrcp.f32 %v3718_v22  ;;  %p5364_p9 = scmp.ne.s32.totalorder %s7449_s12, %s5363_s13  ;;  %p5371_p6 = scmp.lt.s32.totalorder %s5369_s27, %s5363_s13 }
 0x968   : > { %v3719_v8 = vadd.f32 1.0, %v5058_v15 }
 0x969   : > { %p5365_p10 = pnand %p5364_p9, %p7754_p1  ;;  %p5372_p13 = por %p5371_p6, %p5370_p5 }
 0x96a   : > { %5069 = vrcp.f32 %v3719_v8 }
 0x96b   : > { %v5060_v40 = vpop.eup %5059  ;;  %p5366_p0 = pneg %p5365_p10 }
 0x96c   : > { %v3720_v1 = vadd.f32 1.0, %v5060_v40  ;;  %v4672_v40 = vpop.f32.mrf.mxu1 }
 0x96d   : > { %p5373_p7 = pnand %p5372_p13, %p5366_p0 }
 0x96e   : > { %5071 = vrcp.f32 %v3720_v1 }
 0x96f   : > { %v7063_v32 = vpop.eup %5061  ;;  %5073 = vpow2.f32 %v4447_v57 }
 0x970   : > { %v3763_v58 = vmul.f32 %v5175_v27, %v7063_v32  ;;  %v7067_v26 = vpop.eup %5063 }
 0x971   : > { %v3765_v6 = vmul.f32 %v6858_v23, %v7067_v26 }
 0x972   : > { %3795 = vrot.lane.b32.xlu0 %v3763_v58, %s5488_s20  ;;  %v3639_v58 = vpop.f32.mrf.mxu1 }
 0x973   : > { %v7070_v55 = vpop.eup %5065 }
 0x974   : > { %v3764_v22 = vmul.f32 %v5176_v24, %v7070_v55  ;;  %v7076_v15 = vpop.eup %5067 }
 0x975   : > { %v3766_v1 = vmul.f32 %v6853_v45, %v7076_v15  ;;  %v3640_v45 = vadd.f32 %v7038_v36, %v3639_v58  ;;  %v3645_v58 = vadd.f32 %v4671_v41, %v7038_v36 }
 0x976   : > { %3797 = vrot.lane.b32.xlu1 %v3764_v22, %s5488_s20  ;;  %3799 = vrot.lane.b32.xlu0 %v3765_v6, %s5488_s20  ;;  %v4675_v22 = vpop.f32.mrf.mxu1 }
 0x977   : > { %v7080_v8 = vpop.eup %5069 }
 0x978   : > { %v3767_v27 = vmul.f32 %v6847_v12, %v7080_v8  ;;  %v3652_v6 = vpop.f32.mrf.mxu1  ;;  %v3629_v12 = vadd.f32 %v7050_v0, %v7038_v36 }
 0x97a   : > { %3801 = vrot.lane.b32.xlu1 %v3766_v1, %s5488_s20  ;;  %3803 = vrot.lane.b32.xlu0 %v3767_v27, %s5488_s20  ;;  %v4676_v50 = vpop.f32.mrf.mxu1  ;;  %v3648_v1 = vadd.f32 %v4672_v40, %v7038_v36  ;;  %v4449_v27 = vmul.f32 -1.442695, %v3640_v45  ;;  %v4446_v43 = vmul.f32 -1.442695, %v3629_v12 }
 0x97b   : > { %v7088_v23 = vpop.eup %5071  ;;  %v3664_v45 = vadd.f32 %v4676_v50, %v7038_v36 }
 0x97c   : > { %v3768_v24 = vmul.f32 %v6842_v63, %v7088_v23  ;;  %v3655_v16 = vpop.f32.mrf.mxu1  ;;  %v3637_v63 = vadd.f32 %v7038_v36, %v3636_v30  ;;  %5075 = vpow2.f32 %v4449_v27  ;;  %v5074_v50 = vpop.eup %5073 }
 0x97d   : > { %v3656_v56 = vadd.f32 %v7038_v36, %v3655_v16  ;;  %5077 = vpow2.f32 %v4446_v43  ;;  %v3653_v16 = vadd.f32 %v7038_v36, %v3652_v6  ;;  %v4455_v42 = vmul.f32 -1.442695, %v3664_v45 }
 0x97e   : > { %3805 = vrot.lane.b32.xlu1 %v3768_v24, %s5488_s20  ;;  %v4451_v24 = vmul.f32 -1.442695, %v3648_v1  ;;  %v4448_v7 = vmul.f32 -1.442695, %v3637_v63  ;;  %v4450_v1 = vmul.f32 -1.442695, %v3645_v58 }
 0x97f   : > { %v4453_v12 = vmul.f32 -1.442695, %v3656_v56  ;;  %v4452_v58 = vmul.f32 -1.442695, %v3653_v16 }
 0x980   : > { %5079 = vpow2.f32 %v4451_v24 }
 0x981   : > { %5081 = vpow2.f32 %v4448_v7  ;;  %v3661_v7 = vadd.f32 %v4675_v22, %v7038_v36 }
 0x982   : > { %5083 = vpow2.f32 %v4453_v12 }
 0x983   : > { %5085 = vpow2.f32 %v4450_v1 }
 0x984   : > { %5087 = vpow2.f32 %v4455_v42 }
 0x985   : > { %5089 = vpow2.f32 %v4452_v58 }
 0x989   : > { %v5076_v12 = vpop.eup %5075 }
 0x98a   : > { %v3724_v22 = vadd.f32 1.0, %v5076_v12 }
 0x98c   : > { %v2973_v25 = vpop.permute.xlu0 %2972 }
 0x98d   : > { %v2976_v14 = vpop.permute.xlu1 %2975  ;;  %v3022_v40 = vrot.slane %v2973_v25, %v6768_v60 }
 0x98e   : > { %v3026_v57 = vrot.slane %v2976_v14, %v6768_v60 }
 0x990   : > { %v2985_v51 = vpop.permute.xlu0 %2984  ;;  %v3083_v43 = vsel %vm2227_vm2, %v3026_v57, %v3022_v40  ;;  %v3722_v40 = vadd.f32 1.0, %v5074_v50 }
 0x991   : > { %v2979_v0 = vpop.permute.xlu1 %2978  ;;  %v3038_v14 = vrot.slane %v2985_v51, %v6768_v60 }
 0x992   : > { %v3030_v30 = vrot.slane %v2979_v0, %v6768_v60  ;;  %5091 = vrcp.f32 %v3722_v40 }
 0x994   : > { %v2988_v27 = vpop.permute.xlu0 %2987  ;;  %v3084_v25 = vsel %vm2229_vm3, %v3030_v30, %v3083_v43  ;;  %v4454_v30 = vmul.f32 -1.442695, %v3661_v7 }
 0x995   : > { %v2982_v41 = vpop.permute.xlu1 %2981  ;;  %v3042_v0 = vrot.slane %v2988_v27, %v6768_v60 }
 0x996   : > { %v3034_v63 = vrot.slane %v2982_v41, %v6768_v60  ;;  %v5078_v41 = vpop.eup %5077  ;;  %5093 = vpow2.f32 %v4454_v30 }
 0x997   : > { %v5080_v27 = vpop.eup %5079  ;;  %5095 = vrcp.f32 %v3724_v22 }
 0x998   : > { %v3085_v24 = vsel %vm2231_vm4, %v3034_v63, %v3084_v25  ;;  %v2991_v56 = vpop.permute.xlu0 %2990  ;;  %v3721_v63 = vadd.f32 1.0, %v5078_v41  ;;  %v3726_v50 = vadd.f32 1.0, %v5080_v27 }
 0x999   : > { %v3086_v6 = vsel %vm2233_vm5, %v3038_v14, %v3085_v24  ;;  %v3046_v57 = vrot.slane %v2991_v56, %v6768_v60  ;;  %v5082_v14 = vpop.eup %5081 }
 0x99a   : > { %v3087_v45 = vsel %vm2235_vm6, %v3042_v0, %v3086_v6  ;;  %v5084_v24 = vpop.eup %5083  ;;  %5097 = vrcp.f32 %v3721_v63  ;;  %v3723_v58 = vadd.f32 1.0, %v5082_v14 }
 0x99b   : > { %v3088_v36 = vsel %vm2237_vm7, %v3046_v57, %v3087_v45  ;;  %v5086_v7 = vpop.eup %5085  ;;  %5099 = vrcp.f32 %v3726_v50  ;;  %v3728_v0 = vadd.f32 1.0, %v5084_v24 }
 0x99c   : > { %v2994_v51 = vpop.permute.xlu0 %2993  ;;  %v5088_v57 = vpop.eup %5087  ;;  %v3725_v45 = vadd.f32 1.0, %v5086_v7  ;;  %5101 = vrcp.f32 %v3723_v58 }
 0x99d   : > { %v3050_v1 = vrot.slane %v2994_v51, %v6768_v60  ;;  %v5090_v51 = vpop.eup %5089  ;;  %v3730_v30 = vadd.f32 1.0, %v5088_v57  ;;  %5103 = vrcp.f32 %v3728_v0 }
 0x99e   : > { %5105 = vrcp.f32 %v3725_v45 }
 0x99f   : > { %v3089_v16 = vsel %vm2239_vm8, %v3050_v1, %v3088_v36  ;;  %v7125_v1 = vpop.eup %5091  ;;  %v3727_v36 = vadd.f32 1.0, %v5090_v51  ;;  %5107 = vrcp.f32 %v3730_v30 }
 0x9a0   : > { %v7118_v43 = vpop.permute.xlu0 %3861  ;;  %v3099_v42 = vsel %vm2818_vm10, %v3089_v16, 0.0 }
 0x9a1   : > { %v2997_v25 = vpop.permute.xlu1 %2996  ;;  %3100 = vadd.xlane.f32.xlu0 %v3099_v42  ;;  %5109 = vrcp.f32 %v3727_v36 }
 0x9a3   : > { %v5094_v27 = vpop.eup %5093 }
 0x9a4   : > { %v7121_v56 = vpop.permute.xlu0 %3865  ;;  %v5096_v42 = vpop.eup %5095  ;;  %v3729_v14 = vadd.f32 1.0, %v5094_v27 }
 0x9a5   : > { %v3000_v6 = vpop.permute.xlu1 %2999 }
 0x9a6   : > { %5111 = vrcp.f32 %v3729_v14  ;;  %v3058_v30 = vrot.slane %v3000_v6, %v6768_v60 }
 0x9a7   : > { %v7132_v7 = vpop.eup %5097 }
 0x9a8   : > { %v7123_v40 = vpop.permute.xlu0 %3869  ;;  %v5100_v58 = vpop.eup %5099  ;;  %v3769_v51 = vmul.f32 %v6870_v52, %v7132_v7 }
 0x9a9   : > { %v3003_v12 = vpop.permute.xlu1 %3002 }
 0x9aa   : > { %v3062_v36 = vrot.slane %v3003_v12, %v6768_v60 }
 0x9ac   : > { %v3874_v41 = vpop.permute.xlu0 %3873 }
 0x9ad   : > { %v3006_v22 = vpop.permute.xlu1 %3005  ;;  %v7128_v16 = vmul.f32 %v7125_v1, %v3874_v41  ;;  %v7138_v41 = vpop.eup %5101 }
 0x9ae   : > { %v5104_v27 = vpop.eup %5103  ;;  %v3066_v19 = vrot.slane %v3006_v22, %v6768_v60  ;;  %v3771_v52 = vmul.f32 %v6880_v62, %v7138_v41 }
 0x9af   : > { %v7150_v31 = vpop.eup %5105 }
 0x9b0   : > { %v3878_v63 = vpop.permute.xlu0 %3877  ;;  %v5108_v22 = vpop.eup %5107 }
 0x9b1   : > { %v3009_v50 = vpop.permute.xlu1 %3008  ;;  %v7130_v24 = vmul.f32 %v5096_v42, %v3878_v63  ;;  %v3054_v63 = vrot.slane %v2997_v25, %v6768_v60 }
 0x9b3   : > { %v3090_v6 = vsel %vm2227_vm2, %v3058_v30, %v3054_v63  ;;  %v7163_v63 = vpop.eup %5109 }
 0x9b4   : > { %v3882_v0 = vpop.permute.xlu0 %3881 }
 0x9b5   : > { %v3012_v57 = vpop.permute.xlu1 %3011  ;;  %v7134_v45 = vmul.f32 %v5100_v58, %v3882_v0  ;;  %v3070_v0 = vrot.slane %v3009_v50, %v6768_v60 }
 0x9b6   : > { %v3074_v12 = vrot.slane %v3012_v57, %v6768_v60 }
 0x9b7   : > { %7711 = vst [vmem:[#allocation27_spill] sm:$0xff] %v7134_v45  ;;  %3807 = vrot.lane.b32.xlu0 %v3769_v51, %s5488_s20  ;;  %v3091_v51 = vsel %vm2229_vm3, %v3062_v36, %v3090_v6  ;;  %v7713_v45 = vld [vmem:[#allocation60_spill] sm:$0xff] }
 0x9b8   : > { %v3886_v14 = vpop.permute.xlu0 %3885  ;;  %v3092_v50 = vsel %vm2231_vm4, %v3066_v19, %v3091_v51  ;;  %v3773_v30 = vmul.f32 %v7713_v45, %v7150_v31  ;;  %v7173_v51 = vpop.eup %5111 }
 0x9b9   : > { %v3015_v4 = vpop.permute.xlu1 %3014  ;;  %v7146_v46 = vmul.f32 %v5104_v27, %v3886_v14  ;;  %v3093_v39 = vsel %vm2233_vm5, %v3070_v0, %v3092_v50  ;;  %v7716_v50 = vld [vmem:[#allocation57_spill] sm:$0xff] }
 0x9ba   : > { %v3078_v25 = vrot.slane %v3015_v4, %v6768_v60  ;;  %v3094_v57 = vsel %vm2235_vm6, %v3074_v12, %v3093_v39  ;;  %v7715_v39 = vld [vmem:[#allocation64_spill] sm:$0xff] }
 0x9bb   : > { %7712 = vst [vmem:[#allocation65_spill] sm:$0xff] %v7146_v46  ;;  %3811 = vrot.lane.b32.xlu0 %v3771_v52, %s5488_s20  ;;  %v7714_v52 = vld [vmem:[#allocation62_spill] sm:$0xff] }
 0x9bc   : > { %v3890_v14 = vpop.permute.xlu0 %3889  ;;  %v3095_v36 = vsel %vm2237_vm7, %v3078_v25, %v3094_v57  ;;  %v3775_v6 = vmul.f32 %v7714_v52, %v7163_v63 }
 0x9bd   : > { %v3018_v46 = vpop.permute.xlu1 %3017  ;;  %v7159_v62 = vmul.f32 %v5108_v22, %v3890_v14  ;;  %v3770_v14 = vmul.f32 %v7716_v50, %v7125_v1  ;;  %v3908_v1 = vmul.f32 %v7070_v55, %v7118_v43 }
 0x9be   : > { %v3082_v4 = vrot.slane %v3018_v46, %v6768_v60  ;;  %v3777_v46 = vmul.f32 %v7715_v39, %v7173_v51 }
 0x9bf   : > { %3815 = vrot.lane.b32.xlu0 %v3773_v30, %s5488_s20  ;;  %v7717_v30 = vld [vmem:[#allocation58_spill] sm:$0xff] }
 0x9c0   : > { %v3096_v19 = vsel %vm2239_vm8, %v3082_v4, %v3095_v36  ;;  %v3772_v57 = vmul.f32 %v7717_v30, %v5096_v42  ;;  %v7718_v4 = vld [vmem:[#allocation59_spill] sm:$0xff]  ;;  %v3910_v42 = vmul.f32 %v7076_v15, %v7121_v56 }
 0x9c1   : > { %v3102_v0 = vsel %vm2818_vm10, %v3096_v19, 0.0  ;;  %v3860_v45 = vpop.permute.xlu1 %3859  ;;  %v3774_v36 = vmul.f32 %v7718_v4, %v5100_v58 }
 0x9c2   : > { %3103 = vadd.xlane.f32.xlu1 %v3102_v0  ;;  %v3907_v60 = vmul.f32 %v7063_v32, %v3860_v45  ;;  %v7719_v32 = vld [vmem:[#allocation61_spill] sm:$0xff] }
 0x9c3   : > { %3819 = vrot.lane.b32.xlu0 %v3775_v6, %s5488_s20  ;;  %v3776_v19 = vmul.f32 %v7719_v32, %v5104_v27 }
 0x9c5   : > { %v3864_v12 = vpop.permute.xlu1 %3863 }
 0x9c6   : > { %v3909_v25 = vmul.f32 %v7067_v26, %v3864_v12  ;;  %v7720_v26 = vld [vmem:[#allocation63_spill] sm:$0xff] }
 0x9c7   : > { %3823 = vrot.lane.b32.xlu0 %v3777_v46, %s5488_s20  ;;  %v3778_v0 = vmul.f32 %v7720_v26, %v5108_v22 }
 0x9c9   : > { %v7200_v58 = vpop.permute.xlu1 %3867 }
 0x9cb   : > { %3939 = vrot.lane.b32.xlu0 %v3907_v60, %s5488_s20 }
 0x9cd   : > { %v7204_v27 = vpop.permute.xlu1 %3871 }
 0x9cf   : > { %3943 = vrot.lane.b32.xlu0 %v3909_v25, %s5488_s20 }
 0x9d1   : > { %v7208_v22 = vpop.permute.xlu1 %3875 }
 0x9d3   : > { %3809 = vrot.lane.b32.xlu1 %v3770_v14, %s5488_s20 }
 0x9d5   : > { %v7212_v43 = vpop.permute.xlu1 %3879 }
 0x9d7   : > { %3813 = vrot.lane.b32.xlu1 %v3772_v57, %s5488_s20 }
 0x9d9   : > { %v7218_v60 = vpop.permute.xlu1 %3883 }
 0x9db   : > { %3817 = vrot.lane.b32.xlu1 %v3774_v36, %s5488_s20 }
 0x9dd   : > { %v7221_v25 = vpop.permute.xlu1 %3887 }
 0x9df   : > { %3821 = vrot.lane.b32.xlu1 %v3776_v19, %s5488_s20 }
 0x9e3   : > { %3825 = vrot.lane.b32.xlu1 %v3778_v0, %s5488_s20 }
 0x9e4   : > { %v7202_v52 = vpop.permute.xlu0 %3795 }
 0x9e7   : > { %3941 = vrot.lane.b32.xlu1 %v3908_v1, %s5488_s20 }
 0x9e8   : > { %v7206_v6 = vpop.permute.xlu0 %3799  ;;  %v7224_v57 = vpop.permute.xlu1 %3797 }
 0x9eb   : > { %3945 = vrot.lane.b32.xlu1 %v3910_v42, %s5488_s20  ;;  %v3912_v42 = vmul.f32 %v7088_v23, %v7123_v40 }
 0x9ec   : > { %v7210_v45 = vpop.permute.xlu0 %3803 }
 0xa2a   : > { %v3101_v55 = vpop.xlane.xlu0 %3100 }
 0xa2b   : > { %v3110_v39 = vrot.slane %v3101_v55, %v7683_v17  ;;  %v3114_v15 = vrot.slane %v3101_v55, %v7709_v54  ;;  %v3118_v56 = vrot.slane %v3101_v55, %v6920_v9  ;;  %v3122_v46 = vrot.slane %v3101_v55, %v6929_v29 }
 0xa2c   : > { %v3126_v12 = vrot.slane %v3101_v55, %v6923_v3  ;;  %v3130_v50 = vrot.slane %v3101_v55, %v6926_v59  ;;  %v3134_v4 = vrot.slane %v3101_v55, %v6936_v34  ;;  %v3138_v26 = vrot.slane %v3101_v55, %v6945_v48 }
 0xa2d   : > { %5113 = vrcp.f32 %v3110_v39  ;;  %v7233_v39 = vpop.permute.xlu1 %3801 }
 0xa2e   : > { %5115 = vrcp.f32 %v3114_v15 }
 0xa2f   : > { %5117 = vrcp.f32 %v3118_v56 }
 0xa30   : > { %5119 = vrcp.f32 %v3122_v46 }
 0xa31   : > { %5121 = vrcp.f32 %v3126_v12  ;;  %v7237_v15 = vpop.permute.xlu1 %3805 }
 0xa32   : > { %5123 = vrcp.f32 %v3130_v50 }
 0xa33   : > { %5125 = vrcp.f32 %v3134_v4 }
 0xa34   : > { %5127 = vrcp.f32 %v3138_v26 }
 0xa3a   : > { %v5114_v14 = vpop.eup %5113 }
 0xa3b   : > { %v5116_v30 = vpop.eup %5115  ;;  %v3188_v36 = vmul.f32 %v5114_v14, %v6953_v5 }
 0xa3c   : > { %v5118_v32 = vpop.eup %5117  ;;  %v3190_v19 = vmul.f32 %v5116_v30, %v6955_v28 }
 0xa3d   : > { %3221 = vperm.xlu0 %4877, %v3188_v36   ;;  %v3192_v0 = vmul.f32 %v5118_v32, %v6966_v37  ;;  %v5120_v1 = vpop.eup %5119 }
 0xa3e   : > { %3226 = vperm.xlu1 %4878, %v3190_v19   ;;  %v3194_v5 = vmul.f32 %v5120_v1, %v6974_v21  ;;  %v5122_v28 = vpop.eup %5121 }
 0xa3f   : > { %v3196_v55 = vmul.f32 %v5122_v28, %v6961_v38  ;;  %v5124_v56 = vpop.eup %5123 }
 0xa40   : > { %v3198_v46 = vmul.f32 %v5124_v56, %v6970_v61  ;;  %v5126_v23 = vpop.eup %5125  ;;  %v7247_v61 = vpop.permute.xlu0 %3807 }
 0xa41   : > { %3231 = vperm.xlu0 %4877, %v3192_v0   ;;  %v3200_v21 = vmul.f32 %v5126_v23, %v6978_v49  ;;  %v5128_v14 = vpop.eup %5127 }
 0xa42   : > { %3949 = vrot.lane.b32.xlu1 %v3912_v42, %s5488_s20  ;;  %v3202_v30 = vmul.f32 %v5128_v14, %v6983_v2 }
 0xa44   : > { %v7251_v4 = vpop.permute.xlu0 %3811 }
 0xa45   : > { %3236 = vperm.xlu0 %4877, %v3194_v5  }
 0xa48   : > { %v7258_v19 = vpop.permute.xlu0 %3815 }
 0xa49   : > { %3241 = vperm.xlu0 %4877, %v3196_v55  }
 0xa4b   : > { %v3104_v37 = vpop.xlane.xlu1 %3103 }
 0xa4c   : > { %v3142_v40 = vrot.slane %v3104_v37, %v7683_v17  ;;  %v3146_v12 = vrot.slane %v3104_v37, %v7709_v54  ;;  %v3150_v50 = vrot.slane %v3104_v37, %v6920_v9  ;;  %v3154_v38 = vrot.slane %v3104_v37, %v6929_v29 }
 0xa4d   : > { %3246 = vperm.xlu0 %4877, %v3198_v46   ;;  %v3158_v17 = vrot.slane %v3104_v37, %v6923_v3  ;;  %v3162_v9 = vrot.slane %v3104_v37, %v6926_v59  ;;  %v3166_v29 = vrot.slane %v3104_v37, %v6936_v34  ;;  %v3911_v3 = vmul.f32 %v7080_v8, %v7200_v58  ;;  %v7267_v8 = vpop.permute.xlu0 %3819  ;;  %v7724_v46 = vld [vmem:[#allocation39_spill] sm:$0xff] }
 0xa4e   : > { %5129 = vrcp.f32 %v3142_v40  ;;  %v3170_v59 = vrot.slane %v3104_v37, %v6945_v48  ;;  %v3913_v34 = vmul.f32 %v7132_v7, %v7204_v27  ;;  %v3915_v48 = vmul.f32 %v7138_v41, %v7208_v22 }
 0xa4f   : > { %5131 = vrcp.f32 %v3146_v12  ;;  %v7272_v1 = vpop.permute.xlu1 %3809 }
 0xa50   : > { %5133 = vrcp.f32 %v3150_v50  ;;  %v7725_v50 = vld [vmem:[#allocation43_spill] sm:$0xff] }
 0xa51   : > { %3251 = vperm.xlu0 %4877, %v3200_v21   ;;  %5135 = vrcp.f32 %v3154_v38  ;;  %v7277_v7 = vpop.permute.xlu0 %3823  ;;  %v3848_v21 = vadd.f32 %v7237_v15, %v7725_v50 }
 0xa52   : > { %5137 = vrcp.f32 %v3158_v17 }
 0xa53   : > { %5139 = vrcp.f32 %v3162_v9  ;;  %v7283_v41 = vpop.permute.xlu1 %3813  ;;  %v7726_v9 = vld [vmem:[#allocation37_spill] sm:$0xff] }
 0xa54   : > { %5141 = vrcp.f32 %v3166_v29 }
 0xa55   : > { %3256 = vperm.xlu0 %4877, %v3202_v30   ;;  %5143 = vrcp.f32 %v3170_v59  ;;  %v3940_v28 = vpop.permute.xlu0 %3939 }
 0xa57   : > { %v7292_v55 = vpop.permute.xlu1 %3817 }
 0xa5b   : > { %v5130_v54 = vpop.eup %5129 }
 0xa5c   : > { %v5132_v49 = vpop.eup %5131  ;;  %v3204_v36 = vmul.f32 %v5130_v54, %v6990_v13  ;;  %v7727_v54 = vld [vmem:[#allocation28_spill] sm:$0xff] }
 0xa5d   : > { %v3206_v2 = vmul.f32 %v5132_v49, %v6997_v44  ;;  %v5134_v32 = vpop.eup %5133 }
 0xa5e   : > { %3261 = vperm.xlu0 %4877, %v3204_v36   ;;  %v3208_v26 = vmul.f32 %v5134_v32, %v7003_v11  ;;  %v5136_v0 = vpop.eup %5135 }
 0xa5f   : > { %3266 = vperm.xlu1 %4878, %v3206_v2   ;;  %v3210_v13 = vmul.f32 %v5136_v0, %v7008_v20  ;;  %v5138_v44 = vpop.eup %5137  ;;  %v3917_v20 = vmul.f32 %v7150_v31, %v7212_v43  ;;  %v3921_v31 = vmul.f32 %v7173_v51, %v7221_v25  ;;  %v3843_v43 = vadd.f32 %v7202_v52, %v6533_v53  ;;  %v7721_v52 = vld [vmem:[#allocation27_spill] sm:$0xff]  ;;  %v7723_v25 = vld [vmem:[#allocation40_spill] sm:$0xff]  ;;  %v7728_v2 = vld [vmem:[#allocation38_spill] sm:$0xff] }
 0xa60   : > { %v3212_v11 = vmul.f32 %v5138_v44, %v7013_v10  ;;  %v5140_v58 = vpop.eup %5139  ;;  %v3919_v10 = vmul.f32 %v7163_v63, %v7218_v60  ;;  %v3845_v60 = vadd.f32 %v7206_v6, %v6525_v47  ;;  %v7722_v47 = vld [vmem:[#allocation65_spill] sm:$0xff] }
 0xa61   : > { %v3214_v27 = vmul.f32 %v5140_v58, %v7018_v33  ;;  %v5142_v42 = vpop.eup %5141  ;;  %v3987_v63 = vsub.f32 %v3843_v43, %v3940_v28  ;;  %v7731_v58 = vld [vmem:[#allocation50_spill] sm:$0xff] }
 0xa62   : > { %3947 = vrot.lane.b32.xlu0 %v3911_v3, %s5488_s20  ;;  %v3216_v22 = vmul.f32 %v5142_v42, %v7023_v35  ;;  %v5144_v5 = vpop.eup %5143  ;;  %v3944_v35 = vpop.permute.xlu0 %3943  ;;  %v7729_v3 = vld [vmem:[#allocation26_spill] sm:$0xff]  ;;  %v7732_v42 = vld [vmem:[#allocation45_spill] sm:$0xff] }
 0xa63   : > { %3271 = vperm.xlu1 %4878, %v3208_v26   ;;  %v3218_v33 = vmul.f32 %v5144_v5, %v7028_v18  ;;  %v3989_v51 = vsub.f32 %v3845_v60, %v3944_v35  ;;  %v7300_v18 = vpop.permute.xlu1 %3821 }
 0xa66   : > { %3951 = vrot.lane.b32.xlu0 %v3913_v34, %s5488_s20 }
 0xa67   : > { %3276 = vperm.xlu1 %4878, %v3210_v13   ;;  %v7305_v53 = vpop.permute.xlu1 %3825  ;;  %v7730_v13 = vld [vmem:[#allocation46_spill] sm:$0xff] }
 0xa6a   : > { %3955 = vrot.lane.b32.xlu0 %v3915_v48, %s5488_s20 }
 0xa6b   : > { %3281 = vperm.xlu1 %4878, %v3212_v11   ;;  %v3942_v6 = vpop.permute.xlu1 %3941 }
 0xa6e   : > { %3959 = vrot.lane.b32.xlu0 %v3917_v20, %s5488_s20 }
 0xa6f   : > { %3286 = vperm.xlu1 %4878, %v3214_v27   ;;  %v3946_v37 = vpop.permute.xlu1 %3945 }
 0xa72   : > { %3963 = vrot.lane.b32.xlu0 %v3919_v10, %s5488_s20 }
 0xa73   : > { %3291 = vperm.xlu1 %4878, %v3216_v22  }
 0xa76   : > { %3967 = vrot.lane.b32.xlu0 %v3921_v31, %s5488_s20 }
 0xa77   : > { %3296 = vperm.xlu1 %4878, %v3218_v33   ;;  %v7733_v33 = vld [vmem:[#allocation47_spill] sm:$0xff] }
 0xa7a   : > { %4019 = vrot.lane.b32.xlu0 %v3987_v63, %s5488_s20 }
 0xa7b   : > { %3953 = vrot.lane.b32.xlu1 %v7128_v16, %s5488_s20  ;;  %v3844_v16 = vadd.f32 %v7224_v57, %v7723_v25 }
 0xa7d   : > { %v3988_v56 = vsub.f32 %v3844_v16, %v3942_v6 }
 0xa7e   : > { %4023 = vrot.lane.b32.xlu0 %v3989_v51, %s5488_s20 }
 0xa7f   : > { %3957 = vrot.lane.b32.xlu1 %v7130_v24, %s5488_s20  ;;  %v3846_v24 = vadd.f32 %v7233_v39, %v7724_v46 }
 0xa81   : > { %v3990_v23 = vsub.f32 %v3846_v24, %v3946_v37 }
 0xa83   : > { %3961 = vrot.lane.b32.xlu1 %v7721_v52, %s5488_s20 }
 0xa87   : > { %3965 = vrot.lane.b32.xlu1 %v7722_v47, %s5488_s20  ;;  %v7734_v47 = vld [vmem:[#allocation31_spill] sm:$0xff] }
 0xa88   : > { %v3847_v6 = vadd.f32 %v7210_v45, %v7734_v47 }
 0xa8b   : > { %3969 = vrot.lane.b32.xlu1 %v7159_v62, %s5488_s20 }
 0xa8f   : > { %4021 = vrot.lane.b32.xlu1 %v3988_v56, %s5488_s20 }
 0xa93   : > { %4025 = vrot.lane.b32.xlu1 %v3990_v23, %s5488_s20 }
 0xab8   : > { %v3222_v40 = vpop.permute.xlu0 %3221 }
 0xab9   : > { %v3227_v12 = vpop.permute.xlu1 %3226  ;;  %v3299_v39 = vmul.f32 %v3222_v40, %v7726_v9 }
 0xaba   : > { %v3300_v49 = vmul.f32 %v3227_v12, %v7727_v54 }
 0xabb   : > { %v3316_v29 = vsel %vm3315_vm11, %v3299_v39, 0.0 }
 0xabc   : > { %v3232_v14 = vpop.permute.xlu0 %3231  ;;  %v3323_v15 = vsel %vm3315_vm11, %v3300_v49, 0.0  ;;  %v3317_v26 = vrot.slane %v3316_v29, 4 }
 0xabd   : > { %v3950_v57 = vpop.permute.xlu1 %3949  ;;  %v3301_v32 = vmul.f32 %v3232_v14, %v7728_v2  ;;  %v3324_v0 = vrot.slane %v3323_v15, 4  ;;  %v7735_v14 = vld [vmem:[#allocation41_spill] sm:$0xff]  ;;  %v7736_v2 = vld [vmem:[#allocation30_spill] sm:$0xff] }
 0xabe   : > { %v3992_v38 = vsub.f32 %v3848_v21, %v3950_v57  ;;  %v3318_v27 = vadd.f32 %v3317_v26, %v3316_v29  ;;  %v3849_v57 = vadd.f32 %v7247_v61, %v7735_v14 }
 0xabf   : > { %v3330_v34 = vsel %vm3315_vm11, %v3301_v32, 0.0  ;;  %v3325_v5 = vadd.f32 %v3324_v0, %v3323_v15  ;;  %v3851_v32 = vadd.f32 %v7251_v4, %v7736_v2  ;;  %v7746_v2 = vld [vmem:[#allocation53_spill] sm:$0xff] }
 0xac0   : > { %4029 = vrot.lane.b32.xlu1 %v3992_v38, %s5488_s20  ;;  %v3237_v62 = vpop.permute.xlu0 %3236  ;;  %v3331_v22 = vrot.slane %v3330_v34, 4  ;;  %v3319_v51 = vrot.slane %v3318_v27, 2 }
 0xac1   : > { %v3302_v59 = vmul.f32 %v3237_v62, %v7729_v3  ;;  %v3326_v56 = vrot.slane %v3325_v5, 2 }
 0xac2   : > { %v3332_v25 = vadd.f32 %v3331_v22, %v3330_v34  ;;  %v3320_v21 = vadd.f32 %v3319_v51, %v3318_v27  ;;  %v7738_v27 = vld [vmem:[#allocation52_spill] sm:$0xff] }
 0xac3   : > { %v3337_v11 = vsel %vm3315_vm11, %v3302_v59, 0.0  ;;  %v3327_v45 = vadd.f32 %v3326_v56, %v3325_v5  ;;  %v7744_v56 = vld [vmem:[#allocation54_spill] sm:$0xff] }
 0xac4   : > { %v3242_v30 = vpop.permute.xlu0 %3241  ;;  %v3338_v28 = vrot.slane %v3337_v11, 4  ;;  %v3333_v38 = vrot.slane %v3332_v25, 2  ;;  %v3321_v29 = vrot.slane %v3320_v21, 1 }
 0xac5   : > { %v3303_v44 = vmul.f32 %v3242_v30, %v7730_v13  ;;  %v3328_v61 = vrot.slane %v3327_v45, 1 }
 0xac6   : > { %v3339_v37 = vadd.f32 %v3338_v28, %v3337_v11  ;;  %v3334_v15 = vadd.f32 %v3333_v38, %v3332_v25  ;;  %v7737_v11 = vld [vmem:[#allocation32_spill] sm:$0xff]  ;;  %v7742_v25 = vld [vmem:[#allocation33_spill] sm:$0xff] }
 0xac7   : > { %v3344_v31 = vsel %vm3315_vm11, %v3303_v44, 0.0 }
 0xac8   : > { %v3247_v17 = vpop.permute.xlu0 %3246  ;;  %v3345_v16 = vrot.slane %v3344_v31, 4  ;;  %v3335_v22 = vrot.slane %v3334_v15, 1 }
 0xac9   : > { %v3304_v20 = vmul.f32 %v3247_v17, %v7731_v58  ;;  %v3340_v17 = vrot.slane %v3339_v37, 2  ;;  %v3853_v58 = vadd.f32 %v7258_v19, %v7737_v11  ;;  %v3855_v19 = vadd.f32 %v7267_v8, %v7742_v25 }
 0xaca   : > { %v3346_v62 = vadd.f32 %v3345_v16, %v3344_v31  ;;  %v7740_v31 = vld [vmem:[#allocation48_spill] sm:$0xff]  ;;  %v7743_v16 = vld [vmem:[#allocation34_spill] sm:$0xff] }
 0xacb   : > { %v3351_v35 = vsel %vm3315_vm11, %v3304_v20, 0.0  ;;  %v3341_v26 = vadd.f32 %v3340_v17, %v3339_v37  ;;  %v3322_v20 = vadd.f32 %v3321_v29, %v3320_v21  ;;  %v3336_v21 = vadd.f32 %v3335_v22, %v3334_v15  ;;  %v7747_v22 = vld [vmem:[#allocation55_spill] sm:$0xff] }
 0xacc   : > { %v3252_v36 = vpop.permute.xlu0 %3251  ;;  %v3352_v46 = vrot.slane %v3351_v35, 4  ;;  %v3347_v3 = vrot.slane %v3346_v62, 2 }
 0xacd   : > { %v3305_v10 = vmul.f32 %v3252_v36, %v7732_v42 }
 0xace   : > { %v3353_v9 = vadd.f32 %v3352_v46, %v3351_v35  ;;  %v3348_v5 = vadd.f32 %v3347_v3, %v3346_v62  ;;  %v3342_v35 = vrot.slane %v3341_v26, 1 }
 0xacf   : > { %v3358_v52 = vsel %vm3315_vm11, %v3305_v10, 0.0  ;;  %v7739_v10 = vld [vmem:[#allocation49_spill] sm:$0xff] }
 0xad0   : > { %v3257_v48 = vpop.permute.xlu0 %3256  ;;  %v3359_v40 = vrot.slane %v3358_v52, 4  ;;  %v3354_v0 = vrot.slane %v3353_v9, 2  ;;  %v3349_v14 = vrot.slane %v3348_v5, 1  ;;  %v3343_v62 = vadd.f32 %v3342_v35, %v3341_v26  ;;  %v7748_v35 = vld [vmem:[#allocation42_spill] sm:$0xff] }
 0xad1   : > { %v3306_v43 = vmul.f32 %v3257_v48, %v7733_v33 }
 0xad2   : > { %v3360_v54 = vadd.f32 %v3359_v40, %v3358_v52  ;;  %v3355_v51 = vadd.f32 %v3354_v0, %v3353_v9  ;;  %v7741_v52 = vld [vmem:[#allocation51_spill] sm:$0xff]  ;;  %v7745_v40 = vld [vmem:[#allocation56_spill] sm:$0xff] }
 0xad3   : > { %v3365_v24 = vsel %vm3315_vm11, %v3306_v43, 0.0  ;;  %v3329_v43 = vadd.f32 %v3328_v61, %v3327_v45 }
 0xad4   : > { %v3366_v30 = vrot.slane %v3365_v24, 4  ;;  %v3361_v13 = vrot.slane %v3360_v54, 2 }
 0xad5   : > { %v4099_v8 = vsel %vm2227_vm2, %v3329_v43, %v3322_v20 }
 0xad6   : > { %v3367_v59 = vadd.f32 %v3366_v30, %v3365_v24  ;;  %v4100_v3 = vsel %vm2229_vm3, %v3336_v21, %v4099_v8 }
 0xad7   : > { %v4101_v0 = vsel %vm2231_vm4, %v3343_v62, %v4100_v3 }
 0xad8   : > { %v3368_v28 = vrot.slane %v3367_v59, 2 }
 0xad9   : > { %v3262_v63 = vpop.permute.xlu0 %3261 }
 0xada   : > { %v3267_v60 = vpop.permute.xlu1 %3266  ;;  %v3307_v4 = vmul.f32 %v3262_v63, %v7739_v10  ;;  %v3362_v63 = vadd.f32 %v3361_v13, %v3360_v54 }
 0xadb   : > { %v3308_v42 = vmul.f32 %v3267_v60, %v7738_v27  ;;  %v3857_v60 = vadd.f32 %v7277_v7, %v7743_v16  ;;  %v3356_v7 = vrot.slane %v3355_v51, 1 }
 0xadc   : > { %v3363_v17 = vrot.slane %v3362_v63, 1 }
 0xadd   : > { %v3948_v23 = vpop.permute.xlu0 %3947  ;;  %v3379_v24 = vsel %vm3315_vm11, %v3308_v42, 0.0 }
 0xade   : > { %v3272_v12 = vpop.permute.xlu1 %3271  ;;  %v3991_v50 = vsub.f32 %v3847_v6, %v3948_v23  ;;  %v3372_v23 = vsel %vm3315_vm11, %v3307_v4, 0.0  ;;  %v3380_v9 = vrot.slane %v3379_v24, 4  ;;  %v3364_v11 = vadd.f32 %v3363_v17, %v3362_v63 }
 0xadf   : > { %v3309_v33 = vmul.f32 %v3272_v12, %v7740_v31 }
 0xae0   : > { %4027 = vrot.lane.b32.xlu0 %v3991_v50, %s5488_s20 }
 0xae1   : > { %v3952_v39 = vpop.permute.xlu0 %3951  ;;  %v3386_v38 = vsel %vm3315_vm11, %v3309_v33, 0.0 }
 0xae2   : > { %v3277_v49 = vpop.permute.xlu1 %3276  ;;  %v3993_v36 = vsub.f32 %v3849_v57, %v3952_v39  ;;  %v3369_v57 = vadd.f32 %v3368_v28, %v3367_v59  ;;  %v3373_v39 = vrot.slane %v3372_v23, 4  ;;  %v3350_v59 = vadd.f32 %v3349_v14, %v3348_v5 }
 0xae3   : > { %v3310_v47 = vmul.f32 %v3277_v49, %v7741_v52 }
 0xae4   : > { %4031 = vrot.lane.b32.xlu0 %v3993_v36, %s5488_s20  ;;  %v3387_v36 = vrot.slane %v3386_v38, 4  ;;  %v3370_v61 = vrot.slane %v3369_v57, 1  ;;  %v3374_v20 = vadd.f32 %v3373_v39, %v3372_v23  ;;  %v4102_v43 = vsel %vm2233_vm5, %v3350_v59, %v4101_v0  ;;  %v7751_v0 = vld [vmem:[#allocation35_spill] sm:$0xff] }
 0xae5   : > { %v3956_v34 = vpop.permute.xlu0 %3955  ;;  %v3393_v30 = vsel %vm3315_vm11, %v3310_v47, 0.0 }
 0xae6   : > { %v3282_v44 = vpop.permute.xlu1 %3281  ;;  %v3995_v48 = vsub.f32 %v3851_v32, %v3956_v34  ;;  %v3394_v26 = vrot.slane %v3393_v30, 4  ;;  %v3357_v34 = vadd.f32 %v3356_v7, %v3355_v51  ;;  %v3388_v10 = vadd.f32 %v3387_v36, %v3386_v38 }
 0xae7   : > { %v3311_v37 = vmul.f32 %v3282_v44, %v7744_v56  ;;  %v3371_v31 = vadd.f32 %v3370_v61, %v3369_v57  ;;  %v3850_v51 = vadd.f32 %v7272_v1, %v7748_v35  ;;  %v3375_v16 = vrot.slane %v3374_v20, 2 }
 0xae8   : > { %4035 = vrot.lane.b32.xlu0 %v3995_v48, %s5488_s20  ;;  %v3395_v33 = vadd.f32 %v3394_v26, %v3393_v30  ;;  %v4103_v25 = vsel %vm2235_vm6, %v3357_v34, %v4102_v43  ;;  %v3856_v34 = vadd.f32 %v7300_v18, %v7751_v0 }
 0xae9   : > { %v3960_v6 = vpop.permute.xlu0 %3959  ;;  %v3400_v54 = vsel %vm3315_vm11, %v3311_v37, 0.0  ;;  %v3389_v37 = vrot.slane %v3388_v10, 2  ;;  %v3376_v8 = vadd.f32 %v3375_v16, %v3374_v20 }
 0xaea   : > { %v3287_v46 = vpop.permute.xlu1 %3286  ;;  %v3997_v50 = vsub.f32 %v3853_v58, %v3960_v6  ;;  %v3401_v13 = vrot.slane %v3400_v54, 4  ;;  %v3381_v58 = vadd.f32 %v3380_v9, %v3379_v24  ;;  %v4104_v24 = vsel %vm2237_vm7, %v3364_v11, %v4103_v25 }
 0xaeb   : > { %v3312_v12 = vmul.f32 %v3287_v46, %v7745_v40  ;;  %v3396_v23 = vrot.slane %v3395_v33, 2  ;;  %v3390_v30 = vadd.f32 %v3389_v37, %v3388_v10 }
 0xaec   : > { %4039 = vrot.lane.b32.xlu0 %v3997_v50, %s5488_s20  ;;  %v3402_v52 = vadd.f32 %v3401_v13, %v3400_v54  ;;  %v7749_v50 = vld [vmem:[#allocation44_spill] sm:$0xff]  ;;  %v7750_v54 = vld [vmem:[#allocation29_spill] sm:$0xff] }
 0xaed   : > { %v3964_v45 = vpop.permute.xlu0 %3963  ;;  %v3407_v29 = vsel %vm3315_vm11, %v3312_v12, 0.0  ;;  %v4105_v12 = vsel %vm2239_vm8, %v3371_v31, %v4104_v24  ;;  %v3852_v21 = vadd.f32 %v7283_v41, %v7749_v50  ;;  %v3397_v9 = vadd.f32 %v3396_v23, %v3395_v33 }
 0xaee   : > { %v3292_v49 = vpop.permute.xlu1 %3291  ;;  %v3999_v15 = vsub.f32 %v3855_v19, %v3964_v45  ;;  %v3408_v27 = vrot.slane %v3407_v29, 4  ;;  %v3382_v19 = vrot.slane %v3381_v58, 2  ;;  %v3403_v14 = vrot.slane %v3402_v52, 2 }
 0xaef   : > { %v3313_v32 = vmul.f32 %v3292_v49, %v7746_v2  ;;  %v3854_v41 = vadd.f32 %v7292_v55, %v7750_v54  ;;  %v3398_v61 = vrot.slane %v3397_v9, 1 }
 0xaf0   : > { %4043 = vrot.lane.b32.xlu0 %v3999_v15, %s5488_s20  ;;  %v3409_v63 = vadd.f32 %v3408_v27, %v3407_v29  ;;  %v3383_v38 = vadd.f32 %v3382_v19, %v3381_v58  ;;  %v3404_v49 = vadd.f32 %v3403_v14, %v3402_v52  ;;  %v3377_v29 = vrot.slane %v3376_v8, 1 }
 0xaf1   : > { %v3414_v44 = vsel %vm3315_vm11, %v3313_v32, 0.0  ;;  %v3968_v48 = vpop.permute.xlu0 %3967  ;;  %v3391_v15 = vrot.slane %v3390_v30, 1 }
 0xaf2   : > { %v3297_v42 = vpop.permute.xlu1 %3296  ;;  %v3415_v4 = vrot.slane %v3414_v44, 4  ;;  %v4001_v28 = vsub.f32 %v3857_v60, %v3968_v48  ;;  %v3410_v62 = vrot.slane %v3409_v63, 2  ;;  %v3384_v36 = vrot.slane %v3383_v38, 1 }
 0xaf3   : > { %v3314_v5 = vmul.f32 %v3297_v42, %v7747_v22  ;;  %v3405_v13 = vrot.slane %v3404_v49, 1  ;;  %v3378_v55 = vadd.f32 %v3377_v29, %v3376_v8  ;;  %v3392_v58 = vadd.f32 %v3391_v15, %v3390_v30 }
 0xaf4   : > { %4047 = vrot.lane.b32.xlu0 %v4001_v28, %s5488_s20  ;;  %v3416_v1 = vadd.f32 %v3415_v4, %v3414_v44  ;;  %v3411_v2 = vadd.f32 %v3410_v62, %v3409_v63  ;;  %v3385_v44 = vadd.f32 %v3384_v36, %v3383_v38  ;;  %v3399_v42 = vadd.f32 %v3398_v61, %v3397_v9  ;;  %v7752_v4 = vld [vmem:[#allocation36_spill] sm:$0xff] }
 0xaf5   : > { %v3421_v47 = vsel %vm3315_vm11, %v3314_v5, 0.0  ;;  %v4020_v6 = vpop.permute.xlu0 %4019  ;;  %v3858_v22 = vadd.f32 %v7305_v53, %v7752_v4  ;;  %v3406_v5 = vadd.f32 %v3405_v13, %v3404_v49 }
 0xaf6   : > { %v3422_v56 = vrot.slane %v3421_v47, 4  ;;  %v3954_v60 = vpop.permute.xlu1 %3953  ;;  %4067 = vst.msk [vmem:[%s7380_s8] sm:$0xff] %vm673_vm0, %v4020_v6  ;;  %v3417_v45 = vrot.slane %v3416_v1, 2  ;;  %v3412_v48 = vrot.slane %v3411_v2, 1  ;;  %v4106_v18 = vsel %vm2227_vm2, %v3385_v44, %v3378_v55 }
 0xaf7   : > { %v3994_v46 = vsub.f32 %v3850_v51, %v3954_v60  ;;  %v4107_v33 = vsel %vm2229_vm3, %v3392_v58, %v4106_v18 }
 0xaf8   : > { %v3423_v40 = vadd.f32 %v3422_v56, %v3421_v47  ;;  %4113 = vrot.lane.b32.xlu0 %v4105_v12, %s5491_s14  ;;  %v3418_v3 = vadd.f32 %v3417_v45, %v3416_v1  ;;  %v3413_v28 = vadd.f32 %v3412_v48, %v3411_v2  ;;  %v4108_v51 = vsel %vm2231_vm4, %v3399_v42, %v4107_v33 }
 0xaf9   : > { %4033 = vrot.lane.b32.xlu1 %v3994_v46, %s5488_s20  ;;  %v4024_v57 = vpop.permute.xlu0 %4023  ;;  %v4109_v53 = vsel %vm2233_vm5, %v3406_v5, %v4108_v51 }
 0xafa   : > { %v3958_v7 = vpop.permute.xlu1 %3957  ;;  %4069 = vst.msk [vmem:[%s7380_s8 + $0x10] sm:$0xff] %vm673_vm0, %v4024_v57  ;;  %v3424_v39 = vrot.slane %v3423_v40, 2  ;;  %v3419_v20 = vrot.slane %v3418_v3, 1  ;;  %v4110_v6 = vsel %vm2235_vm6, %v3413_v28, %v4109_v53 }
 0xafb   : > { %v3996_v17 = vsub.f32 %v3852_v21, %v3958_v7 }
 0xafc   : > { %v3425_v26 = vadd.f32 %v3424_v39, %v3423_v40  ;;  %v3420_v43 = vadd.f32 %v3419_v20, %v3418_v3 }
 0xafd   : > { %4037 = vrot.lane.b32.xlu1 %v3996_v17, %s5488_s20 }
 0xafe   : > { %v3962_v32 = vpop.permute.xlu1 %3961  ;;  %v3426_v10 = vrot.slane %v3425_v26, 1  ;;  %v4111_v25 = vsel %vm2237_vm7, %v3420_v43, %v4110_v6 }
 0xaff   : > { %v3998_v59 = vsub.f32 %v3854_v41, %v3962_v32 }
 0xb00   : > { %v3427_v52 = vadd.f32 %v3426_v10, %v3425_v26 }
 0xb01   : > { %4041 = vrot.lane.b32.xlu1 %v3998_v59, %s5488_s20 }
 0xb02   : > { %v3966_v11 = vpop.permute.xlu1 %3965  ;;  %v4112_v19 = vsel %vm2239_vm8, %v3427_v52, %v4111_v25 }
 0xb03   : > { %v4000_v27 = vsub.f32 %v3856_v34, %v3966_v11 }
 0xb05   : > { %4045 = vrot.lane.b32.xlu1 %v4000_v27, %s5488_s20 }
 0xb06   : > { %v3970_v31 = vpop.permute.xlu1 %3969 }
 0xb07   : > { %v4002_v35 = vsub.f32 %v3858_v22, %v3970_v31 }
 0xb09   : > { %4049 = vrot.lane.b32.xlu1 %v4002_v35, %s5488_s20  ;;  %s7431_s20 = scalar_lea.vmem [#allocation15], %s4354_s6 }
 0xb0a   : > { %v4022_v47 = vpop.permute.xlu1 %4021 }
 0xb0b   : > { %4068 = vst.msk [vmem:[%s7380_s8 + $0x8] sm:$0xff] %vm673_vm0, %v4022_v47 }
 0xb0d   : > { %4115 = vrot.lane.b32.xlu1 %v4112_v19, %s5491_s14  ;;  %s4156_s14 = sshll.u32 %s7431_s20, 4  ;;  %s7452_s14 = int_to_ptr.vmem [resolvable:$true] %s4156_s14 }
 0xb0e   : > { %v4026_v16 = vpop.permute.xlu1 %4025 }
 0xb0f   : > { %4070 = vst.msk [vmem:[%s7380_s8 + $0x18] sm:$0xff] %vm673_vm0, %v4026_v16 }
 0xb32   : > { %v4030_v63 = vpop.permute.xlu1 %4029 }
 0xb33   : > { %4072 = vst.msk [vmem:[%s7380_s8 + $0x28] sm:$0xff] %vm673_vm0, %v4030_v63 }
 0xb52   : > { %v4028_v56 = vpop.permute.xlu0 %4027 }
 0xb53   : > { %4071 = vst.msk [vmem:[%s7380_s8 + $0x20] sm:$0xff] %vm673_vm0, %v4028_v56 }
 0xb56   : > { %v4032_v60 = vpop.permute.xlu0 %4031 }
 0xb57   : > { %4073 = vst.msk [vmem:[%s7380_s8 + $0x30] sm:$0xff] %vm673_vm0, %v4032_v60 }
 0xb5a   : > { %v4036_v37 = vpop.permute.xlu0 %4035 }
 0xb5b   : > { %4075 = vst.msk [vmem:[%s7380_s8 + $0x40] sm:$0xff] %vm673_vm0, %v4036_v37 }
 0xb5e   : > { %v4040_v1 = vpop.permute.xlu0 %4039 }
 0xb5f   : > { %4077 = vst.msk [vmem:[%s7380_s8 + $0x50] sm:$0xff] %vm673_vm0, %v4040_v1 }
 0xb62   : > { %v4044_v46 = vpop.permute.xlu0 %4043 }
 0xb63   : > { %4079 = vst.msk [vmem:[%s7380_s8 + $0x60] sm:$0xff] %vm673_vm0, %v4044_v46 }
 0xb66   : > { %v4048_v24 = vpop.permute.xlu0 %4047 }
 0xb67   : > { %4081 = vst.msk [vmem:[%s7380_s8 + $0x70] sm:$0xff] %vm673_vm0, %v4048_v24 }
 0xb6a   : > { %v4114_v40 = vpop.permute.xlu0 %4113 }
 0xb6b   : > { %v4034_v23 = vpop.permute.xlu1 %4033  ;;  %4119 = vst.msk [vmem:[%s7431_s20] sm:$0xff] %vm673_vm0, %v4114_v40 }
 0xb6c   : > { %4074 = vst.msk [vmem:[%s7380_s8 + $0x38] sm:$0xff] %vm673_vm0, %v4034_v23 }
 0xb6f   : > { %v4038_v12 = vpop.permute.xlu1 %4037 }
 0xb70   : > { %4076 = vst.msk [vmem:[%s7380_s8 + $0x48] sm:$0xff] %vm673_vm0, %v4038_v12 }
 0xb73   : > { %v4042_v50 = vpop.permute.xlu1 %4041 }
 0xb74   : > { %4078 = vst.msk [vmem:[%s7380_s8 + $0x58] sm:$0xff] %vm673_vm0, %v4042_v50 }
 0xb77   : > { %v4046_v21 = vpop.permute.xlu1 %4045 }
 0xb78   : > { %4080 = vst.msk [vmem:[%s7380_s8 + $0x68] sm:$0xff] %vm673_vm0, %v4046_v21 }
 0xb7b   : > { %v4050_v14 = vpop.permute.xlu1 %4049 }
 0xb7c   : > { %4082 = vst.msk [vmem:[%s7380_s8 + $0x78] sm:$0xff] %vm673_vm0, %v4050_v14 }
 0xb7d   : > { %5376 = shalt.err (!%p5373_p7)
}
 0xb7e   : > { %s5377_s24 = scalar_lea.hbm %s7447_s0, 2048  ;;  %s5381_s9 = scalar_lea.hbm %s7753_s10, 4096 }
 0xb7f   : > { %p5378_p3 = scmp.ne.s32.totalorder %s7447_s0, %s5377_s24  ;;  %p5382_p2 = scmp.lt.s32.totalorder %s7447_s0, %s7753_s10 }
 0xb80   : > { %p5383_p4 = scmp.lt.s32.totalorder %s5381_s9, %s5377_s24 }
 0xb81   : > { %p5379_p12 = pnand %p5378_p3, %p7754_p1 }
 0xb82   : > { %p5384_p8 = por %p5383_p4, %p5382_p2 }
 0xb83   : > { %p5380_p11 = pneg %p5379_p12 }
 0xb85   : > { %p5385_p9 = pnand %p5384_p8, %p5380_p11 }
 0xb87   : > { %5388 = shalt.err (!%p5385_p9)
}
 0xb88   : > { %s5494_s13 = smov 128   ;;  %s5495_s22 = smov 8   ;;  %v4116_v57 = vpop.permute.xlu1 %4115 }
 0xb89   : > { %4701 = dma.vmem_to_hbm [thread:$0]  (%p7754_p1), %s7449_s12, 2048, %s7447_s0, %s4122_s26, %s5494_s13, %s5494_s13, %s5495_s22  }
 0xb8a   : > { %s7755_s24 = sld [smem:[#allocation75_spill]]  ;;  %4120 = vst.msk [vmem:[%s7431_s20 + $0x8] sm:$0xff] %vm673_vm0, %v4116_v57  ;;  %s4127_s6 = scalar_lea.sflag [#allocation16], %s5777_s15 }
 0xb8b   : > { %s5389_s9 = scalar_lea.vmem %s7452_s14, 256  ;;  %s5496_s21 = smov [#allocation15]  }
 0xb8c   : > { %p5390_p10 = scmp.ne.s32.totalorder %s7452_s14, %s5389_s9  ;;  %s5393_s17 = sshll.u32 %s5496_s21, 4  ;;  %s5394_s17 = int_to_ptr.vmem [resolvable:$false] %s5393_s17 }
 0xb8d   : > { %s5395_s1 = scalar_lea.vmem %s5394_s17, 512  ;;  %p5396_p6 = scmp.lt.s32.totalorder %s7452_s14, %s5394_s17 }
 0xb8e   : > { %p5391_p0 = pnand %p5390_p10, %p7754_p1  ;;  %p5397_p13 = scmp.lt.s32.totalorder %s5395_s1, %s5389_s9 }
 0xb90   : > { %s7487_s8 = scalar_lea.hbm %s7755_s24, %s4467_s28  ;;  %p5392_p5 = pneg %p5391_p0 }
 0xb91   : > { %p5398_p7 = por %p5397_p13, %p5396_p6 }
 0xb93   : > { %p5399_p3 = pnand %p5398_p7, %p5392_p5 }
 0xb95   : > { %5402 = shalt.err (!%p5399_p3)
}
 0xb96   : > { %s5403_s19 = scalar_lea.hbm %s7487_s8, 256  ;;  %s5407_s12 = scalar_lea.hbm %s7755_s24, 512 }
 0xb97   : > { %p5404_p12 = scmp.ne.s32.totalorder %s7487_s8, %s5403_s19  ;;  %p5408_p4 = scmp.lt.s32.totalorder %s7487_s8, %s7755_s24 }
 0xb98   : > { %p5409_p8 = scmp.lt.s32.totalorder %s5407_s12, %s5403_s19 }
 0xb99   : > { %p5405_p11 = pnand %p5404_p12, %p7754_p1 }
 0xb9a   : > { %p5410_p9 = por %p5409_p8, %p5408_p4 }
 0xb9b   : > { %p5406_p2 = pneg %p5405_p11 }
 0xb9d   : > { %p5411_p10 = pnand %p5410_p9, %p5406_p2 }
 0xb9f   : > { %5414 = shalt.err (!%p5411_p10)
}
 0xba0   : > { %4702 = dma.vmem_to_hbm [thread:$0]  (%p7754_p1), %s7452_s14, 256, %s7487_s8, %s4127_s6, %s5494_s13, %s5494_s13, %s5495_s22  }
 0xba1 PF: > { %s4171_s1 = sand.u32 1, %s5461_s29   ;;  %p7756_p0 = scmp.ne.s32.totalorder %s7633_s25, 0 }
 0xba2   : > { %p7757_p5 = scmp.ge.s32.totalorder %s5473_s16, 2  ;;  %s4172_s26 = scalar_lea.sflag [#allocation4], %s4171_s1 }
 0xba4   : > { %p4729_p6 = pnand %p7757_p5, %p7756_p0 }
 0xba6   : > { %p4730_p13 = pneg %p4729_p6 }
 0xba8   : > { %5452 = dma.done.wait (%p4730_p13), %s4172_s26, 2048  }
 0xba9   : > { %5454 = vsyncadd (%p4730_p13), %s4172_s26, 4294965248  ;;  %s4181_s5 = scalar_lea.sflag [#allocation16], %s4171_s1 }
 0xbaa   : > { %5456 = dma.done.wait (%p4730_p13), %s4181_s5, 256  }
 0xbab   : > { %5458 = vsyncadd (%p4730_p13), %s4181_s5, 4294967040  ;;  %s7758_s18 = sld [smem:[#allocation24_spill]]  ;;  %p36_p1 = scmp.ge.s32.totalorder %s5661_s23, 4  }
 0xbac   : > { %s7759_s15 = sld [smem:[#allocation25_spill]]  ;;  %s7760_s29 = smov %s5465_s30 }
 0xbad   : > { %s7762_s16 = smov %s5661_s23  ;;  %38 = sbr.rel (!%p36_p1) target bundleno = 22 (0x16), region = 167 }
 0xbb1   : > { %s7761_s30 = smov %s7758_s18 }
 0xbb2   :  { %4186 = vsyncpa [#allocation3], 1 }
 0xbb3   :  { %4188 = vsyncpa [#allocation3 + $0x1], 1 }
 0xbb4   :  { %4189 = vsyncpa [#allocation6], 1 }
 0xbb5   :  { %4191 = vsyncpa [#allocation6 + $0x1], 1 }
 0xbb6   :  { %4192 = vsyncpa [#allocation9], 1 }
 0xbb7   :  { %4193 = vsyncpa [#allocation12], 1 }
 0xbb8   :  { %4194 = vsyncpa [#allocation4], 1 }
 0xbb9   :  { %4196 = vsyncpa [#allocation4 + $0x1], 1 }
 0xbba   :  { %4197 = vsyncpa [#allocation16], 1 }
 0xbbb   :  { %4199 = vsyncpa [#allocation16 + $0x1], 1 }

</bundles_post_ra>
